<compile_context>
chip_gen: v7x
topology: tpu7x:2x2x1
jax: 0.10.0
libtpu: 0.0.40
codegen_flags: <defaults>
</compile_context>

<pallas_src>
import functools

import jax
import jax.numpy as jnp
from jax.experimental import pallas as pl
from jax.experimental.pallas import tpu as pltpu

EPS = 1e-5
LANE = 128
_NUM_CORE_SPLITS = 2          # leading "parallel" grid axis (v7x megacore)


def _cdiv(a, b):
    return -(-a // b)


def _round_up(a, b):
    return _cdiv(a, b) * b


def _vmem_limit_bytes():
    # Generation-dependent VMEM budget: ~3/4 of physical, capped at 96 MiB
    # (=> 48 MiB on v7x's 64 MiB VMEM, 96 MiB on 128 MiB v5e/v6e parts).
    try:
        cap = pltpu.get_tpu_info().vmem_capacity_bytes
    except Exception:  # conservative fallback
        return 48 * 1024 * 1024
    return int(min(max(cap * 3 // 4, 32 * 1024 * 1024), 96 * 1024 * 1024))


# --------------------------------------------------------------------------- #
# Kernel A: per-channel sum / sum-of-squares of x (BN1 batch statistics).
# Grid (core_split, row_tiles); resident (1, 8, Cp) accumulators per split.
# --------------------------------------------------------------------------- #
def _bn_stats_kernel(x_ref, sum_ref, sq_ref):
    @pl.when(pl.program_id(1) == 0)
    def _():
        sum_ref[...] = jnp.zeros_like(sum_ref)
        sq_ref[...] = jnp.zeros_like(sq_ref)

    x = x_ref[...]                                   # (TR, W, Cp) f32; pad rows 0
    tr, w, cp = x.shape
    rows = tr * w
    x2 = x.reshape(rows, cp)
    rows_p = _round_up(rows, 8)
    if rows_p != rows:
        x2 = jnp.pad(x2, ((0, rows_p - rows), (0, 0)))
    xr = x2.reshape(rows_p // 8, 8, cp)              # sublane-aligned partial reduce
    sum_ref[...] += jnp.sum(xr, axis=0)[None]
    sq_ref[...] += jnp.sum(xr * xr, axis=0)[None]


# --------------------------------------------------------------------------- #
# Kernel B: h = ReLU(x @ w1' + bias1)  (BN1 folded into w1'/bias1), with the
# BN2 sum / sum-of-squares accumulation fused into the same tiled pass.
# --------------------------------------------------------------------------- #
def _stage1_kernel(x_ref, w1_ref, b1_ref, h_ref, sum_ref, sq_ref, *, matmul_dtype):
    @pl.when(pl.program_id(1) == 0)
    def _():
        sum_ref[...] = jnp.zeros_like(sum_ref)
        sq_ref[...] = jnp.zeros_like(sq_ref)

    x = x_ref[...]                                   # (TR, W, Cp) f32
    tr, w, cp = x.shape
    rows = tr * w
    x2 = x.reshape(rows, cp)
    if jnp.dtype(matmul_dtype) != jnp.dtype(jnp.float32):
        x2 = x2.astype(matmul_dtype)
    h = jnp.dot(x2, w1_ref[...], preferred_element_type=jnp.float32) + b1_ref[...]
    h = jnp.maximum(h, 0.0)                          # ReLU (StandardBlock default)
    h_ref[...] = h.reshape(tr, w, cp).astype(h_ref.dtype)

    # BN2 statistics from the f32 pre-cast h.  The zero-padded tail rows each
    # contribute exactly ReLU(bias1); that is subtracted analytically in
    # _finalize_bn (no per-step iota / mask over the whole block).
    rows_p = _round_up(rows, 8)
    hp = h if rows_p == rows else jnp.pad(h, ((0, rows_p - rows), (0, 0)))
    hr = hp.reshape(rows_p // 8, 8, cp)
    sum_ref[...] += jnp.sum(hr, axis=0)[None]
    sq_ref[...] += jnp.sum(hr * hr, axis=0)[None]


# --------------------------------------------------------------------------- #
# Kernel C: BN2 affine (zero-padding applied AFTER the affine, PyTorch order)
# + KxK conv with im2col fused in-kernel + ReLU.  Grid = (batch, TOH-row tile);
# TOH*S + K - 1 unpadded h rows are streamed per step and the kw taps are
# merged into the contraction: K matmuls of (TOH*OW, K*Cp) @ (K*Cp, Cop).
# --------------------------------------------------------------------------- #
def _stage2_kernel(*refs, ksize, stride, pad, height, width, out_w, toh,
                   matmul_dtype):
    rows_in = toh * stride + ksize - 1
    row_refs = refs[:rows_in]
    w2_ref, a2_ref, c2_ref, o_ref = refs[rows_in:]

    base = pl.program_id(1) * (toh * stride) - pad   # image row of row_refs[0]
    a2 = a2_ref[...]                                 # (1, Cp) f32
    c2 = c2_ref[...]
    cp = row_refs[0].shape[-1]
    cop = o_ref.shape[-1]

    # BN2 affine per fetched row; out-of-image rows (the conv's spatial zero
    # padding) are zeroed AFTER the affine -- PyTorch pads the BN output.
    rows = []
    for r in range(rows_in):
        ok = jnp.logical_and(base + r >= 0, base + r < height)
        keep = jnp.where(ok, 1.0, 0.0)
        row = row_refs[r][...]                       # (1, W, Cp)
        row = (row * a2[None] + c2[None]) * keep
        rows.append(row.astype(matmul_dtype))
    rn = jnp.concatenate(rows, axis=0)               # (rows_in, W, Cp)

    # Width-shifted windows per kw, concatenated on the lane axis so the kw
    # taps land in the matmul contraction (K*Cp deep -> fills v6e/v7x MXU).
    wnds = []
    for kw in range(ksize):
        ow_lo = max(0, -((kw - pad) // stride))
        ow_hi = min(out_w, (width - 1 - kw + pad) // stride + 1)
        if ow_hi <= ow_lo:
            wnds.append(jnp.zeros((rows_in, out_w, cp), matmul_dtype))
            continue
        n_valid = ow_hi - ow_lo
        col_lo = ow_lo * stride + kw - pad
        # TODO(synk): stride > 1 relies on a strided sublane slice (untested;
        # the module instance under test uses stride=1 -> contiguous slice).
        piece = rn[:, col_lo:col_lo + (n_valid - 1) * stride + 1:stride, :]
        parts = []
        if ow_lo > 0:
            parts.append(jnp.zeros((rows_in, ow_lo, cp), matmul_dtype))
        parts.append(piece)
        if ow_hi < out_w:
            parts.append(jnp.zeros((rows_in, out_w - ow_hi, cp), matmul_dtype))
        wnds.append(jnp.concatenate(parts, axis=1) if len(parts) > 1 else piece)
    wnd_all = jnp.concatenate(wnds, axis=-1)         # (rows_in, OW, K*Cp)

    m_rows = toh * out_w
    acc = jnp.zeros((m_rows, cop), jnp.float32)
    for kh in range(ksize):
        lhs = wnd_all[kh:kh + (toh - 1) * stride + 1:stride]   # (TOH, OW, K*Cp)
        lhs = lhs.reshape(m_rows, lhs.shape[-1])
        acc = acc + jnp.dot(lhs, w2_ref[kh], preferred_element_type=jnp.float32)
    o_ref[...] = jnp.maximum(acc, 0.0).reshape(o_ref.shape)    # ReLU, bias=False


def _finalize_bn(sums, sqs, count, gamma, beta, sum_corr=None, sq_corr=None):
    """O(C) glue: batch mean / biased var -> per-channel affine a, c.
    Optional corrections remove the analytically known contribution of the
    zero-padded tail rows processed by the tiled kernels."""
    s = jnp.sum(sums, axis=tuple(range(sums.ndim - 1)))
    ss = jnp.sum(sqs, axis=tuple(range(sqs.ndim - 1)))
    if sum_corr is not None:
        s = s - sum_corr
    if sq_corr is not None:
        ss = ss - sq_corr
    mu = s / count
    # TODO(synk): one-pass E[x^2]-mu^2 (clamped) is fine in f32; use a shifted
    # two-pass formulation if bf16 activations ever feed the statistics.
    var = jnp.maximum(ss / count - mu * mu, 0.0)
    a = gamma * jax.lax.rsqrt(var + EPS)
    c = beta - mu * a
    return a, c


def conv_conv_block(x_nchw, params, *, kernel_size, stride, padding,
                    matmul_dtype=jnp.float32):
    # TODO(synk): GLU activation branch of StandardBlock not implemented
    # (module default is ReLU, which is what this kernel implements).
    g1, b1, w1, g2, b2, w2 = (params[k] for k in ("g1", "b1", "w1", "g2", "b2", "w2"))
    N, Cin, H, W = x_nchw.shape
    K, S, P = kernel_size, stride, padding
    Cout = w2.shape[0]                               # torch OIHW: (Cout, Cin, K, K)
    OH = (H + 2 * P - K) // S + 1
    OW = (W + 2 * P - K) // S + 1
    f32 = jnp.float32

    # TODO(synk): for Cin << 128 the lane padding below inflates HBM traffic
    # (demo Cin=4 -> Cp=128); a W-on-lanes layout would remove it but changes
    # the whole stage-1 matmul layout.
    Cp = _round_up(Cin, LANE)
    Cop = _round_up(Cout, LANE)

    # ---- row-group tiling for the two streaming passes -----------------------
    NH = N * H
    target_rows = 1024 if Cp <= 256 else 512         # ~85% of HBM roofline
    TR = max(1, min(NH, max(1, target_rows // max(W, 1))))
    nPC = _cdiv(_cdiv(NH, TR), _NUM_CORE_SPLITS)     # row tiles per core split
    NRp = _NUM_CORE_SPLITS * nPC * TR
    vmem_limit = _vmem_limit_bytes()

    # ---- glue: NCHW -> channels-last (N*H, W, C), zero-pad rows & channels ---
    x3 = jnp.transpose(x_nchw, (0, 2, 3, 1)).astype(f32).reshape(NH, W, Cin)
    x3 = jnp.pad(x3, ((0, NRp - NH), (0, 0), (0, Cp - Cin)))
    g1p, b1p = jnp.pad(g1, (0, Cp - Cin)), jnp.pad(b1, (0, Cp - Cin))
    g2p, b2p = jnp.pad(g2, (0, Cp - Cin)), jnp.pad(b2, (0, Cp - Cin))

    cparams_red = pltpu.CompilerParams(
        dimension_semantics=("parallel", "arbitrary"),   # per-split resident acc
        vmem_limit_bytes=vmem_limit)

    # ---- Kernel A: BN1 batch statistics (tiled reduction) --------------------
    sum1, sq1 = pl.pallas_call(
        _bn_stats_kernel,
        grid=(_NUM_CORE_SPLITS, nPC),
        in_specs=[pl.BlockSpec((TR, W, Cp), lambda c, i: (c * nPC + i, 0, 0))],
        out_specs=(pl.BlockSpec((1, 8, Cp), lambda c, i: (c, 0, 0)),
                   pl.BlockSpec((1, 8, Cp), lambda c, i: (c, 0, 0))),
        out_shape=(jax.ShapeDtypeStruct((_NUM_CORE_SPLITS, 8, Cp), f32),
                   jax.ShapeDtypeStruct((_NUM_CORE_SPLITS, 8, Cp), f32)),
        compiler_params=cparams_red,
    )(x3)
    a1, c1 = _finalize_bn(sum1, sq1, NH * W, g1p, b1p)

    # ---- glue: fold BN1 into the 1x1-conv weights (O(C^2), negligible) -------
    w1_mat = jnp.transpose(w1[:, :, 0, 0], (1, 0))   # (Cin_in, Cin_out): x @ W1
    w1p = jnp.pad(w1_mat, ((0, Cp - Cin), (0, Cp - Cin))).astype(f32)
    w1f = (a1[:, None] * w1p).astype(matmul_dtype)
    bias1 = (c1 @ w1p).reshape(1, Cp).astype(f32)

    # ---- Kernel B: stage-1 matmul + ReLU, fused BN2 statistics ---------------
    h3, sum2, sq2 = pl.pallas_call(
        functools.partial(_stage1_kernel, matmul_dtype=matmul_dtype),
        grid=(_NUM_CORE_SPLITS, nPC),
        in_specs=[pl.BlockSpec((TR, W, Cp), lambda c, i: (c * nPC + i, 0, 0)),
                  pl.BlockSpec((Cp, Cp), lambda c, i: (0, 0)),
                  pl.BlockSpec((1, Cp), lambda c, i: (0, 0))],
        out_specs=(pl.BlockSpec((TR, W, Cp), lambda c, i: (c * nPC + i, 0, 0)),
                   pl.BlockSpec((1, 8, Cp), lambda c, i: (c, 0, 0)),
                   pl.BlockSpec((1, 8, Cp), lambda c, i: (c, 0, 0))),
        out_shape=(jax.ShapeDtypeStruct((NRp, W, Cp), matmul_dtype),
                   jax.ShapeDtypeStruct((_NUM_CORE_SPLITS, 8, Cp), f32),
                   jax.ShapeDtypeStruct((_NUM_CORE_SPLITS, 8, Cp), f32)),
        compiler_params=cparams_red,
    )(x3, w1f, bias1)

    # Remove the zero-padded tail rows' ReLU(bias1) contribution analytically.
    n_pad = (NRp - NH) * W
    relu_b1 = jnp.maximum(bias1[0], 0.0)
    a2, c2 = _finalize_bn(sum2, sq2, NH * W, g2p, b2p,
                          sum_corr=n_pad * relu_b1,
                          sq_corr=n_pad * relu_b1 * relu_b1)
    a2r, c2r = a2.reshape(1, Cp).astype(f32), c2.reshape(1, Cp).astype(f32)

    # ---- Kernel C: BN2 apply + KxK conv (im2col fused in-kernel) + ReLU ------
    TOH = max(1, min(OH, max(1, 128 // max(OW, 1))))   # ~128 matmul rows / step
    OHp = _round_up(OH, TOH)
    rows_in = TOH * S + K - 1
    row_step = TOH * S

    # torch (Cout, Cin, K, K) -> (kh, kw*Cp + ci, co): each kh tap is a single
    # matmul with a K*Cp-deep contraction.
    w2p = jnp.pad(jnp.transpose(w2, (2, 3, 1, 0)),
                  ((0, 0), (0, 0), (0, Cp - Cin), (0, Cop - Cout)))
    w2p = w2p.reshape(K, K * Cp, Cop).astype(matmul_dtype)
    # TODO(synk): for very large Cp*Cop add a Cout-tile grid axis (or pin the
    # weight single-buffered) so the weight block stays within v7x's VMEM.

    # One input spec per needed h row; the row index is clamped in the
    # index_map and out-of-image rows are zeroed in-kernel, so h needs no
    # spatially padded HBM copy and is re-read only (TOH+K-1)/TOH times.
    row_specs = [
        pl.BlockSpec(
            (1, W, Cp),
            (lambda n, t, r=r: (
                n * H + jnp.minimum(jnp.maximum(t * row_step + (r - P), 0), H - 1),
                0, 0)))
        for r in range(rows_in)
    ]
    o = pl.pallas_call(
        functools.partial(_stage2_kernel, ksize=K, stride=S, pad=P, height=H,
                          width=W, out_w=OW, toh=TOH, matmul_dtype=matmul_dtype),
        grid=(N, OHp // TOH),
        in_specs=row_specs + [
            pl.BlockSpec((K, K * Cp, Cop), lambda n, t: (0, 0, 0)),
            pl.BlockSpec((1, Cp), lambda n, t: (0, 0)),
            pl.BlockSpec((1, Cp), lambda n, t: (0, 0)),
        ],
        out_specs=pl.BlockSpec((1, TOH, OW, Cop), lambda n, t: (n, t, 0, 0)),
        out_shape=jax.ShapeDtypeStruct((N, OHp, OW, Cop), f32),
        compiler_params=pltpu.CompilerParams(
            dimension_semantics=("parallel", "parallel"),   # megacore-friendly
            vmem_limit_bytes=vmem_limit),
    )(*([h3] * rows_in), w2p, a2r, c2r)

    return jnp.transpose(o[:, :OH, :, :Cout], (0, 3, 1, 2))    # back to NCHW


def reference(x_nchw, params, *, kernel_size, stride, padding):
    """Pure-JAX reference mirroring the PyTorch training-mode forward."""
    def bn(x, g, b):
        mu = jnp.mean(x, axis=(0, 2, 3), keepdims=True)
        var = jnp.mean((x - mu) ** 2, axis=(0, 2, 3), keepdims=True)
        return ((x - mu) * jax.lax.rsqrt(var + EPS)
                * g.reshape(1, -1, 1, 1) + b.reshape(1, -1, 1, 1))

    dn = ("NCHW", "OIHW", "NCHW")
    hi = jax.lax.Precision.HIGHEST
    h = bn(x_nchw, params["g1"], params["b1"])
    h = jax.lax.conv_general_dilated(h, params["w1"], (1, 1), "VALID",
                                     dimension_numbers=dn, precision=hi)
    h = jnp.maximum(h, 0.0)
    h = bn(h, params["g2"], params["b2"])
    h = jax.lax.conv_general_dilated(h, params["w2"], (stride, stride),
                                     [(padding, padding), (padding, padding)],
                                     dimension_numbers=dn, precision=hi)
    return jnp.maximum(h, 0.0)


if __name__ == "__main__":
    # ConvConvBlock(inputfilter=4, outputfilter=8, kernel_size=3, stride=1, padding=1)
    inputfilter, outputfilter, kernel_size, stride, padding = 4, 8, 3, 1, 1
    N, H, W = 2, 16, 16

    key = jax.random.PRNGKey(0)
    kx, k1, k2, k3, k4, k5, k6 = jax.random.split(key, 7)
    x = jax.random.normal(kx, (N, inputfilter, H, W), jnp.float32)

    params = {
        # BN1 / BN2 affine parameters (deterministic, non-trivial)
        "g1": 1.0 + 0.1 * jax.random.normal(k1, (inputfilter,), jnp.float32),
        "b1": 0.1 * jax.random.normal(k2, (inputfilter,), jnp.float32),
        "g2": 1.0 + 0.1 * jax.random.normal(k3, (inputfilter,), jnp.float32),
        "b2": 0.1 * jax.random.normal(k4, (inputfilter,), jnp.float32),
        # Conv weights in torch OIHW layout, no biases (bn=True in both blocks)
        "w1": 0.3 * jax.random.normal(k5, (inputfilter, inputfilter, 1, 1), jnp.float32),
        "w2": 0.3 * jax.random.normal(
            k6, (outputfilter, inputfilter, kernel_size, kernel_size), jnp.float32),
    }

    # f32 matmuls / f32 h storage here so the result can be checked tightly
    # against the f32 reference; pass matmul_dtype=jnp.bfloat16 on v6e/v7x for
    # higher MXU throughput and half the h HBM traffic (loosen the tolerance).
    run = functools.partial(conv_conv_block, kernel_size=kernel_size,
                            stride=stride, padding=padding)
    out = jax.block_until_ready(jax.jit(run)(x, params))

    ref = reference(x, params, kernel_size=kernel_size, stride=stride, padding=padding)
    assert out.shape == ref.shape == (N, outputfilter, H, W), (out.shape, ref.shape)
    max_err = float(jnp.max(jnp.abs(out - ref)))
    assert jnp.allclose(out, ref, rtol=1e-4, atol=1e-4), max_err

    print("KERNEL_OK")
</pallas_src>

<mosaic_0001>
module attributes {stable_mosaic.version = 11 : i64} {
  func.func @_bn_stats_kernel(%arg0: i32, %arg1: i32, %arg2: memref<32x16x128xf32, #tpu.memory_space<vmem>>, %arg3: memref<1x8x128xf32, #tpu.memory_space<vmem>>, %arg4: memref<1x8x128xf32, #tpu.memory_space<vmem>>) attributes {dimension_semantics = [#tpu.dimension_semantics<parallel>, #tpu.dimension_semantics<arbitrary>], iteration_bounds = array<i64: 2, 1>, scalar_prefetch = 0 : i64, scratch_operands = 0 : i64, tpu.core_type = #tpu.core_type<tc>, window_params = [{transform_indices = @transform_0, window_bounds = array<i64: 32, 16, 128>}, {transform_indices = @transform_1, window_bounds = array<i64: 1, 8, 128>}, {transform_indices = @transform_2, window_bounds = array<i64: 1, 8, 128>}]} {
    %c0_i32 = arith.constant 0 : i32
    %0 = arith.cmpi eq, %arg1, %c0_i32 : i32
    %1 = arith.extui %0 : i1 to i32
    %c0_i32_0 = arith.constant 0 : i32
    %2 = arith.cmpi ne, %1, %c0_i32_0 : i32
    scf.if %2 {
      %cst_16 = arith.constant 0.000000e+00 : f32
      %17 = vector.broadcast %cst_16 : f32 to vector<1x8x128xf32>
      %c0_17 = arith.constant 0 : index
      %c0_18 = arith.constant 0 : index
      %c0_19 = arith.constant 0 : index
      %18 = vector.load %arg3[%c0_17, %c0_18, %c0_19] : memref<1x8x128xf32, #tpu.memory_space<vmem>>, vector<1x8x128xf32>
      tpu.vector_store %arg3[%c0_17, %c0_18, %c0_19], %17 {strides = array<i32>} : memref<1x8x128xf32, #tpu.memory_space<vmem>>, vector<1x8x128xf32>,
      %cst_20 = arith.constant 0.000000e+00 : f32
      %19 = vector.broadcast %cst_20 : f32 to vector<1x8x128xf32>
      %c0_21 = arith.constant 0 : index
      %c0_22 = arith.constant 0 : index
      %c0_23 = arith.constant 0 : index
      %20 = vector.load %arg4[%c0_21, %c0_22, %c0_23] : memref<1x8x128xf32, #tpu.memory_space<vmem>>, vector<1x8x128xf32>
      tpu.vector_store %arg4[%c0_21, %c0_22, %c0_23], %19 {strides = array<i32>} : memref<1x8x128xf32, #tpu.memory_space<vmem>>, vector<1x8x128xf32>,
    } else {
    }
    %c0 = arith.constant 0 : index
    %c0_1 = arith.constant 0 : index
    %c0_2 = arith.constant 0 : index
    %3 = vector.load %arg2[%c0, %c0_1, %c0_2] : memref<32x16x128xf32, #tpu.memory_space<vmem>>, vector<32x16x128xf32>
    %4 = vector.shape_cast %3 : vector<32x16x128xf32> to vector<512x128xf32>
    %5 = vector.shape_cast %4 : vector<512x128xf32> to vector<64x8x128xf32>
    %c0_3 = arith.constant 0 : index
    %c0_4 = arith.constant 0 : index
    %c0_5 = arith.constant 0 : index
    %6 = vector.load %arg3[%c0_3, %c0_4, %c0_5] : memref<1x8x128xf32, #tpu.memory_space<vmem>>, vector<1x8x128xf32>
    %cst = arith.constant dense<0.000000e+00> : vector<8x128xf32>
    %7 = vector.multi_reduction <add>, %5, %cst [0] : vector<64x8x128xf32> to vector<8x128xf32>
    %8 = vector.shape_cast %7 : vector<8x128xf32> to vector<1x8x128xf32>
    %9 = arith.addf %6, %8 : vector<1x8x128xf32>
    %c0_6 = arith.constant 0 : index
    %c0_7 = arith.constant 0 : index
    %c0_8 = arith.constant 0 : index
    %10 = vector.load %arg3[%c0_6, %c0_7, %c0_8] : memref<1x8x128xf32, #tpu.memory_space<vmem>>, vector<1x8x128xf32>
    tpu.vector_store %arg3[%c0_6, %c0_7, %c0_8], %9 {strides = array<i32>} : memref<1x8x128xf32, #tpu.memory_space<vmem>>, vector<1x8x128xf32>,
    %c0_9 = arith.constant 0 : index
    %c0_10 = arith.constant 0 : index
    %c0_11 = arith.constant 0 : index
    %11 = vector.load %arg4[%c0_9, %c0_10, %c0_11] : memref<1x8x128xf32, #tpu.memory_space<vmem>>, vector<1x8x128xf32>
    %12 = arith.mulf %5, %5 : vector<64x8x128xf32>
    %cst_12 = arith.constant dense<0.000000e+00> : vector<8x128xf32>
    %13 = vector.multi_reduction <add>, %12, %cst_12 [0] : vector<64x8x128xf32> to vector<8x128xf32>
    %14 = vector.shape_cast %13 : vector<8x128xf32> to vector<1x8x128xf32>
    %15 = arith.addf %11, %14 : vector<1x8x128xf32>
    %c0_13 = arith.constant 0 : index
    %c0_14 = arith.constant 0 : index
    %c0_15 = arith.constant 0 : index
    %16 = vector.load %arg4[%c0_13, %c0_14, %c0_15] : memref<1x8x128xf32, #tpu.memory_space<vmem>>, vector<1x8x128xf32>
    tpu.vector_store %arg4[%c0_13, %c0_14, %c0_15], %15 {strides = array<i32>} : memref<1x8x128xf32, #tpu.memory_space<vmem>>, vector<1x8x128xf32>,
    return
  }
  func.func @transform_0(%arg0: i32, %arg1: i32) -> (i32, i32, i32) {
    %c1_i32 = arith.constant 1 : i32
    %0 = arith.muli %arg0, %c1_i32 : i32
    %1 = arith.addi %0, %arg1 : i32
    %c0_i32 = arith.constant 0 : i32
    %c0_i32_0 = arith.constant 0 : i32
    %c0_i32_1 = arith.constant 0 : i32
    return %1, %c0_i32, %c0_i32_0 : i32, i32, i32
  }
  func.func @transform_1(%arg0: i32, %arg1: i32) -> (i32, i32, i32) {
    %c0_i32 = arith.constant 0 : i32
    %c0_i32_0 = arith.constant 0 : i32
    %c0_i32_1 = arith.constant 0 : i32
    return %arg0, %c0_i32, %c0_i32_0 : i32, i32, i32
  }
  func.func @transform_2(%arg0: i32, %arg1: i32) -> (i32, i32, i32) {
    %c0_i32 = arith.constant 0 : i32
    %c0_i32_0 = arith.constant 0 : i32
    %c0_i32_1 = arith.constant 0 : i32
    return %arg0, %c0_i32, %c0_i32_0 : i32, i32, i32
  }
}

module attributes {stable_mosaic.version = 11 : i64} {
  func.func @_stage1_kernel(%arg0: i32, %arg1: i32, %arg2: memref<32x16x128xf32, #tpu.memory_space<vmem>>, %arg3: memref<128x128xf32, #tpu.memory_space<vmem>>, %arg4: memref<1x128xf32, #tpu.memory_space<vmem>>, %arg5: memref<32x16x128xf32, #tpu.memory_space<vmem>>, %arg6: memref<1x8x128xf32, #tpu.memory_space<vmem>>, %arg7: memref<1x8x128xf32, #tpu.memory_space<vmem>>) attributes {dimension_semantics = [#tpu.dimension_semantics<parallel>, #tpu.dimension_semantics<arbitrary>], iteration_bounds = array<i64: 2, 1>, scalar_prefetch = 0 : i64, scratch_operands = 0 : i64, tpu.core_type = #tpu.core_type<tc>, window_params = [{transform_indices = @transform_0, window_bounds = array<i64: 32, 16, 128>}, {pipeline_mode = #tpu.pipeline_mode<synchronous>, transform_indices = @transform_1, window_bounds = array<i64: 128, 128>}, {pipeline_mode = #tpu.pipeline_mode<synchronous>, transform_indices = @transform_2, window_bounds = array<i64: 1, 128>}, {transform_indices = @transform_3, window_bounds = array<i64: 32, 16, 128>}, {transform_indices = @transform_4, window_bounds = array<i64: 1, 8, 128>}, {transform_indices = @transform_5, window_bounds = array<i64: 1, 8, 128>}]} {
    %c0_i32 = arith.constant 0 : i32
    %0 = arith.cmpi eq, %arg1, %c0_i32 : i32
    %1 = arith.extui %0 : i1 to i32
    %c0_i32_0 = arith.constant 0 : i32
    %2 = arith.cmpi ne, %1, %c0_i32_0 : i32
    scf.if %2 {
      %cst_25 = arith.constant 0.000000e+00 : f32
      %26 = vector.broadcast %cst_25 : f32 to vector<1x8x128xf32>
      %c0_26 = arith.constant 0 : index
      %c0_27 = arith.constant 0 : index
      %c0_28 = arith.constant 0 : index
      %27 = vector.load %arg6[%c0_26, %c0_27, %c0_28] : memref<1x8x128xf32, #tpu.memory_space<vmem>>, vector<1x8x128xf32>
      tpu.vector_store %arg6[%c0_26, %c0_27, %c0_28], %26 {strides = array<i32>} : memref<1x8x128xf32, #tpu.memory_space<vmem>>, vector<1x8x128xf32>,
      %cst_29 = arith.constant 0.000000e+00 : f32
      %28 = vector.broadcast %cst_29 : f32 to vector<1x8x128xf32>
      %c0_30 = arith.constant 0 : index
      %c0_31 = arith.constant 0 : index
      %c0_32 = arith.constant 0 : index
      %29 = vector.load %arg7[%c0_30, %c0_31, %c0_32] : memref<1x8x128xf32, #tpu.memory_space<vmem>>, vector<1x8x128xf32>
      tpu.vector_store %arg7[%c0_30, %c0_31, %c0_32], %28 {strides = array<i32>} : memref<1x8x128xf32, #tpu.memory_space<vmem>>, vector<1x8x128xf32>,
    } else {
    }
    %c0 = arith.constant 0 : index
    %c0_1 = arith.constant 0 : index
    %c0_2 = arith.constant 0 : index
    %3 = vector.load %arg2[%c0, %c0_1, %c0_2] : memref<32x16x128xf32, #tpu.memory_space<vmem>>, vector<32x16x128xf32>
    %4 = vector.shape_cast %3 : vector<32x16x128xf32> to vector<512x128xf32>
    %c0_3 = arith.constant 0 : index
    %c0_4 = arith.constant 0 : index
    %5 = vector.load %arg3[%c0_3, %c0_4] : memref<128x128xf32, #tpu.memory_space<vmem>>, vector<128x128xf32>
    %cst = arith.constant dense<0.000000e+00> : vector<512x128xf32>
    %6 = tpu.matmul %4, %5, %cst {dimension_numbers = #tpu.dot_dimension_numbers<[1], [0], [0], [1], [0, 0, 1, 1], [], []>} : vector<512x128xf32>, vector<128x128xf32>, vector<512x128xf32> -> vector<512x128xf32>
    %c0_5 = arith.constant 0 : index
    %c0_6 = arith.constant 0 : index
    %7 = vector.load %arg4[%c0_5, %c0_6] : memref<1x128xf32, #tpu.memory_space<vmem>>, vector<1x128xf32>
    %8 = vector.broadcast %7 : vector<1x128xf32> to vector<512x128xf32>
    %9 = arith.addf %6, %8 : vector<512x128xf32>
    %cst_7 = arith.constant 0.000000e+00 : f32
    %10 = vector.broadcast %cst_7 : f32 to vector<512x128xf32>
    %11 = arith.maximumf %9, %10 : vector<512x128xf32>
    %12 = vector.shape_cast %11 : vector<512x128xf32> to vector<32x16x128xf32>
    %c0_8 = arith.constant 0 : index
    %c0_9 = arith.constant 0 : index
    %c0_10 = arith.constant 0 : index
    %13 = vector.load %arg5[%c0_8, %c0_9, %c0_10] : memref<32x16x128xf32, #tpu.memory_space<vmem>>, vector<32x16x128xf32>
    tpu.vector_store %arg5[%c0_8, %c0_9, %c0_10], %12 {strides = array<i32>} : memref<32x16x128xf32, #tpu.memory_space<vmem>>, vector<32x16x128xf32>,
    %14 = vector.shape_cast %11 : vector<512x128xf32> to vector<64x8x128xf32>
    %c0_11 = arith.constant 0 : index
    %c0_12 = arith.constant 0 : index
    %c0_13 = arith.constant 0 : index
    %15 = vector.load %arg6[%c0_11, %c0_12, %c0_13] : memref<1x8x128xf32, #tpu.memory_space<vmem>>, vector<1x8x128xf32>
    %cst_14 = arith.constant dense<0.000000e+00> : vector<8x128xf32>
    %16 = vector.multi_reduction <add>, %14, %cst_14 [0] : vector<64x8x128xf32> to vector<8x128xf32>
    %17 = vector.shape_cast %16 : vector<8x128xf32> to vector<1x8x128xf32>
    %18 = arith.addf %15, %17 : vector<1x8x128xf32>
    %c0_15 = arith.constant 0 : index
    %c0_16 = arith.constant 0 : index
    %c0_17 = arith.constant 0 : index
    %19 = vector.load %arg6[%c0_15, %c0_16, %c0_17] : memref<1x8x128xf32, #tpu.memory_space<vmem>>, vector<1x8x128xf32>
    tpu.vector_store %arg6[%c0_15, %c0_16, %c0_17], %18 {strides = array<i32>} : memref<1x8x128xf32, #tpu.memory_space<vmem>>, vector<1x8x128xf32>,
    %c0_18 = arith.constant 0 : index
    %c0_19 = arith.constant 0 : index
    %c0_20 = arith.constant 0 : index
    %20 = vector.load %arg7[%c0_18, %c0_19, %c0_20] : memref<1x8x128xf32, #tpu.memory_space<vmem>>, vector<1x8x128xf32>
    %21 = arith.mulf %14, %14 : vector<64x8x128xf32>
    %cst_21 = arith.constant dense<0.000000e+00> : vector<8x128xf32>
    %22 = vector.multi_reduction <add>, %21, %cst_21 [0] : vector<64x8x128xf32> to vector<8x128xf32>
    %23 = vector.shape_cast %22 : vector<8x128xf32> to vector<1x8x128xf32>
    %24 = arith.addf %20, %23 : vector<1x8x128xf32>
    %c0_22 = arith.constant 0 : index
    %c0_23 = arith.constant 0 : index
    %c0_24 = arith.constant 0 : index
    %25 = vector.load %arg7[%c0_22, %c0_23, %c0_24] : memref<1x8x128xf32, #tpu.memory_space<vmem>>, vector<1x8x128xf32>
    tpu.vector_store %arg7[%c0_22, %c0_23, %c0_24], %24 {strides = array<i32>} : memref<1x8x128xf32, #tpu.memory_space<vmem>>, vector<1x8x128xf32>,
    return
  }
  func.func @transform_0(%arg0: i32, %arg1: i32) -> (i32, i32, i32) {
    %c1_i32 = arith.constant 1 : i32
    %0 = arith.muli %arg0, %c1_i32 : i32
    %1 = arith.addi %0, %arg1 : i32
    %c0_i32 = arith.constant 0 : i32
    %c0_i32_0 = arith.constant 0 : i32
    %c0_i32_1 = arith.constant 0 : i32
    return %1, %c0_i32, %c0_i32_0 : i32, i32, i32
  }
  func.func @transform_1(%arg0: i32, %arg1: i32) -> (i32, i32) {
    %c0_i32 = arith.constant 0 : i32
    %c0_i32_0 = arith.constant 0 : i32
    %c0_i32_1 = arith.constant 0 : i32
    return %c0_i32, %c0_i32_0 : i32, i32
  }
  func.func @transform_2(%arg0: i32, %arg1: i32) -> (i32, i32) {
    %c0_i32 = arith.constant 0 : i32
    %c0_i32_0 = arith.constant 0 : i32
    %c0_i32_1 = arith.constant 0 : i32
    return %c0_i32, %c0_i32_0 : i32, i32
  }
  func.func @transform_3(%arg0: i32, %arg1: i32) -> (i32, i32, i32) {
    %c1_i32 = arith.constant 1 : i32
    %0 = arith.muli %arg0, %c1_i32 : i32
    %1 = arith.addi %0, %arg1 : i32
    %c0_i32 = arith.constant 0 : i32
    %c0_i32_0 = arith.constant 0 : i32
    %c0_i32_1 = arith.constant 0 : i32
    return %1, %c0_i32, %c0_i32_0 : i32, i32, i32
  }
  func.func @transform_4(%arg0: i32, %arg1: i32) -> (i32, i32, i32) {
    %c0_i32 = arith.constant 0 : i32
    %c0_i32_0 = arith.constant 0 : i32
    %c0_i32_1 = arith.constant 0 : i32
    return %arg0, %c0_i32, %c0_i32_0 : i32, i32, i32
  }
  func.func @transform_5(%arg0: i32, %arg1: i32) -> (i32, i32, i32) {
    %c0_i32 = arith.constant 0 : i32
    %c0_i32_0 = arith.constant 0 : i32
    %c0_i32_1 = arith.constant 0 : i32
    return %arg0, %c0_i32, %c0_i32_0 : i32, i32, i32
  }
}

module attributes {stable_mosaic.version = 11 : i64} {
  func.func @_stage2_kernel(%arg0: i32, %arg1: i32, %arg2: memref<1x16x128xf32, #tpu.memory_space<vmem>>, %arg3: memref<1x16x128xf32, #tpu.memory_space<vmem>>, %arg4: memref<1x16x128xf32, #tpu.memory_space<vmem>>, %arg5: memref<1x16x128xf32, #tpu.memory_space<vmem>>, %arg6: memref<1x16x128xf32, #tpu.memory_space<vmem>>, %arg7: memref<1x16x128xf32, #tpu.memory_space<vmem>>, %arg8: memref<1x16x128xf32, #tpu.memory_space<vmem>>, %arg9: memref<1x16x128xf32, #tpu.memory_space<vmem>>, %arg10: memref<1x16x128xf32, #tpu.memory_space<vmem>>, %arg11: memref<1x16x128xf32, #tpu.memory_space<vmem>>, %arg12: memref<3x384x128xf32, #tpu.memory_space<vmem>>, %arg13: memref<1x128xf32, #tpu.memory_space<vmem>>, %arg14: memref<1x128xf32, #tpu.memory_space<vmem>>, %arg15: memref<1x8x16x128xf32, #tpu.memory_space<vmem>>) attributes {dimension_semantics = [#tpu.dimension_semantics<parallel>, #tpu.dimension_semantics<parallel>], iteration_bounds = array<i64: 2, 2>, scalar_prefetch = 0 : i64, scratch_operands = 0 : i64, tpu.core_type = #tpu.core_type<tc>, window_params = [{transform_indices = @transform_0, window_bounds = array<i64: 1, 16, 128>}, {transform_indices = @transform_1, window_bounds = array<i64: 1, 16, 128>}, {transform_indices = @transform_2, window_bounds = array<i64: 1, 16, 128>}, {transform_indices = @transform_3, window_bounds = array<i64: 1, 16, 128>}, {transform_indices = @transform_4, window_bounds = array<i64: 1, 16, 128>}, {transform_indices = @transform_5, window_bounds = array<i64: 1, 16, 128>}, {transform_indices = @transform_6, window_bounds = array<i64: 1, 16, 128>}, {transform_indices = @transform_7, window_bounds = array<i64: 1, 16, 128>}, {transform_indices = @transform_8, window_bounds = array<i64: 1, 16, 128>}, {transform_indices = @transform_9, window_bounds = array<i64: 1, 16, 128>}, {pipeline_mode = #tpu.pipeline_mode<synchronous>, transform_indices = @transform_10, window_bounds = array<i64: 3, 384, 128>}, {pipeline_mode = #tpu.pipeline_mode<synchronous>, transform_indices = @transform_11, window_bounds = array<i64: 1, 128>}, {pipeline_mode = #tpu.pipeline_mode<synchronous>, transform_indices = @transform_12, window_bounds = array<i64: 1, 128>}, {transform_indices = @transform_13, window_bounds = array<i64: 1, 8, 16, 128>}]} {
    %c8_i32 = arith.constant 8 : i32
    %0 = arith.muli %arg1, %c8_i32 : i32
    %c1_i32 = arith.constant 1 : i32
    %1 = arith.subi %0, %c1_i32 : i32
    %c0 = arith.constant 0 : index
    %c0_0 = arith.constant 0 : index
    %2 = vector.load %arg13[%c0, %c0_0] : memref<1x128xf32, #tpu.memory_space<vmem>>, vector<1x128xf32>
    %c0_1 = arith.constant 0 : index
    %c0_2 = arith.constant 0 : index
    %3 = vector.load %arg14[%c0_1, %c0_2] : memref<1x128xf32, #tpu.memory_space<vmem>>, vector<1x128xf32>
    %c0_i32 = arith.constant 0 : i32
    %4 = arith.addi %1, %c0_i32 : i32
    %c0_i32_3 = arith.constant 0 : i32
    %5 = arith.cmpi sge, %4, %c0_i32_3 : i32
    %c0_i32_4 = arith.constant 0 : i32
    %6 = arith.addi %1, %c0_i32_4 : i32
    %c16_i32 = arith.constant 16 : i32
    %7 = arith.cmpi slt, %6, %c16_i32 : i32
    %8 = arith.andi %5, %7 : i1
    %cst = arith.constant 1.000000e+00 : f32
    %cst_5 = arith.constant 0.000000e+00 : f32
    %9 = arith.select %8, %cst, %cst_5 : f32
    %c0_6 = arith.constant 0 : index
    %c0_7 = arith.constant 0 : index
    %c0_8 = arith.constant 0 : index
    %10 = vector.load %arg2[%c0_6, %c0_7, %c0_8] : memref<1x16x128xf32, #tpu.memory_space<vmem>>, vector<1x16x128xf32>
    %11 = vector.shape_cast %2 : vector<1x128xf32> to vector<1x1x128xf32>
    %12 = vector.broadcast %11 : vector<1x1x128xf32> to vector<1x16x128xf32>
    %13 = arith.mulf %10, %12 : vector<1x16x128xf32>
    %14 = vector.shape_cast %3 : vector<1x128xf32> to vector<1x1x128xf32>
    %15 = vector.broadcast %14 : vector<1x1x128xf32> to vector<1x16x128xf32>
    %16 = arith.addf %13, %15 : vector<1x16x128xf32>
    %17 = vector.broadcast %9 : f32 to vector<1x16x128xf32>
    %18 = arith.mulf %16, %17 : vector<1x16x128xf32>
    %c1_i32_9 = arith.constant 1 : i32
    %19 = arith.addi %1, %c1_i32_9 : i32
    %c0_i32_10 = arith.constant 0 : i32
    %20 = arith.cmpi sge, %19, %c0_i32_10 : i32
    %c1_i32_11 = arith.constant 1 : i32
    %21 = arith.addi %1, %c1_i32_11 : i32
    %c16_i32_12 = arith.constant 16 : i32
    %22 = arith.cmpi slt, %21, %c16_i32_12 : i32
    %23 = arith.andi %20, %22 : i1
    %cst_13 = arith.constant 1.000000e+00 : f32
    %cst_14 = arith.constant 0.000000e+00 : f32
    %24 = arith.select %23, %cst_13, %cst_14 : f32
    %c0_15 = arith.constant 0 : index
    %c0_16 = arith.constant 0 : index
    %c0_17 = arith.constant 0 : index
    %25 = vector.load %arg3[%c0_15, %c0_16, %c0_17] : memref<1x16x128xf32, #tpu.memory_space<vmem>>, vector<1x16x128xf32>
    %26 = vector.shape_cast %2 : vector<1x128xf32> to vector<1x1x128xf32>
    %27 = vector.broadcast %26 : vector<1x1x128xf32> to vector<1x16x128xf32>
    %28 = arith.mulf %25, %27 : vector<1x16x128xf32>
    %29 = vector.shape_cast %3 : vector<1x128xf32> to vector<1x1x128xf32>
    %30 = vector.broadcast %29 : vector<1x1x128xf32> to vector<1x16x128xf32>
    %31 = arith.addf %28, %30 : vector<1x16x128xf32>
    %32 = vector.broadcast %24 : f32 to vector<1x16x128xf32>
    %33 = arith.mulf %31, %32 : vector<1x16x128xf32>
    %c2_i32 = arith.constant 2 : i32
    %34 = arith.addi %1, %c2_i32 : i32
    %c0_i32_18 = arith.constant 0 : i32
    %35 = arith.cmpi sge, %34, %c0_i32_18 : i32
    %c2_i32_19 = arith.constant 2 : i32
    %36 = arith.addi %1, %c2_i32_19 : i32
    %c16_i32_20 = arith.constant 16 : i32
    %37 = arith.cmpi slt, %36, %c16_i32_20 : i32
    %38 = arith.andi %35, %37 : i1
    %cst_21 = arith.constant 1.000000e+00 : f32
    %cst_22 = arith.constant 0.000000e+00 : f32
    %39 = arith.select %38, %cst_21, %cst_22 : f32
    %c0_23 = arith.constant 0 : index
    %c0_24 = arith.constant 0 : index
    %c0_25 = arith.constant 0 : index
    %40 = vector.load %arg4[%c0_23, %c0_24, %c0_25] : memref<1x16x128xf32, #tpu.memory_space<vmem>>, vector<1x16x128xf32>
    %41 = vector.shape_cast %2 : vector<1x128xf32> to vector<1x1x128xf32>
    %42 = vector.broadcast %41 : vector<1x1x128xf32> to vector<1x16x128xf32>
    %43 = arith.mulf %40, %42 : vector<1x16x128xf32>
    %44 = vector.shape_cast %3 : vector<1x128xf32> to vector<1x1x128xf32>
    %45 = vector.broadcast %44 : vector<1x1x128xf32> to vector<1x16x128xf32>
    %46 = arith.addf %43, %45 : vector<1x16x128xf32>
    %47 = vector.broadcast %39 : f32 to vector<1x16x128xf32>
    %48 = arith.mulf %46, %47 : vector<1x16x128xf32>
    %c3_i32 = arith.constant 3 : i32
    %49 = arith.addi %1, %c3_i32 : i32
    %c0_i32_26 = arith.constant 0 : i32
    %50 = arith.cmpi sge, %49, %c0_i32_26 : i32
    %c3_i32_27 = arith.constant 3 : i32
    %51 = arith.addi %1, %c3_i32_27 : i32
    %c16_i32_28 = arith.constant 16 : i32
    %52 = arith.cmpi slt, %51, %c16_i32_28 : i32
    %53 = arith.andi %50, %52 : i1
    %cst_29 = arith.constant 1.000000e+00 : f32
    %cst_30 = arith.constant 0.000000e+00 : f32
    %54 = arith.select %53, %cst_29, %cst_30 : f32
    %c0_31 = arith.constant 0 : index
    %c0_32 = arith.constant 0 : index
    %c0_33 = arith.constant 0 : index
    %55 = vector.load %arg5[%c0_31, %c0_32, %c0_33] : memref<1x16x128xf32, #tpu.memory_space<vmem>>, vector<1x16x128xf32>
    %56 = vector.shape_cast %2 : vector<1x128xf32> to vector<1x1x128xf32>
    %57 = vector.broadcast %56 : vector<1x1x128xf32> to vector<1x16x128xf32>
    %58 = arith.mulf %55, %57 : vector<1x16x128xf32>
    %59 = vector.shape_cast %3 : vector<1x128xf32> to vector<1x1x128xf32>
    %60 = vector.broadcast %59 : vector<1x1x128xf32> to vector<1x16x128xf32>
    %61 = arith.addf %58, %60 : vector<1x16x128xf32>
    %62 = vector.broadcast %54 : f32 to vector<1x16x128xf32>
    %63 = arith.mulf %61, %62 : vector<1x16x128xf32>
    %c4_i32 = arith.constant 4 : i32
    %64 = arith.addi %1, %c4_i32 : i32
    %c0_i32_34 = arith.constant 0 : i32
    %65 = arith.cmpi sge, %64, %c0_i32_34 : i32
    %c4_i32_35 = arith.constant 4 : i32
    %66 = arith.addi %1, %c4_i32_35 : i32
    %c16_i32_36 = arith.constant 16 : i32
    %67 = arith.cmpi slt, %66, %c16_i32_36 : i32
    %68 = arith.andi %65, %67 : i1
    %cst_37 = arith.constant 1.000000e+00 : f32
    %cst_38 = arith.constant 0.000000e+00 : f32
    %69 = arith.select %68, %cst_37, %cst_38 : f32
    %c0_39 = arith.constant 0 : index
    %c0_40 = arith.constant 0 : index
    %c0_41 = arith.constant 0 : index
    %70 = vector.load %arg6[%c0_39, %c0_40, %c0_41] : memref<1x16x128xf32, #tpu.memory_space<vmem>>, vector<1x16x128xf32>
    %71 = vector.shape_cast %2 : vector<1x128xf32> to vector<1x1x128xf32>
    %72 = vector.broadcast %71 : vector<1x1x128xf32> to vector<1x16x128xf32>
    %73 = arith.mulf %70, %72 : vector<1x16x128xf32>
    %74 = vector.shape_cast %3 : vector<1x128xf32> to vector<1x1x128xf32>
    %75 = vector.broadcast %74 : vector<1x1x128xf32> to vector<1x16x128xf32>
    %76 = arith.addf %73, %75 : vector<1x16x128xf32>
    %77 = vector.broadcast %69 : f32 to vector<1x16x128xf32>
    %78 = arith.mulf %76, %77 : vector<1x16x128xf32>
    %c5_i32 = arith.constant 5 : i32
    %79 = arith.addi %1, %c5_i32 : i32
    %c0_i32_42 = arith.constant 0 : i32
    %80 = arith.cmpi sge, %79, %c0_i32_42 : i32
    %c5_i32_43 = arith.constant 5 : i32
    %81 = arith.addi %1, %c5_i32_43 : i32
    %c16_i32_44 = arith.constant 16 : i32
    %82 = arith.cmpi slt, %81, %c16_i32_44 : i32
    %83 = arith.andi %80, %82 : i1
    %cst_45 = arith.constant 1.000000e+00 : f32
    %cst_46 = arith.constant 0.000000e+00 : f32
    %84 = arith.select %83, %cst_45, %cst_46 : f32
    %c0_47 = arith.constant 0 : index
    %c0_48 = arith.constant 0 : index
    %c0_49 = arith.constant 0 : index
    %85 = vector.load %arg7[%c0_47, %c0_48, %c0_49] : memref<1x16x128xf32, #tpu.memory_space<vmem>>, vector<1x16x128xf32>
    %86 = vector.shape_cast %2 : vector<1x128xf32> to vector<1x1x128xf32>
    %87 = vector.broadcast %86 : vector<1x1x128xf32> to vector<1x16x128xf32>
    %88 = arith.mulf %85, %87 : vector<1x16x128xf32>
    %89 = vector.shape_cast %3 : vector<1x128xf32> to vector<1x1x128xf32>
    %90 = vector.broadcast %89 : vector<1x1x128xf32> to vector<1x16x128xf32>
    %91 = arith.addf %88, %90 : vector<1x16x128xf32>
    %92 = vector.broadcast %84 : f32 to vector<1x16x128xf32>
    %93 = arith.mulf %91, %92 : vector<1x16x128xf32>
    %c6_i32 = arith.constant 6 : i32
    %94 = arith.addi %1, %c6_i32 : i32
    %c0_i32_50 = arith.constant 0 : i32
    %95 = arith.cmpi sge, %94, %c0_i32_50 : i32
    %c6_i32_51 = arith.constant 6 : i32
    %96 = arith.addi %1, %c6_i32_51 : i32
    %c16_i32_52 = arith.constant 16 : i32
    %97 = arith.cmpi slt, %96, %c16_i32_52 : i32
    %98 = arith.andi %95, %97 : i1
    %cst_53 = arith.constant 1.000000e+00 : f32
    %cst_54 = arith.constant 0.000000e+00 : f32
    %99 = arith.select %98, %cst_53, %cst_54 : f32
    %c0_55 = arith.constant 0 : index
    %c0_56 = arith.constant 0 : index
    %c0_57 = arith.constant 0 : index
    %100 = vector.load %arg8[%c0_55, %c0_56, %c0_57] : memref<1x16x128xf32, #tpu.memory_space<vmem>>, vector<1x16x128xf32>
    %101 = vector.shape_cast %2 : vector<1x128xf32> to vector<1x1x128xf32>
    %102 = vector.broadcast %101 : vector<1x1x128xf32> to vector<1x16x128xf32>
    %103 = arith.mulf %100, %102 : vector<1x16x128xf32>
    %104 = vector.shape_cast %3 : vector<1x128xf32> to vector<1x1x128xf32>
    %105 = vector.broadcast %104 : vector<1x1x128xf32> to vector<1x16x128xf32>
    %106 = arith.addf %103, %105 : vector<1x16x128xf32>
    %107 = vector.broadcast %99 : f32 to vector<1x16x128xf32>
    %108 = arith.mulf %106, %107 : vector<1x16x128xf32>
    %c7_i32 = arith.constant 7 : i32
    %109 = arith.addi %1, %c7_i32 : i32
    %c0_i32_58 = arith.constant 0 : i32
    %110 = arith.cmpi sge, %109, %c0_i32_58 : i32
    %c7_i32_59 = arith.constant 7 : i32
    %111 = arith.addi %1, %c7_i32_59 : i32
    %c16_i32_60 = arith.constant 16 : i32
    %112 = arith.cmpi slt, %111, %c16_i32_60 : i32
    %113 = arith.andi %110, %112 : i1
    %cst_61 = arith.constant 1.000000e+00 : f32
    %cst_62 = arith.constant 0.000000e+00 : f32
    %114 = arith.select %113, %cst_61, %cst_62 : f32
    %c0_63 = arith.constant 0 : index
    %c0_64 = arith.constant 0 : index
    %c0_65 = arith.constant 0 : index
    %115 = vector.load %arg9[%c0_63, %c0_64, %c0_65] : memref<1x16x128xf32, #tpu.memory_space<vmem>>, vector<1x16x128xf32>
    %116 = vector.shape_cast %2 : vector<1x128xf32> to vector<1x1x128xf32>
    %117 = vector.broadcast %116 : vector<1x1x128xf32> to vector<1x16x128xf32>
    %118 = arith.mulf %115, %117 : vector<1x16x128xf32>
    %119 = vector.shape_cast %3 : vector<1x128xf32> to vector<1x1x128xf32>
    %120 = vector.broadcast %119 : vector<1x1x128xf32> to vector<1x16x128xf32>
    %121 = arith.addf %118, %120 : vector<1x16x128xf32>
    %122 = vector.broadcast %114 : f32 to vector<1x16x128xf32>
    %123 = arith.mulf %121, %122 : vector<1x16x128xf32>
    %c8_i32_66 = arith.constant 8 : i32
    %124 = arith.addi %1, %c8_i32_66 : i32
    %c0_i32_67 = arith.constant 0 : i32
    %125 = arith.cmpi sge, %124, %c0_i32_67 : i32
    %c8_i32_68 = arith.constant 8 : i32
    %126 = arith.addi %1, %c8_i32_68 : i32
    %c16_i32_69 = arith.constant 16 : i32
    %127 = arith.cmpi slt, %126, %c16_i32_69 : i32
    %128 = arith.andi %125, %127 : i1
    %cst_70 = arith.constant 1.000000e+00 : f32
    %cst_71 = arith.constant 0.000000e+00 : f32
    %129 = arith.select %128, %cst_70, %cst_71 : f32
    %c0_72 = arith.constant 0 : index
    %c0_73 = arith.constant 0 : index
    %c0_74 = arith.constant 0 : index
    %130 = vector.load %arg10[%c0_72, %c0_73, %c0_74] : memref<1x16x128xf32, #tpu.memory_space<vmem>>, vector<1x16x128xf32>
    %131 = vector.shape_cast %2 : vector<1x128xf32> to vector<1x1x128xf32>
    %132 = vector.broadcast %131 : vector<1x1x128xf32> to vector<1x16x128xf32>
    %133 = arith.mulf %130, %132 : vector<1x16x128xf32>
    %134 = vector.shape_cast %3 : vector<1x128xf32> to vector<1x1x128xf32>
    %135 = vector.broadcast %134 : vector<1x1x128xf32> to vector<1x16x128xf32>
    %136 = arith.addf %133, %135 : vector<1x16x128xf32>
    %137 = vector.broadcast %129 : f32 to vector<1x16x128xf32>
    %138 = arith.mulf %136, %137 : vector<1x16x128xf32>
    %c9_i32 = arith.constant 9 : i32
    %139 = arith.addi %1, %c9_i32 : i32
    %c0_i32_75 = arith.constant 0 : i32
    %140 = arith.cmpi sge, %139, %c0_i32_75 : i32
    %c9_i32_76 = arith.constant 9 : i32
    %141 = arith.addi %1, %c9_i32_76 : i32
    %c16_i32_77 = arith.constant 16 : i32
    %142 = arith.cmpi slt, %141, %c16_i32_77 : i32
    %143 = arith.andi %140, %142 : i1
    %cst_78 = arith.constant 1.000000e+00 : f32
    %cst_79 = arith.constant 0.000000e+00 : f32
    %144 = arith.select %143, %cst_78, %cst_79 : f32
    %c0_80 = arith.constant 0 : index
    %c0_81 = arith.constant 0 : index
    %c0_82 = arith.constant 0 : index
    %145 = vector.load %arg11[%c0_80, %c0_81, %c0_82] : memref<1x16x128xf32, #tpu.memory_space<vmem>>, vector<1x16x128xf32>
    %146 = vector.shape_cast %2 : vector<1x128xf32> to vector<1x1x128xf32>
    %147 = vector.broadcast %146 : vector<1x1x128xf32> to vector<1x16x128xf32>
    %148 = arith.mulf %145, %147 : vector<1x16x128xf32>
    %149 = vector.shape_cast %3 : vector<1x128xf32> to vector<1x1x128xf32>
    %150 = vector.broadcast %149 : vector<1x1x128xf32> to vector<1x16x128xf32>
    %151 = arith.addf %148, %150 : vector<1x16x128xf32>
    %152 = vector.broadcast %144 : f32 to vector<1x16x128xf32>
    %153 = arith.mulf %151, %152 : vector<1x16x128xf32>
    %154 = tpu.concatenate %18, %33, %48, %63, %78, %93, %108, %123, %138, %153 in 0 : vector<1x16x128xf32>, vector<1x16x128xf32>, vector<1x16x128xf32>, vector<1x16x128xf32>, vector<1x16x128xf32>, vector<1x16x128xf32>, vector<1x16x128xf32>, vector<1x16x128xf32>, vector<1x16x128xf32>, vector<1x16x128xf32> -> vector<10x16x128xf32>
    %155 = vector.extract_strided_slice %154 {offsets = [0, 0, 0], sizes = [10, 15, 128], strides = [1, 1, 1]} : vector<10x16x128xf32> to vector<10x15x128xf32>
    %cst_83 = arith.constant 0.000000e+00 : f32
    %156 = vector.broadcast %cst_83 : f32 to vector<10x1x128xf32>
    %157 = tpu.concatenate %156, %155 in 1 : vector<10x1x128xf32>, vector<10x15x128xf32> -> vector<10x16x128xf32>
    %158 = vector.extract_strided_slice %154 {offsets = [0, 1, 0], sizes = [10, 15, 128], strides = [1, 1, 1]} : vector<10x16x128xf32> to vector<10x15x128xf32>
    %cst_84 = arith.constant 0.000000e+00 : f32
    %159 = vector.broadcast %cst_84 : f32 to vector<10x1x128xf32>
    %160 = tpu.concatenate %158, %159 in 1 : vector<10x15x128xf32>, vector<10x1x128xf32> -> vector<10x16x128xf32>
    %161 = tpu.concatenate %157, %154, %160 in 2 : vector<10x16x128xf32>, vector<10x16x128xf32>, vector<10x16x128xf32> -> vector<10x16x384xf32>
    %cst_85 = arith.constant 0.000000e+00 : f32
    %162 = vector.broadcast %cst_85 : f32 to vector<128x128xf32>
    %163 = vector.extract_strided_slice %161 {offsets = [0, 0, 0], sizes = [8, 16, 384], strides = [1, 1, 1]} : vector<10x16x384xf32> to vector<8x16x384xf32>
    %164 = vector.shape_cast %163 : vector<8x16x384xf32> to vector<128x384xf32>
    %c0_86 = arith.constant 0 : index
    %c0_87 = arith.constant 0 : index
    %c0_88 = arith.constant 0 : index
    %165 = vector.load %arg12[%c0_86, %c0_87, %c0_88] : memref<3x384x128xf32, #tpu.memory_space<vmem>>, vector<1x384x128xf32>
    %166 = vector.shape_cast %165 : vector<1x384x128xf32> to vector<384x128xf32>
    %cst_89 = arith.constant dense<0.000000e+00> : vector<128x128xf32>
    %167 = tpu.matmul %164, %166, %cst_89 {dimension_numbers = #tpu.dot_dimension_numbers<[1], [0], [0], [1], [0, 0, 1, 1], [], []>} : vector<128x384xf32>, vector<384x128xf32>, vector<128x128xf32> -> vector<128x128xf32>
    %168 = arith.addf %162, %167 : vector<128x128xf32>
    %169 = vector.extract_strided_slice %161 {offsets = [1, 0, 0], sizes = [8, 16, 384], strides = [1, 1, 1]} : vector<10x16x384xf32> to vector<8x16x384xf32>
    %170 = vector.shape_cast %169 : vector<8x16x384xf32> to vector<128x384xf32>
    %c1 = arith.constant 1 : index
    %c0_90 = arith.constant 0 : index
    %c0_91 = arith.constant 0 : index
    %171 = vector.load %arg12[%c1, %c0_90, %c0_91] : memref<3x384x128xf32, #tpu.memory_space<vmem>>, vector<1x384x128xf32>
    %172 = vector.shape_cast %171 : vector<1x384x128xf32> to vector<384x128xf32>
    %cst_92 = arith.constant dense<0.000000e+00> : vector<128x128xf32>
    %173 = tpu.matmul %170, %172, %cst_92 {dimension_numbers = #tpu.dot_dimension_numbers<[1], [0], [0], [1], [0, 0, 1, 1], [], []>} : vector<128x384xf32>, vector<384x128xf32>, vector<128x128xf32> -> vector<128x128xf32>
    %174 = arith.addf %168, %173 : vector<128x128xf32>
    %175 = vector.extract_strided_slice %161 {offsets = [2, 0, 0], sizes = [8, 16, 384], strides = [1, 1, 1]} : vector<10x16x384xf32> to vector<8x16x384xf32>
    %176 = vector.shape_cast %175 : vector<8x16x384xf32> to vector<128x384xf32>
    %c2 = arith.constant 2 : index
    %c0_93 = arith.constant 0 : index
    %c0_94 = arith.constant 0 : index
    %177 = vector.load %arg12[%c2, %c0_93, %c0_94] : memref<3x384x128xf32, #tpu.memory_space<vmem>>, vector<1x384x128xf32>
    %178 = vector.shape_cast %177 : vector<1x384x128xf32> to vector<384x128xf32>
    %cst_95 = arith.constant dense<0.000000e+00> : vector<128x128xf32>
    %179 = tpu.matmul %176, %178, %cst_95 {dimension_numbers = #tpu.dot_dimension_numbers<[1], [0], [0], [1], [0, 0, 1, 1], [], []>} : vector<128x384xf32>, vector<384x128xf32>, vector<128x128xf32> -> vector<128x128xf32>
    %180 = arith.addf %174, %179 : vector<128x128xf32>
    %cst_96 = arith.constant 0.000000e+00 : f32
    %181 = vector.broadcast %cst_96 : f32 to vector<128x128xf32>
    %182 = arith.maximumf %180, %181 : vector<128x128xf32>
    %183 = vector.shape_cast %182 : vector<128x128xf32> to vector<1x8x16x128xf32>
    %c0_97 = arith.constant 0 : index
    %c0_98 = arith.constant 0 : index
    %c0_99 = arith.constant 0 : index
    %c0_100 = arith.constant 0 : index
    %184 = vector.load %arg15[%c0_97, %c0_98, %c0_99, %c0_100] : memref<1x8x16x128xf32, #tpu.memory_space<vmem>>, vector<1x8x16x128xf32>
    tpu.vector_store %arg15[%c0_97, %c0_98, %c0_99, %c0_100], %183 {strides = array<i32>} : memref<1x8x16x128xf32, #tpu.memory_space<vmem>>, vector<1x8x16x128xf32>,
    return
  }
  func.func @transform_0(%arg0: i32, %arg1: i32) -> (i32, i32, i32) {
    %c16_i32 = arith.constant 16 : i32
    %0 = arith.muli %arg0, %c16_i32 : i32
    %c8_i32 = arith.constant 8 : i32
    %1 = arith.muli %arg1, %c8_i32 : i32
    %c-1_i32 = arith.constant -1 : i32
    %2 = arith.addi %1, %c-1_i32 : i32
    %c0_i32 = arith.constant 0 : i32
    %3 = arith.maxsi %2, %c0_i32 : i32
    %c15_i32 = arith.constant 15 : i32
    %4 = arith.minsi %3, %c15_i32 : i32
    %5 = arith.addi %0, %4 : i32
    %c0_i32_0 = arith.constant 0 : i32
    %c0_i32_1 = arith.constant 0 : i32
    %c0_i32_2 = arith.constant 0 : i32
    return %5, %c0_i32_0, %c0_i32_1 : i32, i32, i32
  }
  func.func @transform_1(%arg0: i32, %arg1: i32) -> (i32, i32, i32) {
    %c16_i32 = arith.constant 16 : i32
    %0 = arith.muli %arg0, %c16_i32 : i32
    %c8_i32 = arith.constant 8 : i32
    %1 = arith.muli %arg1, %c8_i32 : i32
    %c0_i32 = arith.constant 0 : i32
    %2 = arith.addi %1, %c0_i32 : i32
    %c0_i32_0 = arith.constant 0 : i32
    %3 = arith.maxsi %2, %c0_i32_0 : i32
    %c15_i32 = arith.constant 15 : i32
    %4 = arith.minsi %3, %c15_i32 : i32
    %5 = arith.addi %0, %4 : i32
    %c0_i32_1 = arith.constant 0 : i32
    %c0_i32_2 = arith.constant 0 : i32
    %c0_i32_3 = arith.constant 0 : i32
    return %5, %c0_i32_1, %c0_i32_2 : i32, i32, i32
  }
  func.func @transform_2(%arg0: i32, %arg1: i32) -> (i32, i32, i32) {
    %c16_i32 = arith.constant 16 : i32
    %0 = arith.muli %arg0, %c16_i32 : i32
    %c8_i32 = arith.constant 8 : i32
    %1 = arith.muli %arg1, %c8_i32 : i32
    %c1_i32 = arith.constant 1 : i32
    %2 = arith.addi %1, %c1_i32 : i32
    %c0_i32 = arith.constant 0 : i32
    %3 = arith.maxsi %2, %c0_i32 : i32
    %c15_i32 = arith.constant 15 : i32
    %4 = arith.minsi %3, %c15_i32 : i32
    %5 = arith.addi %0, %4 : i32
    %c0_i32_0 = arith.constant 0 : i32
    %c0_i32_1 = arith.constant 0 : i32
    %c0_i32_2 = arith.constant 0 : i32
    return %5, %c0_i32_0, %c0_i32_1 : i32, i32, i32
  }
  func.func @transform_3(%arg0: i32, %arg1: i32) -> (i32, i32, i32) {
    %c16_i32 = arith.constant 16 : i32
    %0 = arith.muli %arg0, %c16_i32 : i32
    %c8_i32 = arith.constant 8 : i32
    %1 = arith.muli %arg1, %c8_i32 : i32
    %c2_i32 = arith.constant 2 : i32
    %2 = arith.addi %1, %c2_i32 : i32
    %c0_i32 = arith.constant 0 : i32
    %3 = arith.maxsi %2, %c0_i32 : i32
    %c15_i32 = arith.constant 15 : i32
    %4 = arith.minsi %3, %c15_i32 : i32
    %5 = arith.addi %0, %4 : i32
    %c0_i32_0 = arith.constant 0 : i32
    %c0_i32_1 = arith.constant 0 : i32
    %c0_i32_2 = arith.constant 0 : i32
    return %5, %c0_i32_0, %c0_i32_1 : i32, i32, i32
  }
  func.func @transform_4(%arg0: i32, %arg1: i32) -> (i32, i32, i32) {
    %c16_i32 = arith.constant 16 : i32
    %0 = arith.muli %arg0, %c16_i32 : i32
    %c8_i32 = arith.constant 8 : i32
    %1 = arith.muli %arg1, %c8_i32 : i32
    %c3_i32 = arith.constant 3 : i32
    %2 = arith.addi %1, %c3_i32 : i32
    %c0_i32 = arith.constant 0 : i32
    %3 = arith.maxsi %2, %c0_i32 : i32
    %c15_i32 = arith.constant 15 : i32
    %4 = arith.minsi %3, %c15_i32 : i32
    %5 = arith.addi %0, %4 : i32
    %c0_i32_0 = arith.constant 0 : i32
    %c0_i32_1 = arith.constant 0 : i32
    %c0_i32_2 = arith.constant 0 : i32
    return %5, %c0_i32_0, %c0_i32_1 : i32, i32, i32
  }
  func.func @transform_5(%arg0: i32, %arg1: i32) -> (i32, i32, i32) {
    %c16_i32 = arith.constant 16 : i32
    %0 = arith.muli %arg0, %c16_i32 : i32
    %c8_i32 = arith.constant 8 : i32
    %1 = arith.muli %arg1, %c8_i32 : i32
    %c4_i32 = arith.constant 4 : i32
    %2 = arith.addi %1, %c4_i32 : i32
    %c0_i32 = arith.constant 0 : i32
    %3 = arith.maxsi %2, %c0_i32 : i32
    %c15_i32 = arith.constant 15 : i32
    %4 = arith.minsi %3, %c15_i32 : i32
    %5 = arith.addi %0, %4 : i32
    %c0_i32_0 = arith.constant 0 : i32
    %c0_i32_1 = arith.constant 0 : i32
    %c0_i32_2 = arith.constant 0 : i32
    return %5, %c0_i32_0, %c0_i32_1 : i32, i32, i32
  }
  func.func @transform_6(%arg0: i32, %arg1: i32) -> (i32, i32, i32) {
    %c16_i32 = arith.constant 16 : i32
    %0 = arith.muli %arg0, %c16_i32 : i32
    %c8_i32 = arith.constant 8 : i32
    %1 = arith.muli %arg1, %c8_i32 : i32
    %c5_i32 = arith.constant 5 : i32
    %2 = arith.addi %1, %c5_i32 : i32
    %c0_i32 = arith.constant 0 : i32
    %3 = arith.maxsi %2, %c0_i32 : i32
    %c15_i32 = arith.constant 15 : i32
    %4 = arith.minsi %3, %c15_i32 : i32
    %5 = arith.addi %0, %4 : i32
    %c0_i32_0 = arith.constant 0 : i32
    %c0_i32_1 = arith.constant 0 : i32
    %c0_i32_2 = arith.constant 0 : i32
    return %5, %c0_i32_0, %c0_i32_1 : i32, i32, i32
  }
  func.func @transform_7(%arg0: i32, %arg1: i32) -> (i32, i32, i32) {
    %c16_i32 = arith.constant 16 : i32
    %0 = arith.muli %arg0, %c16_i32 : i32
    %c8_i32 = arith.constant 8 : i32
    %1 = arith.muli %arg1, %c8_i32 : i32
    %c6_i32 = arith.constant 6 : i32
    %2 = arith.addi %1, %c6_i32 : i32
    %c0_i32 = arith.constant 0 : i32
    %3 = arith.maxsi %2, %c0_i32 : i32
    %c15_i32 = arith.constant 15 : i32
    %4 = arith.minsi %3, %c15_i32 : i32
    %5 = arith.addi %0, %4 : i32
    %c0_i32_0 = arith.constant 0 : i32
    %c0_i32_1 = arith.constant 0 : i32
    %c0_i32_2 = arith.constant 0 : i32
    return %5, %c0_i32_0, %c0_i32_1 : i32, i32, i32
  }
  func.func @transform_8(%arg0: i32, %arg1: i32) -> (i32, i32, i32) {
    %c16_i32 = arith.constant 16 : i32
    %0 = arith.muli %arg0, %c16_i32 : i32
    %c8_i32 = arith.constant 8 : i32
    %1 = arith.muli %arg1, %c8_i32 : i32
    %c7_i32 = arith.constant 7 : i32
    %2 = arith.addi %1, %c7_i32 : i32
    %c0_i32 = arith.constant 0 : i32
    %3 = arith.maxsi %2, %c0_i32 : i32
    %c15_i32 = arith.constant 15 : i32
    %4 = arith.minsi %3, %c15_i32 : i32
    %5 = arith.addi %0, %4 : i32
    %c0_i32_0 = arith.constant 0 : i32
    %c0_i32_1 = arith.constant 0 : i32
    %c0_i32_2 = arith.constant 0 : i32
    return %5, %c0_i32_0, %c0_i32_1 : i32, i32, i32
  }
  func.func @transform_9(%arg0: i32, %arg1: i32) -> (i32, i32, i32) {
    %c16_i32 = arith.constant 16 : i32
    %0 = arith.muli %arg0, %c16_i32 : i32
    %c8_i32 = arith.constant 8 : i32
    %1 = arith.muli %arg1, %c8_i32 : i32
    %c8_i32_0 = arith.constant 8 : i32
    %2 = arith.addi %1, %c8_i32_0 : i32
    %c0_i32 = arith.constant 0 : i32
    %3 = arith.maxsi %2, %c0_i32 : i32
    %c15_i32 = arith.constant 15 : i32
    %4 = arith.minsi %3, %c15_i32 : i32
    %5 = arith.addi %0, %4 : i32
    %c0_i32_1 = arith.constant 0 : i32
    %c0_i32_2 = arith.constant 0 : i32
    %c0_i32_3 = arith.constant 0 : i32
    return %5, %c0_i32_1, %c0_i32_2 : i32, i32, i32
  }
  func.func @transform_10(%arg0: i32, %arg1: i32) -> (i32, i32, i32) {
    %c0_i32 = arith.constant 0 : i32
    %c0_i32_0 = arith.constant 0 : i32
    %c0_i32_1 = arith.constant 0 : i32
    %c0_i32_2 = arith.constant 0 : i32
    return %c0_i32, %c0_i32_0, %c0_i32_1 : i32, i32, i32
  }
  func.func @transform_11(%arg0: i32, %arg1: i32) -> (i32, i32) {
    %c0_i32 = arith.constant 0 : i32
    %c0_i32_0 = arith.constant 0 : i32
    %c0_i32_1 = arith.constant 0 : i32
    return %c0_i32, %c0_i32_0 : i32, i32
  }
  func.func @transform_12(%arg0: i32, %arg1: i32) -> (i32, i32) {
    %c0_i32 = arith.constant 0 : i32
    %c0_i32_0 = arith.constant 0 : i32
    %c0_i32_1 = arith.constant 0 : i32
    return %c0_i32, %c0_i32_0 : i32, i32
  }
  func.func @transform_13(%arg0: i32, %arg1: i32) -> (i32, i32, i32, i32) {
    %c0_i32 = arith.constant 0 : i32
    %c0_i32_0 = arith.constant 0 : i32
    %c0_i32_1 = arith.constant 0 : i32
    return %arg0, %arg1, %c0_i32, %c0_i32_0 : i32, i32, i32, i32
  }
}

</mosaic_0001>

<bundles_post_ra>
// kernel: conv_conv_block.3
= control target key start
LH: loop header
LB: loop body
LE: loop exit
PB: predicated region body
PF: predicated region fallthrough
CT: control target
= control target key end

     0   :  { %s612_s9 = smov 0   ;;  %s614_s10 = smov 0   ;;  %s719_s0 = inlined_call_operand.vmem [shape: f32[64,16,128], index: 0, kind: input, shape index: {}]   ;;  %s720_s1 = inlined_call_operand.vmem [shape: f32[2,8,128], index: 1, kind: output, shape index: {0}]   ;;  %s721_s2 = inlined_call_operand.vmem [shape: f32[2,8,128], index: 2, kind: output, shape index: {1}]  }
   0x1   :  { %s616_s11 = smov 0  }
   0x2 LB: > { %s25_s12 = sadd.s32 1, %s591_s10  ;;  %p539_p0 = scmp.ge.s32.totalorder %s595_s11, 1  ;;  %s595_s11 = sphi %s616_s11, %s13_s11   ;;  %s591_s10 = sphi %s614_s10, %s723_s10   ;;  %s587_s9 = sphi %s612_s9, %s722_s9  }
   0x3   : > { %p27_p1 = scmp.ge.s32.totalorder %s25_s12, 2  ;;  %p133_p2 = scmp.lt.s32.totalorder %s595_s11, 3 }
   0x5   : > { %s725_s12 = smov (%p27_p1, %s25_s12), 0  ;;  %p134_p3 = pnand %p539_p0, %p133_p2 }
   0x6   : > { %s540_s13 = sshll.u32 (!%p134_p3), %s587_s9, 5  ;;  %p169_p5 = scmp.lt.s32.totalorder (!%p134_p3), %s587_s9, 1 }
   0x7   : > { %137 = sbr.rel (%p134_p3) target bundleno = 147 (0x93), region = 24  ;;  %p162_p4 = scmp.lt.s32.totalorder (!%p134_p3), %s540_s13, 63 }
   0xe   : > { %s727_s13 = smov (!%p162_p4, %s540_s13), 63  ;;  %s729_s9 = smov (!%p169_p5, %s587_s9), 1 }
   0xf   : > { %s547_s14 = sshll.u32 %s727_s13, 4  ;;  %s543_s18 = sshll.u32 %s729_s9, 3 }
  0x10   : > { %s636_s17 = scalar_lea.vmem %s719_s0, %s547_s14  ;;  %s172_s21 = scalar_lea.vmem %s720_s1, %s543_s18 }
  0x11   : > { %v183_v0 = vld [vmem:[%s636_s17] sm:$0xff]  ;;  %v184_v1 = vld [vmem:[%s636_s17 + $0x8] sm:$0xff]  ;;  %v185_v2 = vld [vmem:[%s636_s17 + $0x10] sm:$0xff]  ;;  %s176_s24 = scalar_lea.vmem %s721_s2, %s543_s18 }
  0x12   : > { %v186_v3 = vld [vmem:[%s636_s17 + $0x18] sm:$0xff]  ;;  %v248_v4 = vadd.f32 %v184_v1, %v183_v0  ;;  %v314_v5 = vmul.f32 %v183_v0, %v183_v0  ;;  %v315_v6 = vmul.f32 %v184_v1, %v184_v1  ;;  %v316_v7 = vmul.f32 %v185_v2, %v185_v2  ;;  %v187_v8 = vld [vmem:[%s636_s17 + $0x20] sm:$0xff]  ;;  %v188_v12 = vld [vmem:[%s636_s17 + $0x28] sm:$0xff] }
  0x13   : > { %v317_v10 = vmul.f32 %v186_v3, %v186_v3  ;;  %v318_v14 = vmul.f32 %v187_v8, %v187_v8  ;;  %v189_v16 = vld [vmem:[%s636_s17 + $0x30] sm:$0xff]  ;;  %v319_v18 = vmul.f32 %v188_v12, %v188_v12  ;;  %v190_v20 = vld [vmem:[%s636_s17 + $0x38] sm:$0xff]  ;;  %v191_v24 = vld [vmem:[%s636_s17 + $0x40] sm:$0xff] }
  0x14   : > { %v249_v9 = vadd.f32 %v248_v4, %v185_v2  ;;  %v378_v11 = vadd.f32 %v315_v6, %v314_v5  ;;  %v320_v22 = vmul.f32 %v189_v16, %v189_v16  ;;  %v321_v26 = vmul.f32 %v190_v20, %v190_v20  ;;  %v192_v28 = vld [vmem:[%s636_s17 + $0x48] sm:$0xff]  ;;  %v193_v32 = vld [vmem:[%s636_s17 + $0x50] sm:$0xff]  ;;  %v194_v36 = vld [vmem:[%s636_s17 + $0x58] sm:$0xff] }
  0x15   : > { %v322_v30 = vmul.f32 %v191_v24, %v191_v24  ;;  %v323_v34 = vmul.f32 %v192_v28, %v192_v28  ;;  %v324_v38 = vmul.f32 %v193_v32, %v193_v32  ;;  %v195_v40 = vld [vmem:[%s636_s17 + $0x60] sm:$0xff]  ;;  %v325_v42 = vmul.f32 %v194_v36, %v194_v36  ;;  %v196_v44 = vld [vmem:[%s636_s17 + $0x68] sm:$0xff]  ;;  %v197_v48 = vld [vmem:[%s636_s17 + $0x70] sm:$0xff] }
  0x16   : > { %v250_v13 = vadd.f32 %v249_v9, %v186_v3  ;;  %v379_v15 = vadd.f32 %v378_v11, %v316_v7  ;;  %v326_v46 = vmul.f32 %v195_v40, %v195_v40  ;;  %v327_v50 = vmul.f32 %v196_v44, %v196_v44  ;;  %v198_v52 = vld [vmem:[%s636_s17 + $0x78] sm:$0xff]  ;;  %v199_v56 = vld [vmem:[%s636_s17 + $0x80] sm:$0xff]  ;;  %v200_v60 = vld [vmem:[%s636_s17 + $0x88] sm:$0xff] }
  0x17   : > { %v328_v54 = vmul.f32 %v197_v48, %v197_v48  ;;  %v329_v58 = vmul.f32 %v198_v52, %v198_v52  ;;  %v330_v62 = vmul.f32 %v199_v56, %v199_v56  ;;  %v201_v0 = vld [vmem:[%s636_s17 + $0x90] sm:$0xff]  ;;  %v331_v2 = vmul.f32 %v200_v60, %v200_v60  ;;  %v202_v4 = vld [vmem:[%s636_s17 + $0x98] sm:$0xff] }
  0x18   : > { %v251_v17 = vadd.f32 %v250_v13, %v187_v8  ;;  %v380_v19 = vadd.f32 %v379_v15, %v317_v10  ;;  %v332_v6 = vmul.f32 %v201_v0, %v201_v0  ;;  %v203_v8 = vld [vmem:[%s636_s17 + $0xa0] sm:$0xff]  ;;  %v333_v10 = vmul.f32 %v202_v4, %v202_v4 }
  0x1a   : > { %v252_v21 = vadd.f32 %v251_v17, %v188_v12  ;;  %v381_v23 = vadd.f32 %v380_v19, %v318_v14  ;;  %v204_v12 = vld [vmem:[%s636_s17 + $0xa8] sm:$0xff]  ;;  %v334_v14 = vmul.f32 %v203_v8, %v203_v8 }
  0x1c   : > { %v253_v25 = vadd.f32 %v252_v21, %v189_v16  ;;  %v382_v27 = vadd.f32 %v381_v23, %v319_v18  ;;  %v205_v16 = vld [vmem:[%s636_s17 + $0xb0] sm:$0xff]  ;;  %v335_v18 = vmul.f32 %v204_v12, %v204_v12 }
  0x1e   : > { %v254_v29 = vadd.f32 %v253_v25, %v190_v20  ;;  %v383_v31 = vadd.f32 %v382_v27, %v320_v22  ;;  %v206_v20 = vld [vmem:[%s636_s17 + $0xb8] sm:$0xff]  ;;  %v336_v22 = vmul.f32 %v205_v16, %v205_v16 }
  0x20   : > { %v255_v33 = vadd.f32 %v254_v29, %v191_v24  ;;  %v384_v35 = vadd.f32 %v383_v31, %v321_v26  ;;  %v207_v24 = vld [vmem:[%s636_s17 + $0xc0] sm:$0xff]  ;;  %v337_v26 = vmul.f32 %v206_v20, %v206_v20 }
  0x22   : > { %v256_v37 = vadd.f32 %v255_v33, %v192_v28  ;;  %v385_v39 = vadd.f32 %v384_v35, %v322_v30  ;;  %v208_v28 = vld [vmem:[%s636_s17 + $0xc8] sm:$0xff]  ;;  %v338_v30 = vmul.f32 %v207_v24, %v207_v24 }
  0x24   : > { %v257_v41 = vadd.f32 %v256_v37, %v193_v32  ;;  %v386_v43 = vadd.f32 %v385_v39, %v323_v34  ;;  %v209_v32 = vld [vmem:[%s636_s17 + $0xd0] sm:$0xff]  ;;  %v339_v34 = vmul.f32 %v208_v28, %v208_v28 }
  0x26   : > { %v258_v45 = vadd.f32 %v257_v41, %v194_v36  ;;  %v387_v47 = vadd.f32 %v386_v43, %v324_v38  ;;  %v210_v36 = vld [vmem:[%s636_s17 + $0xd8] sm:$0xff]  ;;  %v340_v38 = vmul.f32 %v209_v32, %v209_v32 }
  0x28   : > { %v259_v49 = vadd.f32 %v258_v45, %v195_v40  ;;  %v388_v51 = vadd.f32 %v387_v47, %v325_v42  ;;  %v211_v40 = vld [vmem:[%s636_s17 + $0xe0] sm:$0xff]  ;;  %v341_v42 = vmul.f32 %v210_v36, %v210_v36 }
  0x2a   : > { %v260_v53 = vadd.f32 %v259_v49, %v196_v44  ;;  %v389_v55 = vadd.f32 %v388_v51, %v326_v46  ;;  %v212_v44 = vld [vmem:[%s636_s17 + $0xe8] sm:$0xff]  ;;  %v342_v46 = vmul.f32 %v211_v40, %v211_v40 }
  0x2c   : > { %v261_v57 = vadd.f32 %v260_v53, %v197_v48  ;;  %v390_v59 = vadd.f32 %v389_v55, %v327_v50  ;;  %v213_v48 = vld [vmem:[%s636_s17 + $0xf0] sm:$0xff]  ;;  %v343_v50 = vmul.f32 %v212_v44, %v212_v44 }
  0x2e   : > { %v262_v61 = vadd.f32 %v261_v57, %v198_v52  ;;  %v391_v63 = vadd.f32 %v390_v59, %v328_v54  ;;  %v214_v52 = vld [vmem:[%s636_s17 + $0xf8] sm:$0xff]  ;;  %v344_v54 = vmul.f32 %v213_v48, %v213_v48 }
  0x30   : > { %v263_v1 = vadd.f32 %v262_v61, %v199_v56  ;;  %v392_v3 = vadd.f32 %v391_v63, %v329_v58  ;;  %v215_v56 = vld [vmem:[%s636_s17 + $0x100] sm:$0xff]  ;;  %v345_v58 = vmul.f32 %v214_v52, %v214_v52 }
  0x32   : > { %v264_v5 = vadd.f32 %v263_v1, %v200_v60  ;;  %v393_v7 = vadd.f32 %v392_v3, %v330_v62  ;;  %v216_v60 = vld [vmem:[%s636_s17 + $0x108] sm:$0xff]  ;;  %v346_v62 = vmul.f32 %v215_v56, %v215_v56 }
  0x34   : > { %v265_v9 = vadd.f32 %v264_v5, %v201_v0  ;;  %v394_v11 = vadd.f32 %v393_v7, %v331_v2  ;;  %v217_v0 = vld [vmem:[%s636_s17 + $0x110] sm:$0xff]  ;;  %v347_v2 = vmul.f32 %v216_v60, %v216_v60 }
  0x36   : > { %v266_v13 = vadd.f32 %v265_v9, %v202_v4  ;;  %v395_v15 = vadd.f32 %v394_v11, %v332_v6  ;;  %v218_v4 = vld [vmem:[%s636_s17 + $0x118] sm:$0xff]  ;;  %v348_v6 = vmul.f32 %v217_v0, %v217_v0 }
  0x38   : > { %v267_v17 = vadd.f32 %v266_v13, %v203_v8  ;;  %v396_v19 = vadd.f32 %v395_v15, %v333_v10  ;;  %v219_v8 = vld [vmem:[%s636_s17 + $0x120] sm:$0xff]  ;;  %v349_v10 = vmul.f32 %v218_v4, %v218_v4 }
  0x3a   : > { %v268_v21 = vadd.f32 %v267_v17, %v204_v12  ;;  %v397_v23 = vadd.f32 %v396_v19, %v334_v14  ;;  %v220_v12 = vld [vmem:[%s636_s17 + $0x128] sm:$0xff]  ;;  %v350_v14 = vmul.f32 %v219_v8, %v219_v8 }
  0x3c   : > { %v269_v25 = vadd.f32 %v268_v21, %v205_v16  ;;  %v398_v27 = vadd.f32 %v397_v23, %v335_v18  ;;  %v221_v16 = vld [vmem:[%s636_s17 + $0x130] sm:$0xff]  ;;  %v351_v18 = vmul.f32 %v220_v12, %v220_v12 }
  0x3e   : > { %v270_v29 = vadd.f32 %v269_v25, %v206_v20  ;;  %v399_v31 = vadd.f32 %v398_v27, %v336_v22  ;;  %v222_v20 = vld [vmem:[%s636_s17 + $0x138] sm:$0xff]  ;;  %v352_v22 = vmul.f32 %v221_v16, %v221_v16 }
  0x40   : > { %v271_v33 = vadd.f32 %v270_v29, %v207_v24  ;;  %v400_v35 = vadd.f32 %v399_v31, %v337_v26  ;;  %v223_v24 = vld [vmem:[%s636_s17 + $0x140] sm:$0xff]  ;;  %v353_v26 = vmul.f32 %v222_v20, %v222_v20 }
  0x42   : > { %v272_v37 = vadd.f32 %v271_v33, %v208_v28  ;;  %v401_v39 = vadd.f32 %v400_v35, %v338_v30  ;;  %v224_v28 = vld [vmem:[%s636_s17 + $0x148] sm:$0xff]  ;;  %v354_v30 = vmul.f32 %v223_v24, %v223_v24 }
  0x44   : > { %v273_v41 = vadd.f32 %v272_v37, %v209_v32  ;;  %v402_v43 = vadd.f32 %v401_v39, %v339_v34  ;;  %v225_v32 = vld [vmem:[%s636_s17 + $0x150] sm:$0xff]  ;;  %v355_v34 = vmul.f32 %v224_v28, %v224_v28 }
  0x46   : > { %v274_v45 = vadd.f32 %v273_v41, %v210_v36  ;;  %v403_v47 = vadd.f32 %v402_v43, %v340_v38  ;;  %v226_v36 = vld [vmem:[%s636_s17 + $0x158] sm:$0xff]  ;;  %v356_v38 = vmul.f32 %v225_v32, %v225_v32 }
  0x48   : > { %v275_v49 = vadd.f32 %v274_v45, %v211_v40  ;;  %v404_v51 = vadd.f32 %v403_v47, %v341_v42  ;;  %v227_v40 = vld [vmem:[%s636_s17 + $0x160] sm:$0xff]  ;;  %v357_v42 = vmul.f32 %v226_v36, %v226_v36 }
  0x4a   : > { %v276_v53 = vadd.f32 %v275_v49, %v212_v44  ;;  %v405_v55 = vadd.f32 %v404_v51, %v342_v46  ;;  %v228_v44 = vld [vmem:[%s636_s17 + $0x168] sm:$0xff]  ;;  %v358_v46 = vmul.f32 %v227_v40, %v227_v40 }
  0x4c   : > { %v277_v57 = vadd.f32 %v276_v53, %v213_v48  ;;  %v406_v59 = vadd.f32 %v405_v55, %v343_v50  ;;  %v229_v48 = vld [vmem:[%s636_s17 + $0x170] sm:$0xff]  ;;  %v359_v50 = vmul.f32 %v228_v44, %v228_v44 }
  0x4e   : > { %v278_v61 = vadd.f32 %v277_v57, %v214_v52  ;;  %v407_v63 = vadd.f32 %v406_v59, %v344_v54  ;;  %v230_v52 = vld [vmem:[%s636_s17 + $0x178] sm:$0xff]  ;;  %v360_v54 = vmul.f32 %v229_v48, %v229_v48 }
  0x50   : > { %v279_v1 = vadd.f32 %v278_v61, %v215_v56  ;;  %v408_v3 = vadd.f32 %v407_v63, %v345_v58  ;;  %v231_v56 = vld [vmem:[%s636_s17 + $0x180] sm:$0xff]  ;;  %v361_v58 = vmul.f32 %v230_v52, %v230_v52 }
  0x52   : > { %v280_v5 = vadd.f32 %v279_v1, %v216_v60  ;;  %v409_v7 = vadd.f32 %v408_v3, %v346_v62  ;;  %v232_v60 = vld [vmem:[%s636_s17 + $0x188] sm:$0xff]  ;;  %v362_v62 = vmul.f32 %v231_v56, %v231_v56 }
  0x54   : > { %v281_v9 = vadd.f32 %v280_v5, %v217_v0  ;;  %v410_v11 = vadd.f32 %v409_v7, %v347_v2  ;;  %v233_v0 = vld [vmem:[%s636_s17 + $0x190] sm:$0xff]  ;;  %v363_v2 = vmul.f32 %v232_v60, %v232_v60 }
  0x56   : > { %v282_v13 = vadd.f32 %v281_v9, %v218_v4  ;;  %v411_v15 = vadd.f32 %v410_v11, %v348_v6  ;;  %v234_v4 = vld [vmem:[%s636_s17 + $0x198] sm:$0xff]  ;;  %v364_v6 = vmul.f32 %v233_v0, %v233_v0 }
  0x58   : > { %v283_v17 = vadd.f32 %v282_v13, %v219_v8  ;;  %v412_v19 = vadd.f32 %v411_v15, %v349_v10  ;;  %v235_v8 = vld [vmem:[%s636_s17 + $0x1a0] sm:$0xff]  ;;  %v365_v10 = vmul.f32 %v234_v4, %v234_v4 }
  0x5a   : > { %v284_v21 = vadd.f32 %v283_v17, %v220_v12  ;;  %v413_v23 = vadd.f32 %v412_v19, %v350_v14  ;;  %v236_v12 = vld [vmem:[%s636_s17 + $0x1a8] sm:$0xff]  ;;  %v366_v14 = vmul.f32 %v235_v8, %v235_v8 }
  0x5c   : > { %v285_v25 = vadd.f32 %v284_v21, %v221_v16  ;;  %v414_v27 = vadd.f32 %v413_v23, %v351_v18  ;;  %v237_v16 = vld [vmem:[%s636_s17 + $0x1b0] sm:$0xff]  ;;  %v367_v18 = vmul.f32 %v236_v12, %v236_v12 }
  0x5e   : > { %v286_v29 = vadd.f32 %v285_v25, %v222_v20  ;;  %v415_v31 = vadd.f32 %v414_v27, %v352_v22  ;;  %v238_v20 = vld [vmem:[%s636_s17 + $0x1b8] sm:$0xff]  ;;  %v368_v22 = vmul.f32 %v237_v16, %v237_v16 }
  0x60   : > { %v287_v33 = vadd.f32 %v286_v29, %v223_v24  ;;  %v416_v35 = vadd.f32 %v415_v31, %v353_v26  ;;  %v239_v24 = vld [vmem:[%s636_s17 + $0x1c0] sm:$0xff]  ;;  %v369_v26 = vmul.f32 %v238_v20, %v238_v20 }
  0x62   : > { %v288_v37 = vadd.f32 %v287_v33, %v224_v28  ;;  %v417_v39 = vadd.f32 %v416_v35, %v354_v30  ;;  %v240_v28 = vld [vmem:[%s636_s17 + $0x1c8] sm:$0xff]  ;;  %v370_v30 = vmul.f32 %v239_v24, %v239_v24 }
  0x64   : > { %v289_v41 = vadd.f32 %v288_v37, %v225_v32  ;;  %v418_v43 = vadd.f32 %v417_v39, %v355_v34  ;;  %v241_v32 = vld [vmem:[%s636_s17 + $0x1d0] sm:$0xff]  ;;  %v371_v34 = vmul.f32 %v240_v28, %v240_v28 }
  0x66   : > { %v290_v45 = vadd.f32 %v289_v41, %v226_v36  ;;  %v419_v47 = vadd.f32 %v418_v43, %v356_v38  ;;  %v242_v36 = vld [vmem:[%s636_s17 + $0x1d8] sm:$0xff]  ;;  %v372_v38 = vmul.f32 %v241_v32, %v241_v32 }
  0x68   : > { %v291_v49 = vadd.f32 %v290_v45, %v227_v40  ;;  %v420_v51 = vadd.f32 %v419_v47, %v357_v42  ;;  %v243_v40 = vld [vmem:[%s636_s17 + $0x1e0] sm:$0xff]  ;;  %v373_v42 = vmul.f32 %v242_v36, %v242_v36 }
  0x6a   : > { %v292_v53 = vadd.f32 %v291_v49, %v228_v44  ;;  %v421_v55 = vadd.f32 %v420_v51, %v358_v46  ;;  %v244_v44 = vld [vmem:[%s636_s17 + $0x1e8] sm:$0xff]  ;;  %v374_v46 = vmul.f32 %v243_v40, %v243_v40 }
  0x6c   : > { %v293_v57 = vadd.f32 %v292_v53, %v229_v48  ;;  %v422_v59 = vadd.f32 %v421_v55, %v359_v50  ;;  %v245_v48 = vld [vmem:[%s636_s17 + $0x1f0] sm:$0xff]  ;;  %v375_v50 = vmul.f32 %v244_v44, %v244_v44 }
  0x6e   : > { %v294_v61 = vadd.f32 %v293_v57, %v230_v52  ;;  %v423_v63 = vadd.f32 %v422_v59, %v360_v54  ;;  %v246_v52 = vld [vmem:[%s636_s17 + $0x1f8] sm:$0xff]  ;;  %v376_v54 = vmul.f32 %v245_v48, %v245_v48 }
  0x6f   : > { %v377_v57 = vmul.f32 %v246_v52, %v246_v52 }
  0x70   : > { %v295_v1 = vadd.f32 %v294_v61, %v231_v56  ;;  %v424_v3 = vadd.f32 %v423_v63, %v361_v58 }
  0x72   : > { %v296_v5 = vadd.f32 %v295_v1, %v232_v60  ;;  %v425_v7 = vadd.f32 %v424_v3, %v362_v62 }
  0x74   : > { %v297_v9 = vadd.f32 %v296_v5, %v233_v0  ;;  %v426_v11 = vadd.f32 %v425_v7, %v363_v2 }
  0x76   : > { %v298_v13 = vadd.f32 %v297_v9, %v234_v4  ;;  %v427_v15 = vadd.f32 %v426_v11, %v364_v6 }
  0x78   : > { %v299_v17 = vadd.f32 %v298_v13, %v235_v8  ;;  %v428_v19 = vadd.f32 %v427_v15, %v365_v10 }
  0x7a   : > { %v300_v21 = vadd.f32 %v299_v17, %v236_v12  ;;  %v429_v23 = vadd.f32 %v428_v19, %v366_v14 }
  0x7c   : > { %v301_v25 = vadd.f32 %v300_v21, %v237_v16  ;;  %v430_v27 = vadd.f32 %v429_v23, %v367_v18 }
  0x7e   : > { %v302_v29 = vadd.f32 %v301_v25, %v238_v20  ;;  %v431_v31 = vadd.f32 %v430_v27, %v368_v22 }
  0x80   : > { %v303_v33 = vadd.f32 %v302_v29, %v239_v24  ;;  %v432_v35 = vadd.f32 %v431_v31, %v369_v26 }
  0x82   : > { %v304_v37 = vadd.f32 %v303_v33, %v240_v28  ;;  %v433_v39 = vadd.f32 %v432_v35, %v370_v30 }
  0x84   : > { %v305_v41 = vadd.f32 %v304_v37, %v241_v32  ;;  %v434_v43 = vadd.f32 %v433_v39, %v371_v34 }
  0x86   : > { %v306_v45 = vadd.f32 %v305_v41, %v242_v36  ;;  %v435_v47 = vadd.f32 %v434_v43, %v372_v38 }
  0x88   : > { %v307_v49 = vadd.f32 %v306_v45, %v243_v40  ;;  %v436_v51 = vadd.f32 %v435_v47, %v373_v42 }
  0x8a   : > { %v308_v53 = vadd.f32 %v307_v49, %v244_v44  ;;  %v437_v55 = vadd.f32 %v436_v51, %v374_v46 }
  0x8c   : > { %v309_v56 = vadd.f32 %v308_v53, %v245_v48  ;;  %v438_v58 = vadd.f32 %v437_v55, %v375_v50 }
  0x8e   : > { %v310_v59 = vadd.f32 %v309_v56, %v246_v52  ;;  %v439_v60 = vadd.f32 %v438_v58, %v376_v54 }
  0x90   : > { %v440_v61 = vadd.f32 %v439_v60, %v377_v57  ;;  %312 = vst [vmem:[%s172_s21] sm:$0xff] %v310_v59 }
  0x92   : > { %442 = vst [vmem:[%s176_s24] sm:$0xff] %v440_v61 }
  0x93 PF: > { %s13_s11 = sadd.s32 1, %s595_s11   ;;  %s722_s9 = smov %s591_s10 }
  0x94   : > { %p10_p6 = scmp.ge.s32.totalorder %s13_s11, 4   ;;  %s723_s10 = smov %s725_s12 }
  0x96   :  { %12 = sbr.rel (!%p10_p6) target bundleno = 2 (0x2), region = 70 }

// kernel: conv_conv_block.4
= control target key start
LH: loop header
LB: loop body
LE: loop exit
PB: predicated region body
PF: predicated region fallthrough
CT: control target
= control target key end

     0   :  { %s1565_s18 = smov 0   ;;  %s1567_s19 = smov 0   ;;  %s2057_s0 = inlined_call_operand.vmem [shape: f32[64,16,128], index: 0, kind: input, shape index: {}]   ;;  %s2058_s1 = inlined_call_operand.vmem [shape: f32[128,128], index: 1, kind: input, shape index: {}]   ;;  %s2059_s2 = inlined_call_operand.vmem [shape: f32[1,128], index: 2, kind: input, shape index: {}]   ;;  %s2060_s3 = inlined_call_operand.vmem [shape: f32[64,16,128], index: 3, kind: output, shape index: {0}]   ;;  %s2061_s4 = inlined_call_operand.vmem [shape: f32[2,8,128], index: 4, kind: output, shape index: {1}]   ;;  %s2062_s5 = inlined_call_operand.vmem [shape: f32[2,8,128], index: 5, kind: output, shape index: {2}]  }
   0x1   :  { %s1569_s20 = smov 0  }
   0x2 LB: > { %s28_s21 = sadd.s32 1, %s1529_s19  ;;  %p1216_p0 = scmp.ge.s32.totalorder %s1533_s20, 1  ;;  %s1533_s20 = sphi %s1569_s20, %s16_s20   ;;  %s1529_s19 = sphi %s1567_s19, %s2064_s19   ;;  %s1525_s18 = sphi %s1565_s18, %s2063_s18  }
   0x3   : > { %p30_p1 = scmp.ge.s32.totalorder %s28_s21, 2  ;;  %p212_p2 = scmp.lt.s32.totalorder %s1533_s20, 3 }
   0x5   : > { %s2066_s21 = smov (%p30_p1, %s28_s21), 0  ;;  %p213_p3 = pnand %p1216_p0, %p212_p2 }
   0x6   : > { %v348_v0 = vld [vmem:[%s2058_s1] sm:$0xff] (!%p213_p3)  ;;  %v349_v1 = vld [vmem:[%s2058_s1 + $0x8] sm:$0xff] (!%p213_p3)  ;;  %v350_v2 = vld [vmem:[%s2058_s1 + $0x10] sm:$0xff] (!%p213_p3)  ;;  %s1217_s28 = sshll.u32 (!%p213_p3), %s1525_s18, 5  ;;  %p270_p5 = scmp.lt.s32.totalorder (!%p213_p3), %s1525_s18, 1 }
   0x7   : > { %216 = sbr.rel (%p213_p3) target bundleno = 389 (0x185), region = 32  ;;  %v1438_v3 = vpack.c.bf16 (!%p213_p3), %v349_v1, %v348_v0  ;;  %v351_v4 = vld [vmem:[%s2058_s1 + $0x18] sm:$0xff] (!%p213_p3)  ;;  %p254_p4 = scmp.lt.s32.totalorder (!%p213_p3), %s1217_s28, 63  ;;  %v352_v6 = vld [vmem:[%s2058_s1 + $0x20] sm:$0xff] (!%p213_p3)  ;;  %v353_v7 = vld [vmem:[%s2058_s1 + $0x28] sm:$0xff] (!%p213_p3) }
   0x8   : > { %v1442_v5 = vpack.c.bf16 (!%p213_p3), %v351_v4, %v350_v2  ;;  %v1446_v8 = vpack.c.bf16 (!%p213_p3), %v353_v7, %v352_v6  ;;  %v354_v9 = vld [vmem:[%s2058_s1 + $0x30] sm:$0xff] (!%p213_p3)  ;;  %v355_v10 = vld [vmem:[%s2058_s1 + $0x38] sm:$0xff] (!%p213_p3)  ;;  %v356_v13 = vld [vmem:[%s2058_s1 + $0x40] sm:$0xff] (!%p213_p3) }
   0x9   : > { %1439 = vmatprep.subr.bf16.mxu0 (!%p213_p3), %v1438_v3  ;;  %1470 = vmatprep.subr.bf16.mxu1 (!%p213_p3), %v1438_v3  ;;  %v1450_v12 = vpack.c.bf16 (!%p213_p3), %v355_v10, %v354_v9  ;;  %v357_v14 = vld [vmem:[%s2058_s1 + $0x48] sm:$0xff] (!%p213_p3)  ;;  %v358_v16 = vld [vmem:[%s2058_s1 + $0x50] sm:$0xff] (!%p213_p3)  ;;  %v359_v17 = vld [vmem:[%s2058_s1 + $0x58] sm:$0xff] (!%p213_p3) }
   0xa   : > { %1441 = vmatpush3.bf16.msra.mxu0 (!%p213_p3), %v1438_v3  ;;  %1478 = vmatpush3.bf16.msra.mxu1 (!%p213_p3), %v1438_v3  ;;  %v1454_v15 = vpack.c.bf16 (!%p213_p3), %v357_v14, %v356_v13  ;;  %v1458_v18 = vpack.c.bf16 (!%p213_p3), %v359_v17, %v358_v16  ;;  %v360_v20 = vld [vmem:[%s2058_s1 + $0x60] sm:$0xff] (!%p213_p3)  ;;  %v361_v21 = vld [vmem:[%s2058_s1 + $0x68] sm:$0xff] (!%p213_p3)  ;;  %v362_v23 = vld [vmem:[%s2058_s1 + $0x70] sm:$0xff] (!%p213_p3) }
   0xb   : > { %1443 = vmatprep.subr.bf16.mxu0 (!%p213_p3), %v1442_v5  ;;  %1471 = vmatprep.subr.bf16.mxu1 (!%p213_p3), %v1442_v5  ;;  %v1462_v22 = vpack.c.bf16 (!%p213_p3), %v361_v21, %v360_v20  ;;  %v363_v24 = vld [vmem:[%s2058_s1 + $0x78] sm:$0xff] (!%p213_p3) }
   0xc   : > { %v1466_v25 = vpack.c.bf16 (!%p213_p3), %v363_v24, %v362_v23  ;;  %v1711_v24 = vld [vmem:[%s2059_s2] ss:$0 sm:$0xff] (!%p213_p3) }
   0xe   : > { %s2068_s28 = smov (!%p254_p4, %s1217_s28), 63  ;;  %1445 = vmatpush3.bf16.msra.mxu0 %v1442_v5  ;;  %1479 = vmatpush3.bf16.msra.mxu1 %v1442_v5  ;;  %s2070_s18 = smov (!%p270_p5, %s1525_s18), 1 }
   0xf   : > { %s1228_s10 = sshll.u32 %s2068_s28, 4  ;;  %1447 = vmatprep.subr.bf16.mxu0 %v1446_v8  ;;  %1472 = vmatprep.subr.bf16.mxu1 %v1446_v8  ;;  %s1223_s28 = sshll.u32 %s2070_s18, 3 }
  0x10   : > { %s1618_s17 = scalar_lea.vmem %s2057_s0, %s1228_s10  ;;  %s1719_s24 = scalar_lea.vmem %s2060_s3, %s1228_s10 }
  0x11   : > { %v284_v11 = vld [vmem:[%s1618_s17] sm:$0xff]  ;;  %v285_v26 = vld [vmem:[%s1618_s17 + $0x8] sm:$0xff]  ;;  %v286_v27 = vld [vmem:[%s1618_s17 + $0x10] sm:$0xff]  ;;  %s273_s25 = scalar_lea.vmem %s2061_s4, %s1223_s28  ;;  %s277_s29 = scalar_lea.vmem %s2062_s5, %s1223_s28 }
  0x12   : > { %1342 = vmatprep.mubr.f32.mxu0 %v284_v11  ;;  %1449 = vmatpush3.bf16.msra.mxu0 %v1446_v8  ;;  %v316_v19 = vld [vmem:[%s1618_s17 + $0x100] sm:$0xff]  ;;  %v317_v28 = vld [vmem:[%s1618_s17 + $0x108] sm:$0xff]  ;;  %v318_v29 = vld [vmem:[%s1618_s17 + $0x110] sm:$0xff] }
  0x13   : > { %1451 = vmatprep.subr.bf16.mxu0 %v1450_v12  ;;  %1480 = vmatpush3.bf16.msra.mxu1 %v1446_v8  ;;  %v287_v30 = vld [vmem:[%s1618_s17 + $0x18] sm:$0xff]  ;;  %v288_v31 = vld [vmem:[%s1618_s17 + $0x20] sm:$0xff]  ;;  %v289_v34 = vld [vmem:[%s1618_s17 + $0x28] sm:$0xff] }
  0x14   : > { %1473 = vmatprep.subr.bf16.mxu1 %v1450_v12  ;;  %1390 = vmatprep.mubr.f32.mxu1 %v316_v19  ;;  %v319_v32 = vld [vmem:[%s1618_s17 + $0x118] sm:$0xff]  ;;  %v320_v33 = vld [vmem:[%s1618_s17 + $0x120] sm:$0xff]  ;;  %v290_v35 = vld [vmem:[%s1618_s17 + $0x30] sm:$0xff] }
  0x15   : > { %v321_v36 = vld [vmem:[%s1618_s17 + $0x128] sm:$0xff]  ;;  %v322_v37 = vld [vmem:[%s1618_s17 + $0x130] sm:$0xff]  ;;  %v291_v38 = vld [vmem:[%s1618_s17 + $0x38] sm:$0xff] }
  0x16   : > { %1453 = vmatpush3.bf16.msra.mxu0 %v1450_v12  ;;  %v292_v39 = vld [vmem:[%s1618_s17 + $0x40] sm:$0xff]  ;;  %v323_v40 = vld [vmem:[%s1618_s17 + $0x138] sm:$0xff]  ;;  %v293_v42 = vld [vmem:[%s1618_s17 + $0x48] sm:$0xff] }
  0x17   : > { %1455 = vmatprep.subr.bf16.mxu0 %v1454_v15  ;;  %1481 = vmatpush3.bf16.msra.mxu1 %v1450_v12  ;;  %v324_v41 = vld [vmem:[%s1618_s17 + $0x140] sm:$0xff]  ;;  %v294_v43 = vld [vmem:[%s1618_s17 + $0x50] sm:$0xff]  ;;  %v325_v44 = vld [vmem:[%s1618_s17 + $0x148] sm:$0xff] }
  0x18   : > { %1474 = vmatprep.subr.bf16.mxu1 %v1454_v15  ;;  %v326_v45 = vld [vmem:[%s1618_s17 + $0x150] sm:$0xff]  ;;  %v295_v46 = vld [vmem:[%s1618_s17 + $0x58] sm:$0xff]  ;;  %v296_v47 = vld [vmem:[%s1618_s17 + $0x60] sm:$0xff] }
  0x19   : > { %v327_v48 = vld [vmem:[%s1618_s17 + $0x158] sm:$0xff]  ;;  %v328_v49 = vld [vmem:[%s1618_s17 + $0x160] sm:$0xff]  ;;  %v297_v50 = vld [vmem:[%s1618_s17 + $0x68] sm:$0xff] }
  0x1a   : > { %1457 = vmatpush3.bf16.msra.mxu0 %v1454_v15  ;;  %v298_v51 = vld [vmem:[%s1618_s17 + $0x70] sm:$0xff]  ;;  %v329_v52 = vld [vmem:[%s1618_s17 + $0x168] sm:$0xff]  ;;  %v299_v54 = vld [vmem:[%s1618_s17 + $0x78] sm:$0xff] }
  0x1b   : > { %1459 = vmatprep.subr.bf16.mxu0 %v1458_v18  ;;  %1482 = vmatpush3.bf16.msra.mxu1 %v1454_v15  ;;  %v330_v53 = vld [vmem:[%s1618_s17 + $0x170] sm:$0xff]  ;;  %v300_v55 = vld [vmem:[%s1618_s17 + $0x80] sm:$0xff]  ;;  %v331_v56 = vld [vmem:[%s1618_s17 + $0x178] sm:$0xff] }
  0x1c   : > { %1475 = vmatprep.subr.bf16.mxu1 %v1458_v18  ;;  %v332_v57 = vld [vmem:[%s1618_s17 + $0x180] sm:$0xff]  ;;  %v301_v58 = vld [vmem:[%s1618_s17 + $0x88] sm:$0xff]  ;;  %v302_v59 = vld [vmem:[%s1618_s17 + $0x90] sm:$0xff] }
  0x1d   : > { %v333_v60 = vld [vmem:[%s1618_s17 + $0x188] sm:$0xff]  ;;  %v334_v61 = vld [vmem:[%s1618_s17 + $0x190] sm:$0xff]  ;;  %v303_v62 = vld [vmem:[%s1618_s17 + $0x98] sm:$0xff] }
  0x1e   : > { %1461 = vmatpush3.bf16.msra.mxu0 %v1458_v18  ;;  %v304_v63 = vld [vmem:[%s1618_s17 + $0xa0] sm:$0xff]  ;;  %v335_v0 = vld [vmem:[%s1618_s17 + $0x198] sm:$0xff]  ;;  %v305_v2 = vld [vmem:[%s1618_s17 + $0xa8] sm:$0xff] }
  0x1f   : > { %1463 = vmatprep.subr.bf16.mxu0 %v1462_v22  ;;  %1483 = vmatpush3.bf16.msra.mxu1 %v1458_v18  ;;  %v336_v1 = vld [vmem:[%s1618_s17 + $0x1a0] sm:$0xff]  ;;  %v306_v3 = vld [vmem:[%s1618_s17 + $0xb0] sm:$0xff]  ;;  %v337_v4 = vld [vmem:[%s1618_s17 + $0x1a8] sm:$0xff] }
  0x20   : > { %1476 = vmatprep.subr.bf16.mxu1 %v1462_v22  ;;  %v338_v5 = vld [vmem:[%s1618_s17 + $0x1b0] sm:$0xff]  ;;  %v307_v6 = vld [vmem:[%s1618_s17 + $0xb8] sm:$0xff]  ;;  %v308_v7 = vld [vmem:[%s1618_s17 + $0xc0] sm:$0xff] }
  0x21   : > { %v339_v8 = vld [vmem:[%s1618_s17 + $0x1b8] sm:$0xff]  ;;  %v340_v9 = vld [vmem:[%s1618_s17 + $0x1c0] sm:$0xff]  ;;  %v309_v10 = vld [vmem:[%s1618_s17 + $0xc8] sm:$0xff] }
  0x22   : > { %1465 = vmatpush3.bf16.msra.mxu0 %v1462_v22  ;;  %v310_v11 = vld [vmem:[%s1618_s17 + $0xd0] sm:$0xff]  ;;  %v341_v12 = vld [vmem:[%s1618_s17 + $0x1c8] sm:$0xff]  ;;  %v311_v14 = vld [vmem:[%s1618_s17 + $0xd8] sm:$0xff] }
  0x23   : > { %1467 = vmatprep.subr.bf16.mxu0 %v1466_v25  ;;  %1484 = vmatpush3.bf16.msra.mxu1 %v1462_v22  ;;  %v342_v13 = vld [vmem:[%s1618_s17 + $0x1d0] sm:$0xff]  ;;  %v312_v15 = vld [vmem:[%s1618_s17 + $0xe0] sm:$0xff]  ;;  %v343_v16 = vld [vmem:[%s1618_s17 + $0x1d8] sm:$0xff] }
  0x24   : > { %1477 = vmatprep.subr.bf16.mxu1 %v1466_v25  ;;  %v344_v17 = vld [vmem:[%s1618_s17 + $0x1e0] sm:$0xff]  ;;  %v313_v18 = vld [vmem:[%s1618_s17 + $0xe8] sm:$0xff]  ;;  %v314_v19 = vld [vmem:[%s1618_s17 + $0xf0] sm:$0xff] }
  0x25   : > { %v345_v20 = vld [vmem:[%s1618_s17 + $0x1e8] sm:$0xff]  ;;  %v346_v21 = vld [vmem:[%s1618_s17 + $0x1f0] sm:$0xff]  ;;  %v315_v22 = vld [vmem:[%s1618_s17 + $0xf8] sm:$0xff] }
  0x26   : > { %1469 = vmatpush3.bf16.msra.mxu0 %v1466_v25  ;;  %v347_v23 = vld [vmem:[%s1618_s17 + $0x1f8] sm:$0xff] }
  0x27   : > { %1485 = vmatpush3.bf16.msra.mxu1 %v1466_v25 }
  0x29   : > { %1343 = vmatmul.mubr.f32.vlgmr.msra.gmra.mrb[0].mxu0 %v285_v26 }
  0x2a   : > { %1345 = vmatprep.mubr.f32.mxu0 %v286_v27  ;;  %1391 = vmatmul.mubr.f32.vlgmr.msra.gmra.mrb[0].mxu1 %v317_v28 }
  0x2b   : > { %1393 = vmatprep.mubr.f32.mxu1 %v318_v29 }
  0x2d   : > { %1346 = vmatmul.mubr.f32.gmra.mrb[2].mxu0 %v287_v30 }
  0x2e   : > { %1348 = vmatprep.mubr.f32.mxu0 %v288_v31  ;;  %1394 = vmatmul.mubr.f32.gmra.mrb[2].mxu1 %v319_v32 }
  0x2f   : > { %1396 = vmatprep.mubr.f32.mxu1 %v320_v33 }
  0x31   : > { %1349 = vmatmul.mubr.f32.gmra.mrb[4].mxu0 %v289_v34 }
  0x32   : > { %1351 = vmatprep.mubr.f32.mxu0 %v290_v35  ;;  %1397 = vmatmul.mubr.f32.gmra.mrb[4].mxu1 %v321_v36 }
  0x33   : > { %1399 = vmatprep.mubr.f32.mxu1 %v322_v37 }
  0x35   : > { %1352 = vmatmul.mubr.f32.gmra.mrb[6].mxu0 %v291_v38 }
  0x36   : > { %1354 = vmatprep.mubr.f32.mxu0 %v292_v39  ;;  %1400 = vmatmul.mubr.f32.gmra.mrb[6].mxu1 %v323_v40 }
  0x37   : > { %1402 = vmatprep.mubr.f32.mxu1 %v324_v41 }
  0x39   : > { %1355 = vmatmul.mubr.f32.gmra.mrb[8].mxu0 %v293_v42 }
  0x3a   : > { %1357 = vmatprep.mubr.f32.mxu0 %v294_v43  ;;  %1403 = vmatmul.mubr.f32.gmra.mrb[8].mxu1 %v325_v44 }
  0x3b   : > { %1405 = vmatprep.mubr.f32.mxu1 %v326_v45 }
  0x3d   : > { %1358 = vmatmul.mubr.f32.gmra.mrb[10].mxu0 %v295_v46 }
  0x3e   : > { %1360 = vmatprep.mubr.f32.mxu0 %v296_v47  ;;  %1406 = vmatmul.mubr.f32.gmra.mrb[10].mxu1 %v327_v48 }
  0x3f   : > { %1408 = vmatprep.mubr.f32.mxu1 %v328_v49 }
  0x41   : > { %1361 = vmatmul.mubr.f32.gmra.mrb[12].mxu0 %v297_v50 }
  0x42   : > { %1363 = vmatprep.mubr.f32.mxu0 %v298_v51  ;;  %1409 = vmatmul.mubr.f32.gmra.mrb[12].mxu1 %v329_v52 }
  0x43   : > { %1411 = vmatprep.mubr.f32.mxu1 %v330_v53 }
  0x45   : > { %1364 = vmatmul.mubr.f32.gmra.mrb[14].mxu0 %v299_v54 }
  0x46   : > { %1366 = vmatprep.mubr.f32.mxu0 %v300_v55  ;;  %1412 = vmatmul.mubr.f32.gmra.mrb[14].mxu1 %v331_v56 }
  0x47   : > { %1414 = vmatprep.mubr.f32.mxu1 %v332_v57 }
  0x49   : > { %1367 = vmatmul.mubr.f32.gmra.mrb[16].mxu0 %v301_v58 }
  0x4a   : > { %1369 = vmatprep.mubr.f32.mxu0 %v302_v59  ;;  %1415 = vmatmul.mubr.f32.gmra.mrb[16].mxu1 %v333_v60 }
  0x4b   : > { %1417 = vmatprep.mubr.f32.mxu1 %v334_v61 }
  0x4d   : > { %1370 = vmatmul.mubr.f32.gmra.mrb[18].mxu0 %v303_v62 }
  0x4e   : > { %1372 = vmatprep.mubr.f32.mxu0 %v304_v63  ;;  %1418 = vmatmul.mubr.f32.gmra.mrb[18].mxu1 %v335_v0 }
  0x4f   : > { %1420 = vmatprep.mubr.f32.mxu1 %v336_v1 }
  0x51   : > { %1373 = vmatmul.mubr.f32.gmra.mrb[20].mxu0 %v305_v2 }
  0x52   : > { %1375 = vmatprep.mubr.f32.mxu0 %v306_v3  ;;  %1421 = vmatmul.mubr.f32.gmra.mrb[20].mxu1 %v337_v4 }
  0x53   : > { %1423 = vmatprep.mubr.f32.mxu1 %v338_v5 }
  0x55   : > { %1376 = vmatmul.mubr.f32.gmra.mrb[22].mxu0 %v307_v6 }
  0x56   : > { %1378 = vmatprep.mubr.f32.mxu0 %v308_v7  ;;  %1424 = vmatmul.mubr.f32.gmra.mrb[22].mxu1 %v339_v8 }
  0x57   : > { %1426 = vmatprep.mubr.f32.mxu1 %v340_v9 }
  0x59   : > { %1379 = vmatmul.mubr.f32.gmra.mrb[24].mxu0 %v309_v10 }
  0x5a   : > { %1381 = vmatprep.mubr.f32.mxu0 %v310_v11  ;;  %1427 = vmatmul.mubr.f32.gmra.mrb[24].mxu1 %v341_v12 }
  0x5b   : > { %1429 = vmatprep.mubr.f32.mxu1 %v342_v13 }
  0x5d   : > { %1382 = vmatmul.mubr.f32.gmra.mrb[26].mxu0 %v311_v14 }
  0x5e   : > { %1384 = vmatprep.mubr.f32.mxu0 %v312_v15  ;;  %1430 = vmatmul.mubr.f32.gmra.mrb[26].mxu1 %v343_v16 }
  0x5f   : > { %1432 = vmatprep.mubr.f32.mxu1 %v344_v17 }
  0x61   : > { %1385 = vmatmul.mubr.f32.gmra.mrb[28].mxu0 %v313_v18 }
  0x62   : > { %1387 = vmatprep.mubr.f32.mxu0 %v314_v19  ;;  %1433 = vmatmul.mubr.f32.gmra.mrb[28].mxu1 %v345_v20 }
  0x63   : > { %1435 = vmatprep.mubr.f32.mxu1 %v346_v21 }
  0x65   : > { %1388 = vmatmul.mubr.f32.gmra.mrb[30].mxu0 %v315_v22 }
  0x66   : > { %1436 = vmatmul.mubr.f32.gmra.mrb[30].mxu1 %v347_v23 }
  0xfc   : > { %v1344_v25 = vpop.f32.mrb[0].mxu0 }
  0xfd   : > { %v443_v26 = vadd.f32 %v1344_v25, %v1711_v24  ;;  %v437_v27 = vpop.f32.mrb[1].mxu0  ;;  %v1392_v28 = vpop.f32.mrb[0].mxu1 }
  0xfe   : > { %v438_v29 = vadd.f32 %v1711_v24, %v437_v27  ;;  %v603_v30 = vadd.f32 %v1392_v28, %v1711_v24  ;;  %v597_v31 = vpop.f32.mrb[1].mxu1 }
  0xff   : > { %v757_v32 = vmax.f32 %v443_v26, 0.0  ;;  %v598_v33 = vadd.f32 %v1711_v24, %v597_v31 }
 0x100   : > { %v756_v34 = vmax.f32 %v438_v29, 0.0  ;;  %v1347_v35 = vpop.f32.mrb[2].mxu0  ;;  %v1724_v36 = vmax.f32 %v603_v30, 0.0 }
 0x101   : > { %821 = vst [vmem:[%s1719_s24 + $0x8] sm:$0xff] %v757_v32  ;;  %v952_v37 = vmul.f32 %v757_v32, %v757_v32  ;;  %v453_v38 = vadd.f32 %v1347_v35, %v1711_v24  ;;  %v447_v39 = vpop.f32.mrb[3].mxu0  ;;  %v1728_v40 = vmax.f32 %v598_v33, 0.0  ;;  %v1395_v41 = vpop.f32.mrb[2].mxu1 }
 0x102   : > { %820 = vst [vmem:[%s1719_s24] sm:$0xff] %v756_v34  ;;  %v885_v42 = vadd.f32 %v757_v32, %v756_v34  ;;  %v951_v43 = vmul.f32 %v756_v34, %v756_v34  ;;  %v448_v44 = vadd.f32 %v1711_v24, %v447_v39  ;;  %853 = vst [vmem:[%s1719_s24 + $0x108] sm:$0xff] %v1724_v36  ;;  %v607_v45 = vpop.f32.mrb[3].mxu1 }
 0x103   : > { %v759_v46 = vmax.f32 %v453_v38, 0.0  ;;  %852 = vst [vmem:[%s1719_s24 + $0x100] sm:$0xff] %v1728_v40  ;;  %v613_v47 = vadd.f32 %v1395_v41, %v1711_v24  ;;  %v608_v48 = vadd.f32 %v1711_v24, %v607_v45 }
 0x104   : > { %v1015_v49 = vadd.f32 %v952_v37, %v951_v43  ;;  %v758_v50 = vmax.f32 %v448_v44, 0.0  ;;  %v1350_v51 = vpop.f32.mrb[4].mxu0 }
 0x105   : > { %823 = vst [vmem:[%s1719_s24 + $0x18] sm:$0xff] %v759_v46  ;;  %v463_v52 = vadd.f32 %v1350_v51, %v1711_v24  ;;  %v457_v53 = vpop.f32.mrb[5].mxu0  ;;  %v1740_v54 = vmax.f32 %v613_v47, 0.0  ;;  %v1742_v55 = vmax.f32 %v608_v48, 0.0  ;;  %v1398_v56 = vpop.f32.mrb[4].mxu1  ;;  %v954_v62 = vmul.f32 %v759_v46, %v759_v46 }
 0x106   : > { %822 = vst [vmem:[%s1719_s24 + $0x10] sm:$0xff] %v758_v50  ;;  %v886_v57 = vadd.f32 %v885_v42, %v758_v50  ;;  %v953_v58 = vmul.f32 %v758_v50, %v758_v50  ;;  %v458_v59 = vadd.f32 %v1711_v24, %v457_v53  ;;  %v623_v60 = vadd.f32 %v1398_v56, %v1711_v24  ;;  %v617_v61 = vpop.f32.mrb[5].mxu1 }
 0x107   : > { %v761_v63 = vmax.f32 %v463_v52, 0.0  ;;  %855 = vst [vmem:[%s1719_s24 + $0x118] sm:$0xff] %v1740_v54  ;;  %854 = vst [vmem:[%s1719_s24 + $0x110] sm:$0xff] %v1742_v55  ;;  %v618_v0 = vadd.f32 %v1711_v24, %v617_v61 }
 0x108   : > { %v1016_v1 = vadd.f32 %v1015_v49, %v953_v58  ;;  %v760_v2 = vmax.f32 %v458_v59, 0.0  ;;  %v887_v3 = vadd.f32 %v886_v57, %v759_v46  ;;  %v1353_v4 = vpop.f32.mrb[6].mxu0  ;;  %v1752_v5 = vmax.f32 %v623_v60, 0.0 }
 0x109   : > { %825 = vst [vmem:[%s1719_s24 + $0x28] sm:$0xff] %v761_v63  ;;  %v473_v6 = vadd.f32 %v1353_v4, %v1711_v24  ;;  %v467_v7 = vpop.f32.mrb[7].mxu0  ;;  %v1756_v8 = vmax.f32 %v618_v0, 0.0  ;;  %v1401_v9 = vpop.f32.mrb[6].mxu1  ;;  %v956_v15 = vmul.f32 %v761_v63, %v761_v63 }
 0x10a   : > { %824 = vst [vmem:[%s1719_s24 + $0x20] sm:$0xff] %v760_v2  ;;  %v888_v10 = vadd.f32 %v887_v3, %v760_v2  ;;  %v955_v11 = vmul.f32 %v760_v2, %v760_v2  ;;  %v1017_v12 = vadd.f32 %v1016_v1, %v954_v62  ;;  %v468_v13 = vadd.f32 %v1711_v24, %v467_v7  ;;  %v627_v14 = vpop.f32.mrb[7].mxu1 }
 0x10b   : > { %857 = vst [vmem:[%s1719_s24 + $0x128] sm:$0xff] %v1752_v5  ;;  %v763_v16 = vmax.f32 %v473_v6, 0.0  ;;  %856 = vst [vmem:[%s1719_s24 + $0x120] sm:$0xff] %v1756_v8  ;;  %v633_v17 = vadd.f32 %v1401_v9, %v1711_v24  ;;  %v628_v22 = vadd.f32 %v1711_v24, %v627_v14 }
 0x10c   : > { %v1018_v18 = vadd.f32 %v1017_v12, %v955_v11  ;;  %v762_v19 = vmax.f32 %v468_v13, 0.0  ;;  %v889_v20 = vadd.f32 %v888_v10, %v761_v63  ;;  %v1356_v21 = vpop.f32.mrb[8].mxu0 }
 0x10d   : > { %827 = vst [vmem:[%s1719_s24 + $0x38] sm:$0xff] %v763_v16  ;;  %v483_v23 = vadd.f32 %v1356_v21, %v1711_v24  ;;  %v477_v25 = vpop.f32.mrb[9].mxu0  ;;  %v1768_v26 = vmax.f32 %v633_v17, 0.0  ;;  %v1404_v27 = vpop.f32.mrb[8].mxu1  ;;  %v958_v33 = vmul.f32 %v763_v16, %v763_v16  ;;  %v1774_v35 = vmax.f32 %v628_v22, 0.0 }
 0x10e   : > { %826 = vst [vmem:[%s1719_s24 + $0x30] sm:$0xff] %v762_v19  ;;  %v890_v28 = vadd.f32 %v889_v20, %v762_v19  ;;  %v957_v29 = vmul.f32 %v762_v19, %v762_v19  ;;  %v1019_v30 = vadd.f32 %v1018_v18, %v956_v15  ;;  %v478_v31 = vadd.f32 %v1711_v24, %v477_v25  ;;  %v637_v32 = vpop.f32.mrb[9].mxu1 }
 0x10f   : > { %v765_v34 = vmax.f32 %v483_v23, 0.0  ;;  %859 = vst [vmem:[%s1719_s24 + $0x138] sm:$0xff] %v1768_v26  ;;  %v643_v37 = vadd.f32 %v1404_v27, %v1711_v24  ;;  %v638_v43 = vadd.f32 %v1711_v24, %v637_v32  ;;  %858 = vst [vmem:[%s1719_s24 + $0x130] sm:$0xff] %v1774_v35 }
 0x110   : > { %v1020_v38 = vadd.f32 %v1019_v30, %v957_v29  ;;  %v764_v39 = vmax.f32 %v478_v31, 0.0  ;;  %v891_v41 = vadd.f32 %v890_v28, %v763_v16  ;;  %v1359_v42 = vpop.f32.mrb[10].mxu0 }
 0x111   : > { %829 = vst [vmem:[%s1719_s24 + $0x48] sm:$0xff] %v765_v34  ;;  %v493_v44 = vadd.f32 %v1359_v42, %v1711_v24  ;;  %v487_v45 = vpop.f32.mrb[11].mxu0  ;;  %v1782_v46 = vmax.f32 %v643_v37, 0.0  ;;  %v1407_v47 = vpop.f32.mrb[10].mxu1  ;;  %v960_v53 = vmul.f32 %v765_v34, %v765_v34  ;;  %v1788_v57 = vmax.f32 %v638_v43, 0.0 }
 0x112   : > { %828 = vst [vmem:[%s1719_s24 + $0x40] sm:$0xff] %v764_v39  ;;  %v892_v48 = vadd.f32 %v891_v41, %v764_v39  ;;  %v959_v49 = vmul.f32 %v764_v39, %v764_v39  ;;  %v1021_v50 = vadd.f32 %v1020_v38, %v958_v33  ;;  %v488_v51 = vadd.f32 %v1711_v24, %v487_v45  ;;  %v647_v52 = vpop.f32.mrb[11].mxu1 }
 0x113   : > { %v767_v56 = vmax.f32 %v493_v44, 0.0  ;;  %861 = vst [vmem:[%s1719_s24 + $0x148] sm:$0xff] %v1782_v46  ;;  %v653_v58 = vadd.f32 %v1407_v47, %v1711_v24  ;;  %v648_v63 = vadd.f32 %v1711_v24, %v647_v52  ;;  %860 = vst [vmem:[%s1719_s24 + $0x140] sm:$0xff] %v1788_v57 }
 0x114   : > { %v1022_v59 = vadd.f32 %v1021_v50, %v959_v49  ;;  %v766_v60 = vmax.f32 %v488_v51, 0.0  ;;  %v893_v61 = vadd.f32 %v892_v48, %v765_v34  ;;  %v1362_v62 = vpop.f32.mrb[12].mxu0 }
 0x115   : > { %831 = vst [vmem:[%s1719_s24 + $0x58] sm:$0xff] %v767_v56  ;;  %v503_v0 = vadd.f32 %v1362_v62, %v1711_v24  ;;  %v497_v1 = vpop.f32.mrb[13].mxu0  ;;  %v1796_v2 = vmax.f32 %v653_v58, 0.0  ;;  %v1410_v3 = vpop.f32.mrb[12].mxu1  ;;  %v962_v11 = vmul.f32 %v767_v56, %v767_v56  ;;  %v1802_v13 = vmax.f32 %v648_v63, 0.0 }
 0x116   : > { %830 = vst [vmem:[%s1719_s24 + $0x50] sm:$0xff] %v766_v60  ;;  %v894_v4 = vadd.f32 %v893_v61, %v766_v60  ;;  %v961_v6 = vmul.f32 %v766_v60, %v766_v60  ;;  %v1023_v7 = vadd.f32 %v1022_v59, %v960_v53  ;;  %v498_v9 = vadd.f32 %v1711_v24, %v497_v1  ;;  %v657_v10 = vpop.f32.mrb[13].mxu1 }
 0x117   : > { %v769_v12 = vmax.f32 %v503_v0, 0.0  ;;  %863 = vst [vmem:[%s1719_s24 + $0x158] sm:$0xff] %v1796_v2  ;;  %v663_v14 = vadd.f32 %v1410_v3, %v1711_v24  ;;  %v658_v19 = vadd.f32 %v1711_v24, %v657_v10  ;;  %862 = vst [vmem:[%s1719_s24 + $0x150] sm:$0xff] %v1802_v13 }
 0x118   : > { %v1024_v15 = vadd.f32 %v1023_v7, %v961_v6  ;;  %v768_v16 = vmax.f32 %v498_v9, 0.0  ;;  %v895_v17 = vadd.f32 %v894_v4, %v767_v56  ;;  %v1365_v18 = vpop.f32.mrb[14].mxu0 }
 0x119   : > { %833 = vst [vmem:[%s1719_s24 + $0x68] sm:$0xff] %v769_v12  ;;  %v513_v20 = vadd.f32 %v1365_v18, %v1711_v24  ;;  %v507_v21 = vpop.f32.mrb[15].mxu0  ;;  %v1810_v22 = vmax.f32 %v663_v14, 0.0  ;;  %v1413_v23 = vpop.f32.mrb[14].mxu1  ;;  %v964_v31 = vmul.f32 %v769_v12, %v769_v12  ;;  %v1816_v33 = vmax.f32 %v658_v19, 0.0 }
 0x11a   : > { %832 = vst [vmem:[%s1719_s24 + $0x60] sm:$0xff] %v768_v16  ;;  %v896_v25 = vadd.f32 %v895_v17, %v768_v16  ;;  %v963_v27 = vmul.f32 %v768_v16, %v768_v16  ;;  %v1025_v28 = vadd.f32 %v1024_v15, %v962_v11  ;;  %v508_v29 = vadd.f32 %v1711_v24, %v507_v21  ;;  %v667_v30 = vpop.f32.mrb[15].mxu1 }
 0x11b   : > { %v771_v32 = vmax.f32 %v513_v20, 0.0  ;;  %865 = vst [vmem:[%s1719_s24 + $0x168] sm:$0xff] %v1810_v22  ;;  %v673_v34 = vadd.f32 %v1413_v23, %v1711_v24  ;;  %v668_v42 = vadd.f32 %v1711_v24, %v667_v30  ;;  %864 = vst [vmem:[%s1719_s24 + $0x160] sm:$0xff] %v1816_v33 }
 0x11c   : > { %v1026_v37 = vadd.f32 %v1025_v28, %v963_v27  ;;  %v770_v38 = vmax.f32 %v508_v29, 0.0  ;;  %v897_v39 = vadd.f32 %v896_v25, %v769_v12  ;;  %v1368_v41 = vpop.f32.mrb[16].mxu0 }
 0x11d   : > { %835 = vst [vmem:[%s1719_s24 + $0x78] sm:$0xff] %v771_v32  ;;  %v523_v43 = vadd.f32 %v1368_v41, %v1711_v24  ;;  %v517_v44 = vpop.f32.mrb[17].mxu0  ;;  %v1824_v45 = vmax.f32 %v673_v34, 0.0  ;;  %v1416_v47 = vpop.f32.mrb[16].mxu1  ;;  %v966_v53 = vmul.f32 %v771_v32, %v771_v32  ;;  %v1830_v58 = vmax.f32 %v668_v42, 0.0 }
 0x11e   : > { %834 = vst [vmem:[%s1719_s24 + $0x70] sm:$0xff] %v770_v38  ;;  %v898_v48 = vadd.f32 %v897_v39, %v770_v38  ;;  %v965_v49 = vmul.f32 %v770_v38, %v770_v38  ;;  %v1027_v50 = vadd.f32 %v1026_v37, %v964_v31  ;;  %v518_v51 = vadd.f32 %v1711_v24, %v517_v44  ;;  %v677_v52 = vpop.f32.mrb[17].mxu1 }
 0x11f   : > { %v773_v56 = vmax.f32 %v523_v43, 0.0  ;;  %867 = vst [vmem:[%s1719_s24 + $0x178] sm:$0xff] %v1824_v45  ;;  %v683_v59 = vadd.f32 %v1416_v47, %v1711_v24  ;;  %v678_v0 = vadd.f32 %v1711_v24, %v677_v52  ;;  %866 = vst [vmem:[%s1719_s24 + $0x170] sm:$0xff] %v1830_v58 }
 0x120   : > { %v1028_v60 = vadd.f32 %v1027_v50, %v965_v49  ;;  %v772_v61 = vmax.f32 %v518_v51, 0.0  ;;  %v899_v62 = vadd.f32 %v898_v48, %v771_v32  ;;  %v1371_v63 = vpop.f32.mrb[18].mxu0 }
 0x121   : > { %837 = vst [vmem:[%s1719_s24 + $0x88] sm:$0xff] %v773_v56  ;;  %v533_v1 = vadd.f32 %v1371_v63, %v1711_v24  ;;  %v527_v3 = vpop.f32.mrb[19].mxu0  ;;  %v1838_v4 = vmax.f32 %v683_v59, 0.0  ;;  %v1419_v6 = vpop.f32.mrb[18].mxu1  ;;  %v968_v14 = vmul.f32 %v773_v56, %v773_v56  ;;  %v1844_v16 = vmax.f32 %v678_v0, 0.0 }
 0x122   : > { %836 = vst [vmem:[%s1719_s24 + $0x80] sm:$0xff] %v772_v61  ;;  %v900_v7 = vadd.f32 %v899_v62, %v772_v61  ;;  %v967_v9 = vmul.f32 %v772_v61, %v772_v61  ;;  %v1029_v10 = vadd.f32 %v1028_v60, %v966_v53  ;;  %v528_v11 = vadd.f32 %v1711_v24, %v527_v3  ;;  %v687_v12 = vpop.f32.mrb[19].mxu1 }
 0x123   : > { %v775_v15 = vmax.f32 %v533_v1, 0.0  ;;  %869 = vst [vmem:[%s1719_s24 + $0x188] sm:$0xff] %v1838_v4  ;;  %v693_v17 = vadd.f32 %v1419_v6, %v1711_v24  ;;  %v688_v23 = vadd.f32 %v1711_v24, %v687_v12  ;;  %868 = vst [vmem:[%s1719_s24 + $0x180] sm:$0xff] %v1844_v16 }
 0x124   : > { %v1030_v18 = vadd.f32 %v1029_v10, %v967_v9  ;;  %v774_v19 = vmax.f32 %v528_v11, 0.0  ;;  %v901_v20 = vadd.f32 %v900_v7, %v773_v56  ;;  %v1374_v21 = vpop.f32.mrb[20].mxu0 }
 0x125   : > { %839 = vst [vmem:[%s1719_s24 + $0x98] sm:$0xff] %v775_v15  ;;  %v543_v25 = vadd.f32 %v1374_v21, %v1711_v24  ;;  %v537_v27 = vpop.f32.mrb[21].mxu0  ;;  %v1852_v28 = vmax.f32 %v693_v17, 0.0  ;;  %v1422_v29 = vpop.f32.mrb[20].mxu1  ;;  %v970_v38 = vmul.f32 %v775_v15, %v775_v15  ;;  %v1858_v41 = vmax.f32 %v688_v23, 0.0 }
 0x126   : > { %838 = vst [vmem:[%s1719_s24 + $0x90] sm:$0xff] %v774_v19  ;;  %v902_v30 = vadd.f32 %v901_v20, %v774_v19  ;;  %v969_v31 = vmul.f32 %v774_v19, %v774_v19  ;;  %v1031_v32 = vadd.f32 %v1030_v18, %v968_v14  ;;  %v538_v34 = vadd.f32 %v1711_v24, %v537_v27  ;;  %v697_v37 = vpop.f32.mrb[21].mxu1 }
 0x127   : > { %v777_v39 = vmax.f32 %v543_v25, 0.0  ;;  %871 = vst [vmem:[%s1719_s24 + $0x198] sm:$0xff] %v1852_v28  ;;  %v703_v42 = vadd.f32 %v1422_v29, %v1711_v24  ;;  %v698_v49 = vadd.f32 %v1711_v24, %v697_v37  ;;  %870 = vst [vmem:[%s1719_s24 + $0x190] sm:$0xff] %v1858_v41 }
 0x128   : > { %v1032_v43 = vadd.f32 %v1031_v32, %v969_v31  ;;  %v776_v44 = vmax.f32 %v538_v34, 0.0  ;;  %v903_v47 = vadd.f32 %v902_v30, %v775_v15  ;;  %v1377_v48 = vpop.f32.mrb[22].mxu0 }
 0x129   : > { %841 = vst [vmem:[%s1719_s24 + $0xa8] sm:$0xff] %v777_v39  ;;  %v553_v50 = vadd.f32 %v1377_v48, %v1711_v24  ;;  %v547_v51 = vpop.f32.mrb[23].mxu0  ;;  %v1866_v52 = vmax.f32 %v703_v42, 0.0  ;;  %v1425_v53 = vpop.f32.mrb[22].mxu1  ;;  %v972_v63 = vmul.f32 %v777_v39, %v777_v39  ;;  %v1872_v1 = vmax.f32 %v698_v49, 0.0 }
 0x12a   : > { %840 = vst [vmem:[%s1719_s24 + $0xa0] sm:$0xff] %v776_v44  ;;  %v904_v56 = vadd.f32 %v903_v47, %v776_v44  ;;  %v971_v59 = vmul.f32 %v776_v44, %v776_v44  ;;  %v1033_v60 = vadd.f32 %v1032_v43, %v970_v38  ;;  %v548_v61 = vadd.f32 %v1711_v24, %v547_v51  ;;  %v707_v62 = vpop.f32.mrb[23].mxu1 }
 0x12b   : > { %v779_v0 = vmax.f32 %v553_v50, 0.0  ;;  %873 = vst [vmem:[%s1719_s24 + $0x1a8] sm:$0xff] %v1866_v52  ;;  %v713_v3 = vadd.f32 %v1425_v53, %v1711_v24  ;;  %v708_v11 = vadd.f32 %v1711_v24, %v707_v62  ;;  %872 = vst [vmem:[%s1719_s24 + $0x1a0] sm:$0xff] %v1872_v1 }
 0x12c   : > { %v1034_v6 = vadd.f32 %v1033_v60, %v971_v59  ;;  %v778_v7 = vmax.f32 %v548_v61, 0.0  ;;  %v905_v9 = vadd.f32 %v904_v56, %v777_v39  ;;  %v1380_v10 = vpop.f32.mrb[24].mxu0 }
 0x12d   : > { %843 = vst [vmem:[%s1719_s24 + $0xb8] sm:$0xff] %v779_v0  ;;  %v563_v12 = vadd.f32 %v1380_v10, %v1711_v24  ;;  %v557_v14 = vpop.f32.mrb[25].mxu0  ;;  %v1880_v15 = vmax.f32 %v713_v3, 0.0  ;;  %v1428_v17 = vpop.f32.mrb[24].mxu1  ;;  %v974_v25 = vmul.f32 %v779_v0, %v779_v0  ;;  %v1886_v29 = vmax.f32 %v708_v11, 0.0 }
 0x12e   : > { %842 = vst [vmem:[%s1719_s24 + $0xb0] sm:$0xff] %v778_v7  ;;  %v906_v18 = vadd.f32 %v905_v9, %v778_v7  ;;  %v973_v19 = vmul.f32 %v778_v7, %v778_v7  ;;  %v1035_v20 = vadd.f32 %v1034_v6, %v972_v63  ;;  %v558_v21 = vadd.f32 %v1711_v24, %v557_v14  ;;  %v717_v23 = vpop.f32.mrb[25].mxu1 }
 0x12f   : > { %v781_v27 = vmax.f32 %v563_v12, 0.0  ;;  %875 = vst [vmem:[%s1719_s24 + $0x1b8] sm:$0xff] %v1880_v15  ;;  %v723_v30 = vadd.f32 %v1428_v17, %v1711_v24  ;;  %v718_v38 = vadd.f32 %v1711_v24, %v717_v23  ;;  %874 = vst [vmem:[%s1719_s24 + $0x1b0] sm:$0xff] %v1886_v29 }
 0x130   : > { %v1036_v31 = vadd.f32 %v1035_v20, %v973_v19  ;;  %v780_v32 = vmax.f32 %v558_v21, 0.0  ;;  %v907_v34 = vadd.f32 %v906_v18, %v779_v0  ;;  %v1383_v37 = vpop.f32.mrb[26].mxu0 }
 0x131   : > { %845 = vst [vmem:[%s1719_s24 + $0xc8] sm:$0xff] %v781_v27  ;;  %v573_v39 = vadd.f32 %v1383_v37, %v1711_v24  ;;  %v567_v42 = vpop.f32.mrb[27].mxu0  ;;  %v1894_v43 = vmax.f32 %v723_v30, 0.0  ;;  %v1431_v44 = vpop.f32.mrb[26].mxu1  ;;  %v976_v53 = vmul.f32 %v781_v27, %v781_v27  ;;  %v1900_v59 = vmax.f32 %v718_v38, 0.0 }
 0x132   : > { %844 = vst [vmem:[%s1719_s24 + $0xc0] sm:$0xff] %v780_v32  ;;  %v908_v47 = vadd.f32 %v907_v34, %v780_v32  ;;  %v975_v48 = vmul.f32 %v780_v32, %v780_v32  ;;  %v1037_v49 = vadd.f32 %v1036_v31, %v974_v25  ;;  %v568_v50 = vadd.f32 %v1711_v24, %v567_v42  ;;  %v727_v51 = vpop.f32.mrb[27].mxu1 }
 0x133   : > { %v783_v56 = vmax.f32 %v573_v39, 0.0  ;;  %877 = vst [vmem:[%s1719_s24 + $0x1c8] sm:$0xff] %v1894_v43  ;;  %v733_v60 = vadd.f32 %v1431_v44, %v1711_v24  ;;  %v728_v3 = vadd.f32 %v1711_v24, %v727_v51  ;;  %876 = vst [vmem:[%s1719_s24 + $0x1c0] sm:$0xff] %v1900_v59 }
 0x134   : > { %v1038_v61 = vadd.f32 %v1037_v49, %v975_v48  ;;  %v782_v62 = vmax.f32 %v568_v50, 0.0  ;;  %v909_v63 = vadd.f32 %v908_v47, %v781_v27  ;;  %v1386_v0 = vpop.f32.mrb[28].mxu0 }
 0x135   : > { %847 = vst [vmem:[%s1719_s24 + $0xd8] sm:$0xff] %v783_v56  ;;  %v583_v6 = vadd.f32 %v1386_v0, %v1711_v24  ;;  %v577_v7 = vpop.f32.mrb[29].mxu0  ;;  %v1908_v9 = vmax.f32 %v733_v60, 0.0  ;;  %v1434_v10 = vpop.f32.mrb[28].mxu1  ;;  %v978_v19 = vmul.f32 %v783_v56, %v783_v56  ;;  %v1914_v21 = vmax.f32 %v728_v3, 0.0 }
 0x136   : > { %846 = vst [vmem:[%s1719_s24 + $0xd0] sm:$0xff] %v782_v62  ;;  %v910_v11 = vadd.f32 %v909_v63, %v782_v62  ;;  %v977_v12 = vmul.f32 %v782_v62, %v782_v62  ;;  %v1039_v14 = vadd.f32 %v1038_v61, %v976_v53  ;;  %v578_v17 = vadd.f32 %v1711_v24, %v577_v7  ;;  %v737_v18 = vpop.f32.mrb[29].mxu1 }
 0x137   : > { %v785_v20 = vmax.f32 %v583_v6, 0.0  ;;  %879 = vst [vmem:[%s1719_s24 + $0x1d8] sm:$0xff] %v1908_v9  ;;  %v743_v23 = vadd.f32 %v1434_v10, %v1711_v24  ;;  %v738_v32 = vadd.f32 %v1711_v24, %v737_v18  ;;  %878 = vst [vmem:[%s1719_s24 + $0x1d0] sm:$0xff] %v1914_v21 }
 0x138   : > { %v1040_v25 = vadd.f32 %v1039_v14, %v977_v12  ;;  %v784_v27 = vmax.f32 %v578_v17, 0.0  ;;  %v911_v30 = vadd.f32 %v910_v11, %v783_v56  ;;  %v1389_v31 = vpop.f32.mrb[30].mxu0  ;;  %v983_v17 = vmul.f32 %v1728_v40, %v1728_v40 }
 0x139   : > { %849 = vst [vmem:[%s1719_s24 + $0xe8] sm:$0xff] %v785_v20  ;;  %v593_v34 = vadd.f32 %v1389_v31, %v1711_v24  ;;  %v587_v37 = vpop.f32.mrb[31].mxu0  ;;  %v1922_v38 = vmax.f32 %v743_v23, 0.0  ;;  %v1437_v39 = vpop.f32.mrb[30].mxu1  ;;  %v980_v50 = vmul.f32 %v785_v20, %v785_v20  ;;  %v1928_v53 = vmax.f32 %v738_v32, 0.0 }
 0x13a   : > { %848 = vst [vmem:[%s1719_s24 + $0xe0] sm:$0xff] %v784_v27  ;;  %v912_v42 = vadd.f32 %v911_v30, %v784_v27  ;;  %v979_v44 = vmul.f32 %v784_v27, %v784_v27  ;;  %v1041_v47 = vadd.f32 %v1040_v25, %v978_v19  ;;  %v588_v48 = vadd.f32 %v1711_v24, %v587_v37  ;;  %v747_v49 = vpop.f32.mrb[31].mxu1 }
 0x13b   : > { %v787_v51 = vmax.f32 %v593_v34, 0.0  ;;  %881 = vst [vmem:[%s1719_s24 + $0x1e8] sm:$0xff] %v1922_v38  ;;  %v753_v56 = vadd.f32 %v1437_v39, %v1711_v24  ;;  %v748_v63 = vadd.f32 %v1711_v24, %v747_v49  ;;  %880 = vst [vmem:[%s1719_s24 + $0x1e0] sm:$0xff] %v1928_v53  ;;  %v984_v19 = vmul.f32 %v1724_v36, %v1724_v36 }
 0x13c   : > { %v1042_v60 = vadd.f32 %v1041_v47, %v979_v44  ;;  %v786_v61 = vmax.f32 %v588_v48, 0.0  ;;  %v913_v62 = vadd.f32 %v912_v42, %v785_v20  ;;  %v985_v25 = vmul.f32 %v1742_v55, %v1742_v55 }
 0x13d   : > { %851 = vst [vmem:[%s1719_s24 + $0xf8] sm:$0xff] %v787_v51  ;;  %v1935_v0 = vmax.f32 %v753_v56, 0.0  ;;  %v1938_v10 = vmax.f32 %v748_v63, 0.0  ;;  %v982_v11 = vmul.f32 %v787_v51, %v787_v51  ;;  %v986_v31 = vmul.f32 %v1740_v54, %v1740_v54 }
 0x13e   : > { %850 = vst [vmem:[%s1719_s24 + $0xf0] sm:$0xff] %v786_v61  ;;  %v914_v3 = vadd.f32 %v913_v62, %v786_v61  ;;  %v981_v6 = vmul.f32 %v786_v61, %v786_v61  ;;  %v1043_v7 = vadd.f32 %v1042_v60, %v980_v50 }
 0x13f   : > { %883 = vst [vmem:[%s1719_s24 + $0x1f8] sm:$0xff] %v1935_v0  ;;  %882 = vst [vmem:[%s1719_s24 + $0x1f0] sm:$0xff] %v1938_v10 }
 0x140   : > { %v1044_v12 = vadd.f32 %v1043_v7, %v981_v6  ;;  %v915_v14 = vadd.f32 %v914_v3, %v787_v51 }
 0x142   : > { %v916_v24 = vadd.f32 %v915_v14, %v1728_v40  ;;  %v1045_v18 = vadd.f32 %v1044_v12, %v982_v11  ;;  %v987_v40 = vmul.f32 %v1756_v8, %v1756_v8 }
 0x144   : > { %v1046_v20 = vadd.f32 %v1045_v18, %v983_v17  ;;  %v917_v23 = vadd.f32 %v916_v24, %v1724_v36  ;;  %v988_v36 = vmul.f32 %v1752_v5, %v1752_v5 }
 0x146   : > { %v918_v27 = vadd.f32 %v917_v23, %v1742_v55  ;;  %v1047_v30 = vadd.f32 %v1046_v20, %v984_v19  ;;  %v989_v55 = vmul.f32 %v1774_v35, %v1774_v35 }
 0x148   : > { %v1048_v32 = vadd.f32 %v1047_v30, %v985_v25  ;;  %v919_v34 = vadd.f32 %v918_v27, %v1740_v54  ;;  %v990_v54 = vmul.f32 %v1768_v26, %v1768_v26 }
 0x14a   : > { %v920_v37 = vadd.f32 %v919_v34, %v1756_v8  ;;  %v1049_v39 = vadd.f32 %v1048_v32, %v986_v31  ;;  %v991_v8 = vmul.f32 %v1788_v57, %v1788_v57 }
 0x14c   : > { %v1050_v42 = vadd.f32 %v1049_v39, %v987_v40  ;;  %v921_v44 = vadd.f32 %v920_v37, %v1752_v5  ;;  %v992_v5 = vmul.f32 %v1782_v46, %v1782_v46 }
 0x14e   : > { %v922_v47 = vadd.f32 %v921_v44, %v1774_v35  ;;  %v1051_v48 = vadd.f32 %v1050_v42, %v988_v36  ;;  %v993_v35 = vmul.f32 %v1802_v13, %v1802_v13 }
 0x150   : > { %v1052_v49 = vadd.f32 %v1051_v48, %v989_v55  ;;  %v923_v50 = vadd.f32 %v922_v47, %v1768_v26  ;;  %v994_v26 = vmul.f32 %v1796_v2, %v1796_v2  ;;  %v1007_v47 = vmul.f32 %v1900_v59, %v1900_v59 }
 0x152   : > { %v924_v51 = vadd.f32 %v923_v50, %v1788_v57  ;;  %v1053_v56 = vadd.f32 %v1052_v49, %v990_v54  ;;  %v995_v57 = vmul.f32 %v1816_v33, %v1816_v33  ;;  %v1008_v54 = vmul.f32 %v1894_v43, %v1894_v43 }
 0x153   : > { %v1009_v50 = vmul.f32 %v1914_v21, %v1914_v21 }
 0x154   : > { %v1054_v60 = vadd.f32 %v1053_v56, %v991_v8  ;;  %v925_v61 = vadd.f32 %v924_v51, %v1782_v46  ;;  %v996_v46 = vmul.f32 %v1810_v22, %v1810_v22 }
 0x156   : > { %v926_v62 = vadd.f32 %v925_v61, %v1802_v13  ;;  %v1055_v63 = vadd.f32 %v1054_v60, %v992_v5  ;;  %v997_v13 = vmul.f32 %v1830_v58, %v1830_v58  ;;  %v1011_v5 = vmul.f32 %v1928_v53, %v1928_v53 }
 0x158   : > { %v1056_v3 = vadd.f32 %v1055_v63, %v993_v35  ;;  %v927_v6 = vadd.f32 %v926_v62, %v1796_v2  ;;  %v998_v2 = vmul.f32 %v1824_v45, %v1824_v45  ;;  %v1013_v62 = vmul.f32 %v1938_v10, %v1938_v10 }
 0x15a   : > { %v928_v7 = vadd.f32 %v927_v6, %v1816_v33  ;;  %v1057_v11 = vadd.f32 %v1056_v3, %v994_v26  ;;  %v999_v33 = vmul.f32 %v1844_v16, %v1844_v16  ;;  %v1014_v26 = vmul.f32 %v1935_v0, %v1935_v0 }
 0x15c   : > { %v1058_v12 = vadd.f32 %v1057_v11, %v995_v57  ;;  %v929_v14 = vadd.f32 %v928_v7, %v1810_v22  ;;  %v1000_v22 = vmul.f32 %v1838_v4, %v1838_v4 }
 0x15e   : > { %v930_v17 = vadd.f32 %v929_v14, %v1830_v58  ;;  %v1059_v24 = vadd.f32 %v1058_v12, %v996_v46  ;;  %v1001_v58 = vmul.f32 %v1858_v41, %v1858_v41 }
 0x160   : > { %v1060_v18 = vadd.f32 %v1059_v24, %v997_v13  ;;  %v931_v19 = vadd.f32 %v930_v17, %v1824_v45  ;;  %v1002_v45 = vmul.f32 %v1852_v28, %v1852_v28 }
 0x162   : > { %v932_v20 = vadd.f32 %v931_v19, %v1844_v16  ;;  %v1061_v23 = vadd.f32 %v1060_v18, %v998_v2  ;;  %v1003_v16 = vmul.f32 %v1872_v1, %v1872_v1 }
 0x164   : > { %v1062_v25 = vadd.f32 %v1061_v23, %v999_v33  ;;  %v933_v27 = vadd.f32 %v932_v20, %v1838_v4  ;;  %v1004_v4 = vmul.f32 %v1866_v52, %v1866_v52 }
 0x166   : > { %v934_v30 = vadd.f32 %v933_v27, %v1858_v41  ;;  %v1063_v31 = vadd.f32 %v1062_v25, %v1000_v22  ;;  %v1005_v41 = vmul.f32 %v1886_v29, %v1886_v29 }
 0x168   : > { %v1064_v32 = vadd.f32 %v1063_v31, %v1001_v58  ;;  %v935_v34 = vadd.f32 %v934_v30, %v1852_v28  ;;  %v1006_v28 = vmul.f32 %v1880_v15, %v1880_v15 }
 0x16a   : > { %v936_v40 = vadd.f32 %v935_v34, %v1872_v1  ;;  %v1065_v37 = vadd.f32 %v1064_v32, %v1002_v45 }
 0x16c   : > { %v1066_v39 = vadd.f32 %v1065_v37, %v1003_v16  ;;  %v937_v36 = vadd.f32 %v936_v40, %v1866_v52 }
 0x16e   : > { %v938_v42 = vadd.f32 %v937_v36, %v1886_v29  ;;  %v1067_v44 = vadd.f32 %v1066_v39, %v1004_v4 }
 0x170   : > { %v1068_v55 = vadd.f32 %v1067_v44, %v1005_v41  ;;  %v939_v1 = vadd.f32 %v938_v42, %v1880_v15  ;;  %v1010_v15 = vmul.f32 %v1908_v9, %v1908_v9 }
 0x172   : > { %v940_v48 = vadd.f32 %v939_v1, %v1900_v59  ;;  %v1069_v52 = vadd.f32 %v1068_v55, %v1006_v28 }
 0x174   : > { %v1070_v49 = vadd.f32 %v1069_v52, %v1007_v47  ;;  %v941_v29 = vadd.f32 %v940_v48, %v1894_v43  ;;  %v1012_v43 = vmul.f32 %v1922_v38, %v1922_v38 }
 0x176   : > { %v942_v8 = vadd.f32 %v941_v29, %v1914_v21  ;;  %v1071_v51 = vadd.f32 %v1070_v49, %v1008_v54 }
 0x178   : > { %v1072_v56 = vadd.f32 %v1071_v51, %v1009_v50  ;;  %v943_v59 = vadd.f32 %v942_v8, %v1908_v9 }
 0x17a   : > { %v944_v60 = vadd.f32 %v943_v59, %v1928_v53  ;;  %v1073_v61 = vadd.f32 %v1072_v56, %v1010_v15 }
 0x17c   : > { %v1074_v35 = vadd.f32 %v1073_v61, %v1011_v5  ;;  %v945_v21 = vadd.f32 %v944_v60, %v1922_v38 }
 0x17e   : > { %v946_v63 = vadd.f32 %v945_v21, %v1938_v10  ;;  %v1075_v9 = vadd.f32 %v1074_v35, %v1012_v43 }
 0x180   : > { %v947_v53 = vadd.f32 %v946_v63, %v1935_v0  ;;  %v1076_v3 = vadd.f32 %v1075_v9, %v1013_v62 }
 0x182   : > { %v1077_v6 = vadd.f32 %v1076_v3, %v1014_v26  ;;  %949 = vst [vmem:[%s273_s25] sm:$0xff] %v947_v53 }
 0x184   : > { %1079 = vst [vmem:[%s277_s29] sm:$0xff] %v1077_v6 }
 0x185 PF: > { %s16_s20 = sadd.s32 1, %s1533_s20   ;;  %s2063_s18 = smov %s1529_s19 }
 0x186   : > { %p13_p6 = scmp.ge.s32.totalorder %s16_s20, 4   ;;  %s2064_s19 = smov %s2066_s21 }
 0x188   :  { %15 = sbr.rel (!%p13_p6) target bundleno = 2 (0x2), region = 90 }

// kernel: conv_conv_block.5
= control target key start
LH: loop header
LB: loop body
LE: loop exit
PB: predicated region body
PF: predicated region fallthrough
CT: control target
= control target key end

     0   :  { %s4204_s25 = smov 0   ;;  %s4206_s26 = smov 0   ;;  %s5618_s0 = inlined_call_operand.vmem [shape: f32[64,16,128], index: 0, kind: input, shape index: {}, may-alias: {0,1,2,3,4,5,6,7,8,9}]   ;;  %s5619_s1 = inlined_call_operand.vmem [shape: f32[64,16,128], index: 1, kind: input, shape index: {}, may-alias: {0,1,2,3,4,5,6,7,8,9}]   ;;  %s5620_s2 = inlined_call_operand.vmem [shape: f32[64,16,128], index: 2, kind: input, shape index: {}, may-alias: {0,1,2,3,4,5,6,7,8,9}]   ;;  %s5621_s3 = inlined_call_operand.vmem [shape: f32[64,16,128], index: 3, kind: input, shape index: {}, may-alias: {0,1,2,3,4,5,6,7,8,9}]   ;;  %s5622_s4 = inlined_call_operand.vmem [shape: f32[64,16,128], index: 4, kind: input, shape index: {}, may-alias: {0,1,2,3,4,5,6,7,8,9}]   ;;  %s5623_s5 = inlined_call_operand.vmem [shape: f32[64,16,128], index: 5, kind: input, shape index: {}, may-alias: {0,1,2,3,4,5,6,7,8,9}]   ;;  %s5624_s6 = inlined_call_operand.vmem [shape: f32[64,16,128], index: 6, kind: input, shape index: {}, may-alias: {0,1,2,3,4,5,6,7,8,9}]   ;;  %s5625_s7 = inlined_call_operand.vmem [shape: f32[64,16,128], index: 7, kind: input, shape index: {}, may-alias: {0,1,2,3,4,5,6,7,8,9}]   ;;  %s5626_s8 = inlined_call_operand.vmem [shape: f32[64,16,128], index: 8, kind: input, shape index: {}, may-alias: {0,1,2,3,4,5,6,7,8,9}]   ;;  %s5627_s9 = inlined_call_operand.vmem [shape: f32[64,16,128], index: 9, kind: input, shape index: {}, may-alias: {0,1,2,3,4,5,6,7,8,9}]   ;;  %s5628_s10 = inlined_call_operand.vmem [shape: f32[3,384,128], index: 10, kind: input, shape index: {}]   ;;  %s5629_s11 = inlined_call_operand.vmem [shape: f32[1,128], index: 11, kind: input, shape index: {}]   ;;  %s5630_s12 = inlined_call_operand.vmem [shape: f32[1,128], index: 12, kind: input, shape index: {}]   ;;  %s5631_s13 = inlined_call_operand.vmem [shape: f32[2,16,16,128], index: 13, kind: output, shape index: {}]  }
   0x1   :  { %5636 = sst [smem:[#allocation8_spill]] %s5619_s1  ;;  %s4208_s27 = smov 0  }
   0x2   :  { %s4210_s28 = smov 0   ;;  %s4212_s29 = smov 0  }
   0x3 LB: > { %5637 = sst [smem:[#allocation2_spill]] %s4124_s27  ;;  %s32_s30 = sadd.s32 1, %s4124_s27  ;;  %s4132_s29 = sphi %s4212_s29, %s23_s29   ;;  %s4128_s28 = sphi %s4210_s28, %s5662_s28   ;;  %s4124_s27 = sphi %s4208_s27, %s5661_s27   ;;  %s4120_s26 = sphi %s4206_s26, %s5660_s26   ;;  %s4116_s25 = sphi %s4204_s25, %s5659_s25  }
   0x4   : > { %5638 = sst [smem:[#allocation3_spill]] %s4128_s28  ;;  %s35_s14 = sadd.s32 1, %s4128_s28 }
   0x5   : > { %5639 = sst [smem:[#allocation4_spill]] %s4132_s29  ;;  %p33_p0 = scmp.ge.s32.totalorder %s32_s30, 2 }
   0x6   : > { %p2911_p1 = scmp.ge.s32.totalorder %s4132_s29, 1  ;;  %p807_p2 = scmp.lt.s32.totalorder %s4132_s29, 5 }
   0x7   : > { %s5664_s30 = smov (%p33_p0, %s32_s30), 0  ;;  %s5666_s14 = smov (!%p33_p0, %s35_s14), %s4128_s28 }
   0x8   : > { %5640 = sst [smem:[#allocation5_spill]] %s5664_s30  ;;  %p808_p3 = pnand %p2911_p1, %p807_p2 }
   0x9   : > { %p37_p4 = scmp.ge.s32.totalorder %s5666_s14, 2 }
   0xa   : > { %811 = sbr.rel (%p808_p3) target bundleno = 429 (0x1ad), region = 72 }
   0xb   : > { %s5668_s14 = smov (%p37_p4, %s5666_s14), 0 }
   0xc   : > { %5641 = sst [smem:[#allocation6_spill]] %s5668_s14 }
  0x11   : > { %v3036_v0 = vld [vmem:[%s5628_s10 + $0x200] sm:$0xff]  ;;  %v3037_v1 = vld [vmem:[%s5628_s10 + $0x208] sm:$0xff]  ;;  %s4245_s21 = sshll.u32 %s4116_s25, 3  ;;  %v3038_v9 = vld [vmem:[%s5628_s10 + $0x210] sm:$0xff]  ;;  %s4287_s17 = sshll.u32 %s4120_s26, 4  ;;  %vm1444_vm0 = vcmask 1046528  }
  0x12   : > { %v3052_v2 = vld [vmem:[%s5628_s10 + $0x280] sm:$0xff]  ;;  %v3764_v3 = vpack.c.bf16 %v3037_v1, %v3036_v0  ;;  %v3053_v4 = vld [vmem:[%s5628_s10 + $0x288] sm:$0xff]  ;;  %p1003_p5 = scmp.gt.s32.totalorder %s4245_s21, 0  ;;  %p2923_p6 = scmp.lt.s32.totalorder %s4245_s21, 15  ;;  %v3039_v10 = vld [vmem:[%s5628_s10 + $0x218] sm:$0xff]  ;;  %vm1383_vm1 = vcmask 1040384  }
  0x13   : > { %v3020_v5 = vld [vmem:[%s5628_s10 + $0x180] sm:$0xff]  ;;  %v3021_v6 = vld [vmem:[%s5628_s10 + $0x188] sm:$0xff]  ;;  %v3796_v7 = vpack.c.bf16 %v3053_v4, %v3052_v2  ;;  %v3054_v11 = vld [vmem:[%s5628_s10 + $0x290] sm:$0xff]  ;;  %v3768_v12 = vpack.c.bf16 %v3039_v10, %v3038_v9  ;;  %p1229_p7 = scmp.ge.s32.totalorder %s4245_s21, 0  ;;  %p1230_p9 = scmp.lt.s32.totalorder %s4245_s21, 16 }
  0x14   : > { %v3766_v8 = vpack.c.bf16 %v3021_v6, %v3020_v5  ;;  %3765 = vmatprep.subr.bf16.mxu0 %v3764_v3  ;;  %v3055_v13 = vld [vmem:[%s5628_s10 + $0x298] sm:$0xff]  ;;  %v3022_v14 = vld [vmem:[%s5628_s10 + $0x190] sm:$0xff]  ;;  %s1004_s19 = scalar_select %p1003_p5, %s4245_s21, 0  ;;  %v3040_v18 = vld [vmem:[%s5628_s10 + $0x220] sm:$0xff] }
  0x15   : > { %v3023_v15 = vld [vmem:[%s5628_s10 + $0x198] sm:$0xff]  ;;  %3797 = vmatprep.subr.bf16.mxu1 %v3796_v7  ;;  %v3800_v16 = vpack.c.bf16 %v3055_v13, %v3054_v11  ;;  %v3041_v19 = vld [vmem:[%s5628_s10 + $0x228] sm:$0xff]  ;;  %v3056_v20 = vld [vmem:[%s5628_s10 + $0x2a0] sm:$0xff]  ;;  %p4335_p10 = pnand %p1230_p9, %p1229_p7  ;;  %s5643_s1 = sld [smem:[#allocation8_spill]] }
  0x16   : > { %3767 = vmatpush3.bf16.msra.mxu0 %v3766_v8  ;;  %v3770_v17 = vpack.c.bf16 %v3023_v15, %v3022_v14  ;;  %3799 = vmatpush3.bf16.msra.mxu1 %v3796_v7  ;;  %v3772_v21 = vpack.c.bf16 %v3041_v19, %v3040_v18  ;;  %v3057_v22 = vld [vmem:[%s5628_s10 + $0x2a8] sm:$0xff]  ;;  %v3024_v23 = vld [vmem:[%s5628_s10 + $0x1a0] sm:$0xff]  ;;  %s5670_s19 = smov (!%p2923_p6, %s1004_s19), 15  ;;  %v3042_v26 = vld [vmem:[%s5628_s10 + $0x230] sm:$0xff]  ;;  %s4349_s30 = sadd.s32 1, %s4245_s21 }
  0x17   : > { %3769 = vmatprep.subr.bf16.mxu0 %v3768_v12  ;;  %v3025_v24 = vld [vmem:[%s5628_s10 + $0x1a8] sm:$0xff]  ;;  %3801 = vmatprep.subr.bf16.mxu1 %v3800_v16  ;;  %v3804_v25 = vpack.c.bf16 %v3057_v22, %v3056_v20  ;;  %v3043_v27 = vld [vmem:[%s5628_s10 + $0x238] sm:$0xff]  ;;  %v3058_v28 = vld [vmem:[%s5628_s10 + $0x2b0] sm:$0xff]  ;;  %s1007_s24 = sadd.s32 %s5670_s19, %s4287_s17  ;;  %p1023_p11 = scmp.gt.s32.totalorder %s4349_s30, 0 }
  0x18   : > { %v3059_v29 = vld [vmem:[%s5628_s10 + $0x2b8] sm:$0xff]  ;;  %v3774_v30 = vpack.c.bf16 %v3025_v24, %v3024_v23  ;;  %p1008_p8 = scmp.lt.s32.totalorder %s1007_s24, 63  ;;  %v3776_v31 = vpack.c.bf16 %v3043_v27, %v3042_v26  ;;  %v3026_v32 = vld [vmem:[%s5628_s10 + $0x1b0] sm:$0xff]  ;;  %v3044_v35 = vld [vmem:[%s5628_s10 + $0x240] sm:$0xff]  ;;  %p2932_p12 = scmp.lt.s32.totalorder %s4349_s30, 15 }
  0x19   : > { %v3027_v33 = vld [vmem:[%s5628_s10 + $0x1b8] sm:$0xff]  ;;  %v3808_v34 = vpack.c.bf16 %v3059_v29, %v3058_v28  ;;  %v3045_v36 = vld [vmem:[%s5628_s10 + $0x248] sm:$0xff]  ;;  %v3060_v37 = vld [vmem:[%s5628_s10 + $0x2c0] sm:$0xff]  ;;  %s3011_s22 = scalar_select %p4335_p10, 0.0, 1.0 }
  0x1a   : > { %3771 = vmatpush3.bf16.msra.mxu0 %v3770_v17  ;;  %3803 = vmatpush3.bf16.msra.mxu1 %v3800_v16  ;;  %s5672_s24 = smov (!%p1008_p8, %s1007_s24), 63  ;;  %v3061_v38 = vld [vmem:[%s5628_s10 + $0x2c8] sm:$0xff]  ;;  %v3778_v39 = vpack.c.bf16 %v3027_v33, %v3026_v32  ;;  %v3780_v40 = vpack.c.bf16 %v3045_v36, %v3044_v35  ;;  %v3028_v41 = vld [vmem:[%s5628_s10 + $0x1c0] sm:$0xff]  ;;  %v3046_v44 = vld [vmem:[%s5628_s10 + $0x250] sm:$0xff]  ;;  %p1244_p13 = scmp.ge.s32.totalorder %s4349_s30, 0 }
  0x1b   : > { %3773 = vmatprep.subr.bf16.mxu0 %v3772_v21  ;;  %3805 = vmatprep.subr.bf16.mxu1 %v3804_v25  ;;  %s3235_s19 = sshll.u32 %s5672_s24, 4  ;;  %v3029_v42 = vld [vmem:[%s5628_s10 + $0x1c8] sm:$0xff]  ;;  %v3812_v43 = vpack.c.bf16 %v3061_v38, %v3060_v37  ;;  %v3047_v45 = vld [vmem:[%s5628_s10 + $0x258] sm:$0xff]  ;;  %v3062_v46 = vld [vmem:[%s5628_s10 + $0x2d0] sm:$0xff]  ;;  %v1240_v61 = vstv %s3011_s22  ;;  %p1245_p0 = scmp.lt.s32.totalorder %s4349_s30, 16 }
  0x1c   : > { %s1012_s16 = scalar_lea.vmem %s5643_s1, %s3235_s19  ;;  %v3063_v47 = vld [vmem:[%s5628_s10 + $0x2d8] sm:$0xff]  ;;  %v3782_v48 = vpack.c.bf16 %v3029_v42, %v3028_v41  ;;  %v4370_v49 = vld [vmem:[%s5629_s11] ss:$0 sm:$0xff]  ;;  %v3784_v52 = vpack.c.bf16 %v3047_v45, %v3046_v44  ;;  %v3030_v53 = vld [vmem:[%s5628_s10 + $0x1d0] sm:$0xff]  ;;  %s4601_s1 = sadd.s32 4, %s4245_s21 }
  0x1d   : > { %v4375_v50 = vld [vmem:[%s5630_s12] ss:$0 sm:$0xff]  ;;  %v3031_v54 = vld [vmem:[%s5628_s10 + $0x1d8] sm:$0xff]  ;;  %v1235_v55 = vld [vmem:[%s1012_s16 + $0x8] sm:$0xff]  ;;  %s1024_s14 = scalar_select %p1023_p11, %s4349_s30, 0  ;;  %v3816_v57 = vpack.c.bf16 %v3063_v47, %v3062_v46 }
  0x1e   : > { %3775 = vmatpush3.bf16.msra.mxu0 %v3774_v30  ;;  %3807 = vmatpush3.bf16.msra.mxu1 %v3804_v25  ;;  %v1234_v51 = vld [vmem:[%s1012_s16] sm:$0xff]  ;;  %v3049_v59 = vld [vmem:[%s5628_s10 + $0x268] sm:$0xff]  ;;  %v1237_v60 = vmul.f32 %v4370_v49, %v1235_v55  ;;  %s4397_s16 = sadd.s32 2, %s4245_s21  ;;  %v3786_v1 = vpack.c.bf16 %v3031_v54, %v3030_v53  ;;  %p4411_p1 = pnand %p1245_p0, %p1244_p13  ;;  %v3050_v8 = vld [vmem:[%s5628_s10 + $0x270] sm:$0xff] }
  0x1f   : > { %3777 = vmatprep.subr.bf16.mxu0 %v3776_v31  ;;  %3809 = vmatprep.subr.bf16.mxu1 %v3808_v34  ;;  %v1236_v56 = vmul.f32 %v4370_v49, %v1234_v51  ;;  %v3048_v58 = vld [vmem:[%s5628_s10 + $0x260] sm:$0xff]  ;;  %v3065_v63 = vld [vmem:[%s5628_s10 + $0x2e8] sm:$0xff]  ;;  %s5674_s14 = smov (!%p2932_p12, %s1024_s14), 15  ;;  %p1044_p2 = scmp.gt.s32.totalorder %s4397_s16, 0  ;;  %v3051_v9 = vld [vmem:[%s5628_s10 + $0x278] sm:$0xff] }
  0x20   : > { %v3064_v62 = vld [vmem:[%s5628_s10 + $0x2e0] sm:$0xff]  ;;  %v1239_v2 = vadd.f32 %v4375_v50, %v1237_v60  ;;  %v3788_v3 = vpack.c.bf16 %v3049_v59, %v3048_v58  ;;  %v3033_v5 = vld [vmem:[%s5628_s10 + $0x1e8] sm:$0xff]  ;;  %s1027_s30 = sadd.s32 %s5674_s14, %s4287_s17  ;;  %p2941_p3 = scmp.lt.s32.totalorder %s4397_s16, 15  ;;  %v3066_v11 = vld [vmem:[%s5628_s10 + $0x2f0] sm:$0xff]  ;;  %v3792_v16 = vpack.c.bf16 %v3051_v9, %v3050_v8 }
  0x21   : > { %v1238_v0 = vadd.f32 %v4375_v50, %v1236_v56  ;;  %v3032_v4 = vld [vmem:[%s5628_s10 + $0x1e0] sm:$0xff]  ;;  %v3820_v7 = vpack.c.bf16 %v3065_v63, %v3064_v62  ;;  %p1028_p4 = scmp.lt.s32.totalorder %s1027_s30, 63  ;;  %p1259_p5 = scmp.ge.s32.totalorder %s4397_s16, 0  ;;  %v3067_v12 = vld [vmem:[%s5628_s10 + $0x2f8] sm:$0xff]  ;;  %v3034_v17 = vld [vmem:[%s5628_s10 + $0x1f0] sm:$0xff] }
  0x22   : > { %3779 = vmatpush3.bf16.msra.mxu0 %v3778_v39  ;;  %3811 = vmatpush3.bf16.msra.mxu1 %v3808_v34  ;;  %v4432_v10 = vmul.f32 %v1240_v61, %v1239_v2  ;;  %v3790_v14 = vpack.c.bf16 %v3033_v5, %v3032_v4  ;;  %v3035_v18 = vld [vmem:[%s5628_s10 + $0x1f8] sm:$0xff]  ;;  %s1045_s28 = scalar_select %p1044_p2, %s4397_s16, 0  ;;  %v3824_v19 = vpack.c.bf16 %v3067_v12, %v3066_v11  ;;  %v3132_v21 = vld [vmem:[%s5628_s10 + $0x380] sm:$0xff]  ;;  %v3133_v22 = vld [vmem:[%s5628_s10 + $0x388] sm:$0xff] }
  0x23   : > { %3781 = vmatprep.subr.bf16.mxu0 %v3780_v40  ;;  %3813 = vmatprep.subr.bf16.mxu1 %v3812_v43  ;;  %v4422_v6 = vmul.f32 %v1240_v61, %v1238_v0  ;;  %s5676_s30 = smov (!%p1028_p4, %s1027_s30), 63  ;;  %p1260_p7 = scmp.lt.s32.totalorder %s4397_s16, 16  ;;  %v1521_v23 = vld [vmem:[%s5628_s10 + $0x80] sm:$0xff]  ;;  %v1522_v24 = vld [vmem:[%s5628_s10 + $0x88] sm:$0xff]  ;;  %v3794_v25 = vpack.c.bf16 %v3035_v18, %v3034_v17  ;;  %v3892_v28 = vpack.c.bf16 %v3133_v22, %v3132_v21  ;;  %v1523_v40 = vld [vmem:[%s5628_s10 + $0x90] sm:$0xff] }
  0x24   : > { %v4446_v15 = vrot.slane %v4432_v10, 1  ;;  %s3238_s23 = sshll.u32 %s5676_s30, 4  ;;  %s4479_s14 = sadd.s32 3, %s4245_s21  ;;  %v3116_v29 = vld [vmem:[%s5628_s10 + $0x300] sm:$0xff]  ;;  %v3117_v30 = vld [vmem:[%s5628_s10 + $0x308] sm:$0xff]  ;;  %v3828_v33 = vpack.c.bf16 %v1522_v24, %v1521_v23  ;;  %v1524_v41 = vld [vmem:[%s5628_s10 + $0x98] sm:$0xff] }
  0x25   : > { %1666 = vmatprep.mubr.f32.mxu0 %v4422_v6  ;;  %v1448_v13 = vrot.slane %v4422_v6, 1  ;;  %s1032_s24 = scalar_lea.vmem %s5620_s2, %s3238_s23  ;;  %s5678_s28 = smov (!%p2941_p3, %s1045_s28), 15  ;;  %v1505_v34 = vld [vmem:[%s5628_s10] sm:$0xff]  ;;  %v1506_v35 = vld [vmem:[%s5628_s10 + $0x8] sm:$0xff]  ;;  %v4512_v37 = vrot.slane %v4422_v6, 7  ;;  %vm4524_vm2 = vmneg %vm1383_vm1  ;;  %v1388_v44 = vrot.slane %v4432_v10, 7  ;;  %v3832_v55 = vpack.c.bf16 %v1524_v41, %v1523_v40 }
  0x26   : > { %3783 = vmatpush3.bf16.msra.mxu0 %v3782_v48  ;;  %3815 = vmatpush3.bf16.msra.mxu1 %v3812_v43  ;;  %v1249_v26 = vld [vmem:[%s1032_s24] sm:$0xff]  ;;  %v1250_v27 = vld [vmem:[%s1032_s24 + $0x8] sm:$0xff]  ;;  %p4495_p8 = pnand %p1260_p7, %p1259_p5  ;;  %p1065_p9 = scmp.gt.s32.totalorder %s4479_s14, 0  ;;  %v3894_v43 = vpack.c.bf16 %v3117_v30, %v3116_v29  ;;  %v3134_v45 = vld [vmem:[%s5628_s10 + $0x390] sm:$0xff]  ;;  %v3830_v47 = vpack.c.bf16 %v1506_v35, %v1505_v34 }
  0x27   : > { %3785 = vmatprep.subr.bf16.mxu0 %v3784_v52  ;;  %3817 = vmatprep.subr.bf16.mxu1 %v3816_v57  ;;  %v4459_v20 = vsel %vm1444_vm0, %v1448_v13, %v4446_v15  ;;  %v1251_v31 = vmul.f32 %v4370_v49, %v1249_v26  ;;  %v1252_v32 = vmul.f32 %v4370_v49, %v1250_v27  ;;  %s5646_s19 = scalar_select %p4411_p1, 0.0, 1.0  ;;  %v3135_v46 = vld [vmem:[%s5628_s10 + $0x398] sm:$0xff]  ;;  %v1507_v52 = vld [vmem:[%s5628_s10 + $0x10] sm:$0xff]  ;;  %v4551_v54 = vld [vmem:[%s5628_s10 + $0xa0] sm:$0xff] }
  0x28   : > { %3628 = vmatprep.mubr.f32.mxu1 %v4459_v20  ;;  %s1048_s16 = sadd.s32 %s5678_s28, %s4287_s17  ;;  %p2950_p10 = scmp.lt.s32.totalorder %s4479_s14, 15  ;;  %v1508_v53 = vld [vmem:[%s5628_s10 + $0x18] sm:$0xff]  ;;  %v4556_v56 = vld [vmem:[%s5628_s10 + $0xa8] sm:$0xff]  ;;  %v3896_v61 = vpack.c.bf16 %v3135_v46, %v3134_v45  ;;  %v3136_v62 = vld [vmem:[%s5628_s10 + $0x3a0] sm:$0xff]  ;;  %v4585_v0 = vsel %vm1383_vm1, %v4512_v37, %v1388_v44 }
  0x29   : > { %v1255_v36 = vstv %s5646_s19  ;;  %v1253_v38 = vadd.f32 %v4375_v50, %v1251_v31  ;;  %v1254_v39 = vadd.f32 %v4375_v50, %v1252_v32  ;;  %p1049_p11 = scmp.lt.s32.totalorder %s1048_s16, 63  ;;  %p1274_p12 = scmp.ge.s32.totalorder %s4479_s14, 0  ;;  %v3119_v58 = vld [vmem:[%s5628_s10 + $0x318] sm:$0xff]  ;;  %v3137_v63 = vld [vmem:[%s5628_s10 + $0x3a8] sm:$0xff]  ;;  %v4593_v2 = vld [vmem:[%s5628_s10 + $0x20] sm:$0xff]  ;;  %v3836_v8 = vpack.c.bf16 %v4556_v56, %v4551_v54 }
  0x2a   : > { %3787 = vmatpush3.bf16.msra.mxu0 %v3786_v1  ;;  %3819 = vmatpush3.bf16.msra.mxu1 %v3816_v57  ;;  %s3013_s22 = scalar_select %p4495_p8, 0.0, 1.0  ;;  %v3118_v57 = vld [vmem:[%s5628_s10 + $0x310] sm:$0xff]  ;;  %v3834_v1 = vpack.c.bf16 %v1508_v53, %v1507_v52  ;;  %v3120_v17 = vld [vmem:[%s5628_s10 + $0x320] sm:$0xff]  ;;  %v3121_v18 = vld [vmem:[%s5628_s10 + $0x328] sm:$0xff] }
  0x2b   : > { %3789 = vmatprep.subr.bf16.mxu0 %v3788_v3  ;;  %3821 = vmatprep.subr.bf16.mxu1 %v3820_v7  ;;  %v4537_v48 = vmul.f32 %v1255_v36, %v1253_v38  ;;  %v4539_v51 = vmul.f32 %v1255_v36, %v1254_v39  ;;  %s5680_s16 = smov (!%p1049_p11, %s1048_s16), 63  ;;  %p1275_p13 = scmp.lt.s32.totalorder %s4479_s14, 16  ;;  %v4598_v3 = vld [vmem:[%s5628_s10 + $0x28] sm:$0xff]  ;;  %v3898_v9 = vpack.c.bf16 %v3119_v58, %v3118_v57  ;;  %v4615_v11 = vld [vmem:[%s5628_s10 + $0xb0] sm:$0xff]  ;;  %v3139_v23 = vld [vmem:[%s5628_s10 + $0x3b8] sm:$0xff] }
  0x2c   : > { %s1066_s15 = scalar_select %p1065_p9, %s4479_s14, 0  ;;  %v3138_v22 = vld [vmem:[%s5628_s10 + $0x3b0] sm:$0xff]  ;;  %v3838_v27 = vpack.c.bf16 %v4598_v3, %v4593_v2  ;;  %v1512_v30 = vld [vmem:[%s5628_s10 + $0x38] sm:$0xff]  ;;  %v3902_v31 = vpack.c.bf16 %v3121_v18, %v3120_v17  ;;  %v1529_v34 = vld [vmem:[%s5628_s10 + $0xc0] sm:$0xff] }
  0x2d   : > { %v1451_v59 = vrot.slane %v4537_v48, 1  ;;  %v4572_v60 = vrot.slane %v4539_v51, 1  ;;  %s3241_s19 = sshll.u32 %s5680_s16, 4  ;;  %p4624_p0 = pnand %p1275_p13, %p1274_p12  ;;  %v4643_v21 = vrot.slane %v4537_v48, 7  ;;  %v1391_v26 = vrot.slane %v4539_v51, 7  ;;  %v1511_v29 = vld [vmem:[%s5628_s10 + $0x30] sm:$0xff] }
  0x2e   : > { %3791 = vmatpush3.bf16.msra.mxu0 %v3790_v14  ;;  %3823 = vmatpush3.bf16.msra.mxu1 %v3820_v7  ;;  %s1053_s30 = scalar_lea.vmem %s5621_s3, %s3241_s19  ;;  %s5682_s15 = smov (!%p2950_p10, %s1066_s15), 15  ;;  %v1528_v14 = vld [vmem:[%s5628_s10 + $0xb8] sm:$0xff]  ;;  %v3904_v35 = vpack.c.bf16 %v3139_v23, %v3138_v22  ;;  %v3122_v36 = vld [vmem:[%s5628_s10 + $0x330] sm:$0xff]  ;;  %v1530_v39 = vld [vmem:[%s5628_s10 + $0xc8] sm:$0xff] }
  0x2f   : > { %3793 = vmatprep.subr.bf16.mxu0 %v3792_v16  ;;  %3825 = vmatprep.subr.bf16.mxu1 %v3824_v19  ;;  %v4606_v4 = vsel %vm1444_vm0, %v1451_v59, %v4572_v60  ;;  %v1264_v5 = vld [vmem:[%s1053_s30] sm:$0xff]  ;;  %v1265_v7 = vld [vmem:[%s1053_s30 + $0x8] sm:$0xff]  ;;  %p1086_p1 = scmp.gt.s32.totalorder %s4601_s1, 0  ;;  %v3900_v16 = vpack.c.bf16 %v3137_v63, %v3136_v62  ;;  %s1069_s14 = sadd.s32 %s5682_s15, %s4287_s17  ;;  %v3123_v38 = vld [vmem:[%s5628_s10 + $0x338] sm:$0xff]  ;;  %v4707_v45 = vsel %vm1383_vm1, %v4643_v21, %v1391_v26 }
  0x30   : > { %v1266_v12 = vmul.f32 %v4370_v49, %v1264_v5  ;;  %v1267_v13 = vmul.f32 %v4370_v49, %v1265_v7  ;;  %p2959_p2 = scmp.lt.s32.totalorder %s4601_s1, 15  ;;  %p1070_p3 = scmp.lt.s32.totalorder %s1069_s14, 63  ;;  %v3140_v40 = vld [vmem:[%s5628_s10 + $0x3c0] sm:$0xff]  ;;  %v3141_v41 = vld [vmem:[%s5628_s10 + $0x3c8] sm:$0xff]  ;;  %v4727_v53 = vld [vmem:[%s5628_s10 + $0xd0] sm:$0xff]  ;;  %v3906_v54 = vpack.c.bf16 %v3123_v38, %v3122_v36  ;;  %v3844_v59 = vpack.c.bf16 %v1530_v39, %v1529_v34 }
  0x31   : > { %p1289_p4 = scmp.ge.s32.totalorder %s4601_s1, 0  ;;  %p1290_p5 = scmp.lt.s32.totalorder %s4601_s1, 16  ;;  %v4713_v46 = vld [vmem:[%s5628_s10 + $0x40] sm:$0xff]  ;;  %v1514_v52 = vld [vmem:[%s5628_s10 + $0x48] sm:$0xff]  ;;  %v1532_v3 = vld [vmem:[%s5628_s10 + $0xd8] sm:$0xff] }
  0x32   : > { %3795 = vmatpush3.bf16.msra.mxu0 %v3794_v25  ;;  %3827 = vmatpush3.bf16.msra.mxu1 %v3824_v19  ;;  %v1270_v19 = vstv %s3013_s22  ;;  %v1268_v24 = vadd.f32 %v4375_v50, %v1266_v12  ;;  %v1269_v25 = vadd.f32 %v4375_v50, %v1267_v13  ;;  %s3014_s18 = scalar_select %p4624_p0, 0.0, 1.0  ;;  %v3125_v62 = vld [vmem:[%s5628_s10 + $0x348] sm:$0xff]  ;;  %v3142_v5 = vld [vmem:[%s5628_s10 + $0x3d0] sm:$0xff]  ;;  %v3143_v7 = vld [vmem:[%s5628_s10 + $0x3d8] sm:$0xff] }
  0x33   : > { %3893 = vmatprep.subr.bf16.mxu0 %v3892_v28  ;;  %3829 = vmatprep.subr.bf16.mxu1 %v3828_v33  ;;  %v3840_v28 = vpack.c.bf16 %v1528_v14, %v4615_v11  ;;  %s5684_s14 = smov (!%p1070_p3, %s1069_s14), 63  ;;  %p4749_p7 = pnand %p1290_p5, %p1289_p4  ;;  %v1515_v17 = vld [vmem:[%s5628_s10 + $0x50] sm:$0xff]  ;;  %v3912_v18 = vpack.c.bf16 %v3143_v7, %v3142_v5  ;;  %v3127_v22 = vld [vmem:[%s5628_s10 + $0x358] sm:$0xff]  ;;  %v3144_v26 = vld [vmem:[%s5628_s10 + $0x3e0] sm:$0xff] }
  0x34   : > { %v4671_v32 = vmul.f32 %v1270_v19, %v1268_v24  ;;  %v4673_v33 = vmul.f32 %v1270_v19, %v1269_v25  ;;  %s1087_s16 = scalar_select %p1086_p1, %s4601_s1, 0  ;;  %v3126_v19 = vld [vmem:[%s5628_s10 + $0x350] sm:$0xff]  ;;  %v1516_v25 = vld [vmem:[%s5628_s10 + $0x58] sm:$0xff]  ;;  %v4835_v36 = vld [vmem:[%s5628_s10 + $0x68] sm:$0xff] }
  0x35   : > { %3069 = vmatmul.mubr.msk.f32.vlgmr.msra.gmra.mrb[0].mxu0 %vm4524_vm2, %v4512_v37  ;;  %3629 = vmatmul.mubr.msk.f32.vlgmr.msra.gmra.mrb[0].mxu1 %vm1444_vm0, %v4446_v15  ;;  %s3244_s23 = sshll.u32 %s5684_s14, 4  ;;  %s4722_s14 = sadd.s32 5, %s4245_s21  ;;  %v3914_v38 = vpack.c.bf16 %v3127_v22, %v3126_v19  ;;  %v3850_v39 = vpack.c.bf16 %v1516_v25, %v1515_v17  ;;  %v1519_v22 = vld [vmem:[%s5628_s10 + $0x70] sm:$0xff]  ;;  %v1520_v25 = vld [vmem:[%s5628_s10 + $0x78] sm:$0xff] }
  0x36   : > { %3895 = vmatpush3.bf16.msra.mxu0 %v3894_v43  ;;  %3831 = vmatpush3.bf16.msra.mxu1 %v3830_v47  ;;  %v1454_v43 = vrot.slane %v4671_v32, 1  ;;  %v4702_v44 = vrot.slane %v4673_v33, 1  ;;  %s1074_s15 = scalar_lea.vmem %s5622_s4, %s3244_s23  ;;  %v3842_v47 = vpack.c.bf16 %v1512_v30, %v1511_v29  ;;  %s5686_s16 = smov (!%p2959_p2, %s1087_s16), 15  ;;  %v4754_v2 = vrot.slane %v4671_v32, 7  ;;  %v1533_v29 = vld [vmem:[%s5628_s10 + $0xe0] sm:$0xff]  ;;  %v1534_v30 = vld [vmem:[%s5628_s10 + $0xe8] sm:$0xff] }
  0x37   : > { %1671 = vmatprep.mubr.f32.mxu0 %v4432_v10  ;;  %3631 = vmatprep.mubr.f32.mxu1 %v4606_v4  ;;  %v1279_v57 = vld [vmem:[%s1074_s15] sm:$0xff]  ;;  %v1280_v58 = vld [vmem:[%s1074_s15 + $0x8] sm:$0xff]  ;;  %p1107_p8 = scmp.gt.s32.totalorder %s4722_s14, 0  ;;  %s1090_s1 = sadd.s32 %s5686_s16, %s4287_s17  ;;  %v1394_v11 = vrot.slane %v4673_v33, 7 }
  0x38   : > { %3833 = vmatprep.subr.bf16.mxu1 %v3832_v55  ;;  %3897 = vmatprep.subr.bf16.mxu0 %v3896_v61  ;;  %v3124_v55 = vld [vmem:[%s5628_s10 + $0x340] sm:$0xff]  ;;  %v4734_v56 = vsel %vm1444_vm0, %v1454_v43, %v4702_v44  ;;  %v3908_v61 = vpack.c.bf16 %v3141_v41, %v3140_v40  ;;  %v1281_v63 = vmul.f32 %v4370_v49, %v1279_v57  ;;  %p2968_p9 = scmp.lt.s32.totalorder %s4722_s14, 15  ;;  %p1091_p10 = scmp.lt.s32.totalorder %s1090_s1, 63  ;;  %v3129_v43 = vld [vmem:[%s5628_s10 + $0x368] sm:$0xff]  ;;  %v3147_v57 = vld [vmem:[%s5628_s10 + $0x3f8] sm:$0xff] }
  0x39   : > { %1672 = vmatmul.mubr.f32.gmra.mrb[2].mxu0 %v4585_v0  ;;  %3632 = vmatmul.mubr.msk.f32.gmra.mrb[2].mxu1 %vm1444_vm0, %v4572_v60  ;;  %p1304_p11 = scmp.ge.s32.totalorder %s4722_s14, 0  ;;  %v3910_v14 = vpack.c.bf16 %v3125_v62, %v3124_v55  ;;  %p1305_p12 = scmp.lt.s32.totalorder %s4722_s14, 16  ;;  %v3128_v41 = vld [vmem:[%s5628_s10 + $0x360] sm:$0xff]  ;;  %v3852_v55 = vpack.c.bf16 %v1534_v30, %v1533_v29  ;;  %v1535_v62 = vld [vmem:[%s5628_s10 + $0xf0] sm:$0xff] }
  0x3a   : > { %1676 = vmatprep.mubr.f32.mxu0 %v4537_v48  ;;  %3835 = vmatpush3.bf16.msra.mxu1 %v3834_v1  ;;  %v1282_v1 = vmul.f32 %v4370_v49, %v1280_v58  ;;  %v1283_v12 = vadd.f32 %v4375_v50, %v1281_v63  ;;  %s3015_s29 = scalar_select %p4749_p7, 0.0, 1.0  ;;  %v1536_v63 = vld [vmem:[%s5628_s10 + $0xf8] sm:$0xff]  ;;  %v3918_v5 = vpack.c.bf16 %v3129_v43, %v3128_v41 }
  0x3b   : > { %3899 = vmatpush3.bf16.msra.mxu0 %v3898_v9  ;;  %3837 = vmatprep.subr.bf16.mxu1 %v3836_v8  ;;  %v1285_v8 = vstv %s3014_s18  ;;  %v3846_v9 = vpack.c.bf16 %v1514_v52, %v4713_v46  ;;  %s5688_s1 = smov (!%p1091_p10, %s1090_s1), 63  ;;  %v3146_v46 = vld [vmem:[%s5628_s10 + $0x3f0] sm:$0xff]  ;;  %p4872_p13 = pnand %p1305_p12, %p1304_p11 }
  0x3c   : > { %3901 = vmatprep.subr.bf16.mxu0 %v3900_v16  ;;  %3634 = vmatprep.mubr.f32.mxu1 %v4734_v56  ;;  %v1284_v13 = vadd.f32 %v4375_v50, %v1282_v1  ;;  %v3848_v16 = vpack.c.bf16 %v1532_v3, %v4727_v53  ;;  %v4791_v23 = vmul.f32 %v1285_v8, %v1283_v12  ;;  %s1108_s16 = scalar_select %p1107_p8, %s4722_s14, 0  ;;  %v1300_v1 = vstv %s3015_s29  ;;  %v3131_v12 = vld [vmem:[%s5628_s10 + $0x378] sm:$0xff] }
  0x3d   : > { %3071 = vmatmul.mubr.msk.f32.gmra.mrb[4].mxu0 %vm4524_vm2, %v4643_v21  ;;  %3635 = vmatmul.mubr.msk.f32.gmra.mrb[4].mxu1 %vm1444_vm0, %v4702_v44  ;;  %s3247_s28 = sshll.u32 %s5688_s1, 4  ;;  %s4841_s1 = sadd.s32 6, %s4245_s21 }
  0x3e   : > { %1681 = vmatprep.mubr.f32.mxu0 %v4539_v51  ;;  %3839 = vmatpush3.bf16.msra.mxu1 %v3838_v27  ;;  %v4793_v24 = vmul.f32 %v1285_v8, %v1284_v13  ;;  %v3145_v27 = vld [vmem:[%s5628_s10 + $0x3e8] sm:$0xff]  ;;  %s1095_s23 = scalar_lea.vmem %s5623_s5, %s3247_s28  ;;  %s5690_s16 = smov (!%p2968_p9, %s1108_s16), 15  ;;  %v3856_v13 = vpack.c.bf16 %v1536_v63, %v1535_v62 }
  0x3f   : > { %3903 = vmatpush3.bf16.msra.mxu0 %v3902_v31  ;;  %3841 = vmatprep.subr.bf16.mxu1 %v3840_v28  ;;  %v4814_v28 = vsel %vm1383_vm1, %v4754_v2, %v1394_v11  ;;  %v1457_v31 = vrot.slane %v4791_v23, 1  ;;  %v3916_v40 = vpack.c.bf16 %v3145_v27, %v3144_v26  ;;  %v1294_v52 = vld [vmem:[%s1095_s23] sm:$0xff]  ;;  %v1295_v53 = vld [vmem:[%s1095_s23 + $0x8] sm:$0xff]  ;;  %p1128_p0 = scmp.gt.s32.totalorder %s4841_s1, 0  ;;  %s1111_s14 = sadd.s32 %s5690_s16, %s4287_s17  ;;  %v3130_v11 = vld [vmem:[%s5628_s10 + $0x370] sm:$0xff] }
  0x40   : > { %3905 = vmatprep.subr.bf16.mxu0 %v3904_v35  ;;  %v4824_v34 = vrot.slane %v4793_v24, 1  ;;  %v4830_v35 = vld [vmem:[%s5628_s10 + $0x60] sm:$0xff]  ;;  %v1296_v58 = vmul.f32 %v4370_v49, %v1294_v52  ;;  %p2977_p1 = scmp.lt.s32.totalorder %s4841_s1, 15  ;;  %p1112_p2 = scmp.lt.s32.totalorder %s1111_s14, 63  ;;  %v1538_v27 = vld [vmem:[%s5628_s10 + $0x108] sm:$0xff]  ;;  %v3922_v29 = vpack.c.bf16 %v3131_v12, %v3130_v11 }
  0x41   : > { %1682 = vmatmul.mubr.f32.gmra.mrb[6].mxu0 %v4707_v45  ;;  %v3854_v3 = vpack.c.bf16 %v4835_v36, %v4830_v35  ;;  %p1319_p3 = scmp.ge.s32.totalorder %s4841_s1, 0  ;;  %v1537_v26 = vld [vmem:[%s5628_s10 + $0x100] sm:$0xff]  ;;  %p1320_p4 = scmp.lt.s32.totalorder %s4841_s1, 16  ;;  %v3858_v36 = vpack.c.bf16 %v1520_v25, %v1519_v22 }
  0x42   : > { %1686 = vmatprep.mubr.f32.mxu0 %v4671_v32  ;;  %3843 = vmatpush3.bf16.msra.mxu1 %v3842_v47  ;;  %v4854_v47 = vsel %vm1444_vm0, %v1457_v31, %v4824_v34  ;;  %v1298_v7 = vadd.f32 %v4375_v50, %v1296_v58  ;;  %s3016_s20 = scalar_select %p4872_p13, 0.0, 1.0  ;;  %v4963_v43 = vpack.c.bf16 %v1538_v27, %v1537_v26 }
  0x43   : > { %3907 = vmatpush3.bf16.msra.mxu0 %v3906_v54  ;;  %3845 = vmatprep.subr.bf16.mxu1 %v3844_v59  ;;  %v4860_v54 = vrot.slane %v4791_v23, 7  ;;  %v1297_v59 = vmul.f32 %v4370_v49, %v1295_v53  ;;  %s5692_s14 = smov (!%p1112_p2, %s1111_s14), 63  ;;  %s4950_s30 = sadd.s32 7, %s4245_s21 }
  0x44   : > { %3909 = vmatprep.subr.bf16.mxu0 %v3908_v61  ;;  %3637 = vmatprep.mubr.f32.mxu1 %v4854_v47  ;;  %v1397_v61 = vrot.slane %v4793_v24, 7  ;;  %v4914_v17 = vmul.f32 %v1300_v1, %v1298_v7  ;;  %s1129_s25 = scalar_select %p1128_p0, %s4841_s1, 0 }
  0x45   : > { %3073 = vmatmul.mubr.msk.f32.gmra.mrb[8].mxu0 %vm4524_vm2, %v4754_v2  ;;  %3638 = vmatmul.mubr.msk.f32.gmra.mrb[6].mxu1 %vm1444_vm0, %v4824_v34  ;;  %v1299_v8 = vadd.f32 %v4375_v50, %v1297_v59  ;;  %s3250_s18 = sshll.u32 %s5692_s14, 4  ;;  %p4973_p5 = pnand %p1320_p4, %p1319_p3 }
  0x46   : > { %1691 = vmatprep.mubr.f32.mxu0 %v4673_v33  ;;  %3847 = vmatpush3.bf16.msra.mxu1 %v3846_v9  ;;  %v3920_v9 = vpack.c.bf16 %v3147_v57, %v3146_v46  ;;  %v4922_v19 = vsel %vm1383_vm1, %v4860_v54, %v1397_v61  ;;  %v1460_v30 = vrot.slane %v4914_v17, 1  ;;  %s1116_s15 = scalar_lea.vmem %s5624_s6, %s3250_s18  ;;  %s5694_s25 = smov (!%p2977_p1, %s1129_s25), 15 }
  0x47   : > { %3911 = vmatpush3.bf16.msra.mxu0 %v3910_v14  ;;  %3849 = vmatprep.subr.bf16.mxu1 %v3848_v16  ;;  %v3148_v14 = vld [vmem:[%s5628_s10 + $0x400] sm:$0xff]  ;;  %v3149_v16 = vld [vmem:[%s5628_s10 + $0x408] sm:$0xff]  ;;  %p1149_p7 = scmp.gt.s32.totalorder %s4950_s30, 0  ;;  %s1132_s22 = sadd.s32 %s5694_s25, %s4287_s17 }
  0x48   : > { %3913 = vmatprep.subr.bf16.mxu0 %v3912_v18  ;;  %v4916_v18 = vmul.f32 %v1300_v1, %v1299_v8  ;;  %v4944_v35 = vpack.c.bf16 %v3149_v16, %v3148_v14  ;;  %v1310_v41 = vld [vmem:[%s1116_s15 + $0x8] sm:$0xff]  ;;  %p2986_p8 = scmp.lt.s32.totalorder %s4950_s30, 15  ;;  %p1133_p9 = scmp.lt.s32.totalorder %s1132_s22, 63 }
  0x49   : > { %1692 = vmatmul.mubr.f32.gmra.mrb[10].mxu0 %v4814_v28  ;;  %v1312_v53 = vmul.f32 %v4370_v49, %v1310_v41  ;;  %p1334_p10 = scmp.ge.s32.totalorder %s4950_s30, 0  ;;  %p1335_p11 = scmp.lt.s32.totalorder %s4950_s30, 16 }
  0x4a   : > { %1696 = vmatprep.mubr.f32.mxu0 %v4791_v23  ;;  %3851 = vmatpush3.bf16.msra.mxu1 %v3850_v39  ;;  %v4941_v31 = vrot.slane %v4916_v18, 1  ;;  %v1400_v46 = vrot.slane %v4916_v18, 7  ;;  %s3017_s1 = scalar_select %p4973_p5, 0.0, 1.0 }
  0x4b   : > { %3915 = vmatpush3.bf16.msra.mxu0 %v3914_v38  ;;  %3853 = vmatprep.subr.bf16.mxu1 %v3852_v55  ;;  %v4954_v38 = vrot.slane %v4914_v17, 7  ;;  %v1315_v55 = vstv %s3016_s20  ;;  %v1314_v58 = vadd.f32 %v4375_v50, %v1312_v53  ;;  %s5696_s22 = smov (!%p1133_p9, %s1132_s22), 63  ;;  %s5020_s24 = sadd.s32 4294967295, %s4245_s21 }
  0x4c   : > { %3917 = vmatprep.subr.bf16.mxu0 %v3916_v40  ;;  %v4958_v39 = vsel %vm1444_vm0, %v1460_v30, %v4941_v31  ;;  %v1309_v40 = vld [vmem:[%s1116_s15] sm:$0xff]  ;;  %s1150_s19 = scalar_select %p1149_p7, %s4950_s30, 0 }
  0x4d   : > { %3075 = vmatmul.mubr.msk.f32.gmra.mrb[12].mxu0 %vm4524_vm2, %v4860_v54  ;;  %3640 = vmatprep.mubr.f32.mxu1 %v4958_v39  ;;  %v1311_v52 = vmul.f32 %v4370_v49, %v1309_v40  ;;  %v4998_v59 = vsel %vm1383_vm1, %v4954_v38, %v1400_v46  ;;  %v5002_v62 = vmul.f32 %v1315_v55, %v1314_v58  ;;  %s3253_s20 = sshll.u32 %s5696_s22, 4  ;;  %p5037_p12 = pnand %p1335_p11, %p1334_p10 }
  0x4e   : > { %1701 = vmatprep.mubr.f32.mxu0 %v4793_v24  ;;  %3855 = vmatpush3.bf16.msra.mxu1 %v3854_v3  ;;  %s1137_s16 = scalar_lea.vmem %s5625_s7, %s3253_s20  ;;  %s5698_s19 = smov (!%p2986_p8, %s1150_s19), 15 }
  0x4f   : > { %3919 = vmatpush3.bf16.msra.mxu0 %v3918_v5  ;;  %3857 = vmatprep.subr.bf16.mxu1 %v3856_v13  ;;  %v1313_v57 = vadd.f32 %v4375_v50, %v1311_v52  ;;  %v5009_v1 = vrot.slane %v5002_v62, 1  ;;  %v1403_v5 = vrot.slane %v5002_v62, 7  ;;  %v1324_v8 = vld [vmem:[%s1137_s16] sm:$0xff]  ;;  %p983_p13 = scmp.gt.s32.totalorder %s5020_s24, 0  ;;  %v1330_v13 = vstv %s3017_s1  ;;  %s1153_s18 = sadd.s32 %s5698_s19, %s4287_s17 }
  0x50   : > { %3921 = vmatprep.subr.bf16.mxu0 %v3920_v9  ;;  %3641 = vmatmul.mubr.msk.f32.gmra.mrb[8].mxu1 %vm1444_vm0, %v4941_v31  ;;  %v1325_v9 = vld [vmem:[%s1137_s16 + $0x8] sm:$0xff]  ;;  %v1326_v11 = vmul.f32 %v4370_v49, %v1324_v8  ;;  %p2914_p0 = scmp.lt.s32.totalorder %s5020_s24, 15  ;;  %p1154_p1 = scmp.lt.s32.totalorder %s1153_s18, 63 }
  0x51   : > { %1702 = vmatmul.mubr.f32.gmra.mrb[14].mxu0 %v4922_v19  ;;  %v5000_v61 = vmul.f32 %v1315_v55, %v1313_v57  ;;  %v1327_v12 = vmul.f32 %v4370_v49, %v1325_v9  ;;  %p1203_p2 = scmp.ge.s32.totalorder %s5020_s24, 0  ;;  %p1204_p3 = scmp.lt.s32.totalorder %s5020_s24, 16 }
  0x52   : > { %1706 = vmatprep.mubr.f32.mxu0 %v4914_v17  ;;  %3859 = vmatpush3.bf16.msra.mxu1 %v3858_v36  ;;  %v1328_v14 = vadd.f32 %v4375_v50, %v1326_v11  ;;  %s3018_s23 = scalar_select %p5037_p12, 0.0, 1.0 }
  0x53   : > { %3923 = vmatpush3.bf16.msra.mxu0 %v3922_v29  ;;  %3861 = vmatprep.subr.bf16.mxu1 %v4963_v43  ;;  %v1463_v63 = vrot.slane %v5000_v61, 1  ;;  %v5014_v3 = vrot.slane %v5000_v61, 7  ;;  %v1329_v16 = vadd.f32 %v4375_v50, %v1327_v12  ;;  %s5700_s18 = smov (!%p1154_p1, %s1153_s18), 63  ;;  %p5099_p4 = pnand %p1204_p3, %p1203_p2 }
  0x54   : > { %3925 = vmatprep.subr.bf16.mxu0 %v4944_v35  ;;  %v5059_v25 = vmul.f32 %v1330_v13, %v1328_v14  ;;  %s984_s27 = scalar_select %p983_p13, %s5020_s24, 0  ;;  %v1345_v55 = vstv %s3018_s23 }
  0x55   : > { %3077 = vmatmul.mubr.msk.f32.gmra.mrb[16].mxu0 %vm4524_vm2, %v4954_v38  ;;  %v5026_v7 = vsel %vm1444_vm0, %v1463_v63, %v5009_v1  ;;  %v5055_v22 = vsel %vm1383_vm1, %v5014_v3, %v1403_v5  ;;  %v5061_v26 = vmul.f32 %v1330_v13, %v1329_v16  ;;  %s3256_s15 = sshll.u32 %s5700_s18, 4  ;;  %s5211_s19 = sadd.s32 8, %s4245_s21 }
  0x56   : > { %1711 = vmatprep.mubr.f32.mxu0 %v4916_v18  ;;  %3643 = vmatprep.mubr.f32.mxu1 %v5026_v7  ;;  %v1466_v27 = vrot.slane %v5059_v25, 1  ;;  %v5074_v30 = vrot.slane %v5059_v25, 7  ;;  %s1158_s22 = scalar_lea.vmem %s5626_s8, %s3256_s15  ;;  %s5702_s27 = smov (!%p2914_p0, %s984_s27), 15 }
  0x57   : > { %3644 = vmatmul.mubr.msk.f32.gmra.mrb[10].mxu1 %vm1444_vm0, %v5009_v1  ;;  %v5069_v29 = vrot.slane %v5061_v26, 1  ;;  %v1406_v36 = vrot.slane %v5061_v26, 7  ;;  %v1339_v41 = vld [vmem:[%s1158_s22] sm:$0xff]  ;;  %v1340_v46 = vld [vmem:[%s1158_s22 + $0x8] sm:$0xff]  ;;  %s987_s1 = sadd.s32 %s5702_s27, %s4287_s17  ;;  %p1170_p7 = scmp.gt.s32.totalorder %s5211_s19, 0 }
  0x58   : > { %v1341_v52 = vmul.f32 %v4370_v49, %v1339_v41  ;;  %v1342_v53 = vmul.f32 %v4370_v49, %v1340_v46  ;;  %p988_p5 = scmp.lt.s32.totalorder %s987_s1, 63  ;;  %p2995_p8 = scmp.lt.s32.totalorder %s5211_s19, 15 }
  0x59   : > { %1712 = vmatmul.mubr.f32.gmra.mrb[18].mxu0 %v4998_v59  ;;  %v5082_v40 = vsel %vm1444_vm0, %v1466_v27, %v5069_v29  ;;  %v5106_v57 = vsel %vm1383_vm1, %v5074_v30, %v1406_v36  ;;  %s3008_s20 = scalar_select %p5099_p4, 0.0, 1.0 }
  0x5a   : > { %1716 = vmatprep.mubr.f32.mxu0 %v5000_v61  ;;  %3646 = vmatprep.mubr.f32.mxu1 %v5082_v40  ;;  %v1343_v58 = vadd.f32 %v4375_v50, %v1341_v52  ;;  %v1344_v63 = vadd.f32 %v4375_v50, %v1342_v53  ;;  %s5704_s1 = smov (!%p988_p5, %s987_s1), 63  ;;  %p1349_p10 = scmp.ge.s32.totalorder %s5211_s19, 0 }
  0x5b   : > { %3647 = vmatmul.mubr.msk.f32.gmra.mrb[12].mxu1 %vm1444_vm0, %v5069_v29  ;;  %s3232_s25 = sshll.u32 %s5704_s1, 4  ;;  %v1226_v52 = vstv %s3008_s20  ;;  %p1350_p11 = scmp.lt.s32.totalorder %s5211_s19, 16 }
  0x5c   : > { %v5110_v5 = vmul.f32 %v1345_v55, %v1343_v58  ;;  %v5112_v8 = vmul.f32 %v1345_v55, %v1344_v63  ;;  %s992_s24 = scalar_lea.vmem %s5618_s0, %s3232_s25  ;;  %v1539_v58 = vld [vmem:[%s5628_s10 + $0x110] sm:$0xff]  ;;  %p1189_p13 = scmp.lt.s32.totalorder %s4120_s26, 1 }
  0x5d   : > { %3079 = vmatmul.mubr.msk.f32.gmra.mrb[20].mxu0 %vm4524_vm2, %v5014_v3  ;;  %v1208_v16 = vld [vmem:[%s992_s24] sm:$0xff]  ;;  %v1209_v27 = vld [vmem:[%s992_s24 + $0x8] sm:$0xff]  ;;  %s1171_s22 = scalar_select %p1170_p7, %s5211_s19, 0 }
  0x5e   : > { %1721 = vmatprep.mubr.f32.mxu0 %v5002_v62  ;;  %v1469_v9 = vrot.slane %v5110_v5, 1  ;;  %v5119_v11 = vrot.slane %v5112_v8, 1  ;;  %v5123_v12 = vrot.slane %v5110_v5, 7  ;;  %v1409_v13 = vrot.slane %v5112_v8, 7  ;;  %p5346_p12 = pnand %p1350_p11, %p1349_p10  ;;  %s5710_s26 = smov (!%p1189_p13, %s4120_s26), 1 }
  0x5f   : > { %v1216_v36 = vmul.f32 %v4370_v49, %v1208_v16  ;;  %v1217_v41 = vmul.f32 %v4370_v49, %v1209_v27  ;;  %v1540_v49 = vld [vmem:[%s5628_s10 + $0x118] sm:$0xff]  ;;  %s5706_s22 = smov (!%p2995_p8, %s1171_s22), 15  ;;  %s5712_s21 = smov (!%p2923_p6, %s4245_s21), 15 }
  0x60   : > { %5655 = vst [vmem:[#allocation7_spill] sm:$0xff] %v5119_v11  ;;  %v5131_v14 = vsel %vm1444_vm0, %v1469_v9, %v5119_v11  ;;  %v5142_v46 = vsel %vm1383_vm1, %v5123_v12, %v1409_v13  ;;  %v3151_v13 = vld [vmem:[%s5628_s10 + $0x418] sm:$0xff]  ;;  %s1174_s29 = sadd.s32 %s5706_s22, %s4287_s17  ;;  %s3003_s25 = sshll.u32 %s5712_s21, 1 }
  0x61   : > { %1722 = vmatmul.mubr.f32.gmra.mrb[22].mxu0 %v5055_v22  ;;  %3649 = vmatprep.mubr.f32.mxu1 %v5131_v14  ;;  %v1224_v53 = vadd.f32 %v4375_v50, %v1216_v36  ;;  %v1225_v55 = vadd.f32 %v4375_v50, %v1217_v41  ;;  %v3150_v50 = vld [vmem:[%s5628_s10 + $0x410] sm:$0xff]  ;;  %v3864_v36 = vpack.c.bf16 %v1540_v49, %v1539_v58  ;;  %v1541_v41 = vld [vmem:[%s5628_s10 + $0x120] sm:$0xff]  ;;  %v3153_v58 = vld [vmem:[%s5628_s10 + $0x428] sm:$0xff]  ;;  %p1175_p9 = scmp.lt.s32.totalorder %s1174_s29, 63 }
  0x62   : > { %1726 = vmatprep.mubr.f32.mxu0 %v5059_v25  ;;  %3650 = vmatmul.mubr.msk.f32.gmra.mrb[14].mxu1 %vm1444_vm0, %v5119_v11  ;;  %v1544_v11 = vld [vmem:[%s5628_s10 + $0x138] sm:$0xff]  ;;  %s3019_s14 = scalar_select %p5346_p12, 0.0, 1.0 }
  0x63   : > { %v5155_v63 = vmul.f32 %v1226_v52, %v1224_v53  ;;  %v5157_v9 = vmul.f32 %v1226_v52, %v1225_v55  ;;  %v1542_v52 = vld [vmem:[%s5628_s10 + $0x128] sm:$0xff]  ;;  %v5178_v53 = vpack.c.bf16 %v3151_v13, %v3150_v50  ;;  %v3152_v55 = vld [vmem:[%s5628_s10 + $0x420] sm:$0xff]  ;;  %v1543_v13 = vld [vmem:[%s5628_s10 + $0x130] sm:$0xff]  ;;  %s5708_s29 = smov (!%p1175_p9, %s1174_s29), 63 }
  0x64   : > { %v3868_v50 = vpack.c.bf16 %v1542_v52, %v1541_v41  ;;  %v3872_v41 = vpack.c.bf16 %v1544_v11, %v1543_v13  ;;  %v1545_v52 = vld [vmem:[%s5628_s10 + $0x140] sm:$0xff]  ;;  %s3259_s17 = sshll.u32 %s5708_s29, 4  ;;  %s3004_s29 = sshll.u32 %s5710_s26, 5 }
  0x65   : > { %3081 = vmatmul.mubr.msk.f32.gmra.mrb[24].mxu0 %vm4524_vm2, %v5074_v30  ;;  %v1384_v16 = vrot.slane %v5155_v63, 7  ;;  %1956 = vmatprep.mubr.f32.mxu1 %v5155_v63  ;;  %v1385_v27 = vrot.slane %v5157_v9, 7  ;;  %v3156_v11 = vld [vmem:[%s5628_s10 + $0x440] sm:$0xff]  ;;  %s1179_s27 = scalar_lea.vmem %s5627_s9, %s3259_s17  ;;  %s1195_s16 = sadd.s32 %s3004_s29, %s3003_s25 }
  0x66   : > { %1731 = vmatprep.mubr.f32.mxu0 %v5061_v26  ;;  %s3005_s21 = sshll.u32 %s1195_s16, 3 }
  0x67   : > { %3093 = vmatmul.mubr.msk.f32.vlgmr.msra.gmra.mrb[16].mxu1 %vm4524_vm2, %v1384_v16  ;;  %v1386_v49 = vsel %vm1383_vm1, %v1384_v16, %v1385_v27  ;;  %v3154_v16 = vld [vmem:[%s5628_s10 + $0x430] sm:$0xff]  ;;  %v3155_v27 = vld [vmem:[%s5628_s10 + $0x438] sm:$0xff]  ;;  %s5566_s28 = scalar_lea.vmem %s5631_s13, %s3005_s21 }
  0x68   : > { %3863 = vmatpush3.bf16.msra.mxu1 %v4963_v43  ;;  %1961 = vmatprep.mubr.f32.mxu1 %v5157_v9  ;;  %v5201_v43 = vpack.c.bf16 %v3153_v58, %v3152_v55  ;;  %v1546_v55 = vld [vmem:[%s5628_s10 + $0x148] sm:$0xff] }
  0x69   : > { %1732 = vmatmul.mubr.f32.gmra.mrb[26].mxu0 %v5106_v57  ;;  %3865 = vmatprep.subr.bf16.mxu1 %v3864_v36  ;;  %v3876_v58 = vpack.c.bf16 %v1546_v55, %v1545_v52  ;;  %v3161_v52 = vld [vmem:[%s5628_s10 + $0x468] sm:$0xff] }
  0x6a   : > { %1736 = vmatprep.mubr.f32.mxu0 %v5110_v5 }
  0x6b   : > { %1962 = vmatmul.mubr.f32.gmra.mrb[18].mxu1 %v1386_v49  ;;  %v1548_v49 = vld [vmem:[%s5628_s10 + $0x158] sm:$0xff] }
  0x6c   : > { %1966 = vmatprep.mubr.f32.mxu1 %v4422_v6  ;;  %3867 = vmatpush3.bf16.msra.mxu1 %v3864_v36  ;;  %v5225_v6 = vpack.c.bf16 %v3155_v27, %v3154_v16  ;;  %v3157_v36 = vld [vmem:[%s5628_s10 + $0x448] sm:$0xff] }
  0x6d   : > { %3083 = vmatmul.mubr.msk.f32.gmra.mrb[28].mxu0 %vm4524_vm2, %v5123_v12  ;;  %3869 = vmatprep.subr.bf16.mxu1 %v3868_v50  ;;  %v5249_v13 = vpack.c.bf16 %v3157_v36, %v3156_v11  ;;  %v1550_v27 = vld [vmem:[%s5628_s10 + $0x168] sm:$0xff]  ;;  %v1552_v11 = vld [vmem:[%s5628_s10 + $0x178] sm:$0xff] }
  0x6e   : > { %1741 = vmatprep.mubr.f32.mxu0 %v5112_v8 }
  0x6f   : > { %3095 = vmatmul.mubr.msk.f32.gmra.mrb[20].mxu1 %vm4524_vm2, %v4512_v37  ;;  %v1547_v37 = vld [vmem:[%s5628_s10 + $0x150] sm:$0xff] }
  0x70   : > { %1971 = vmatprep.mubr.f32.mxu1 %v4432_v10  ;;  %3871 = vmatpush3.bf16.msra.mxu1 %v3868_v50  ;;  %v3158_v10 = vld [vmem:[%s5628_s10 + $0x450] sm:$0xff]  ;;  %v3159_v50 = vld [vmem:[%s5628_s10 + $0x458] sm:$0xff]  ;;  %v3880_v16 = vpack.c.bf16 %v1548_v49, %v1547_v37 }
  0x71   : > { %1742 = vmatmul.mubr.f32.gmra.mrb[30].mxu0 %v5142_v46  ;;  %3873 = vmatprep.subr.bf16.mxu1 %v3872_v41 }
  0x72   : > { %2295 = vmatprep.mubr.f32.mxu0 %v4537_v48 }
  0x73   : > { %1972 = vmatmul.mubr.f32.gmra.mrb[22].mxu1 %v4585_v0  ;;  %v1549_v0 = vld [vmem:[%s5628_s10 + $0x160] sm:$0xff] }
  0x74   : > { %1976 = vmatprep.mubr.f32.mxu1 %v4537_v48  ;;  %3875 = vmatpush3.bf16.msra.mxu1 %v3872_v41  ;;  %v5274_v48 = vpack.c.bf16 %v3159_v50, %v3158_v10  ;;  %v3160_v41 = vld [vmem:[%s5628_s10 + $0x460] sm:$0xff]  ;;  %v3884_v55 = vpack.c.bf16 %v1550_v27, %v1549_v0 }
  0x75   : > { %3165 = vmatmul.mubr.msk.f32.vlgmr.msra.gmra.mrb[32].mxu0 %vm4524_vm2, %v4643_v21  ;;  %3877 = vmatprep.subr.bf16.mxu1 %v3876_v58  ;;  %v5298_v36 = vpack.c.bf16 %v3161_v52, %v3160_v41 }
  0x76   : > { %3927 = vmatpush3.bf16.msra.mxu0 %v4944_v35  ;;  %2300 = vmatprep.mubr.f32.mxu0 %v4539_v51 }
  0x77   : > { %3929 = vmatprep.subr.bf16.mxu0 %v5178_v53  ;;  %3097 = vmatmul.mubr.msk.f32.gmra.mrb[24].mxu1 %vm4524_vm2, %v4643_v21  ;;  %v1551_v21 = vld [vmem:[%s5628_s10 + $0x170] sm:$0xff] }
  0x78   : > { %1981 = vmatprep.mubr.f32.mxu1 %v4539_v51  ;;  %3879 = vmatpush3.bf16.msra.mxu1 %v3876_v58  ;;  %v3162_v51 = vld [vmem:[%s5628_s10 + $0x470] sm:$0xff]  ;;  %v3163_v58 = vld [vmem:[%s5628_s10 + $0x478] sm:$0xff]  ;;  %v3888_v37 = vpack.c.bf16 %v1552_v11, %v1551_v21 }
  0x79   : > { %2301 = vmatmul.mubr.f32.gmra.mrb[34].mxu0 %v4707_v45  ;;  %3881 = vmatprep.subr.bf16.mxu1 %v3880_v16 }
  0x7a   : > { %2305 = vmatprep.mubr.f32.mxu0 %v4671_v32  ;;  %3931 = vmatpush3.bf16.msra.mxu0 %v5178_v53 }
  0x7b   : > { %3933 = vmatprep.subr.bf16.mxu0 %v5201_v43  ;;  %1982 = vmatmul.mubr.f32.gmra.mrb[26].mxu1 %v4707_v45  ;;  %v5315_v45 = vpack.c.bf16 %v3163_v58, %v3162_v51 }
  0x7c   : > { %1986 = vmatprep.mubr.f32.mxu1 %v4671_v32  ;;  %3883 = vmatpush3.bf16.msra.mxu1 %v3880_v16  ;;  %v1354_v32 = vld [vmem:[%s1179_s27] sm:$0xff] }
  0x7d   : > { %3167 = vmatmul.mubr.msk.f32.gmra.mrb[36].mxu0 %vm4524_vm2, %v4754_v2  ;;  %3885 = vmatprep.subr.bf16.mxu1 %v3884_v55 }
  0x7e   : > { %2310 = vmatprep.mubr.f32.mxu0 %v4673_v33  ;;  %3935 = vmatpush3.bf16.msra.mxu0 %v5201_v43 }
  0x7f   : > { %3937 = vmatprep.subr.bf16.mxu0 %v5225_v6  ;;  %3099 = vmatmul.mubr.msk.f32.gmra.mrb[28].mxu1 %vm4524_vm2, %v4754_v2  ;;  %v4092_v2 = vld [vmem:[%s5629_s11] ss:$0 sm:$0xff] }
  0x80   : > { %1991 = vmatprep.mubr.f32.mxu1 %v4673_v33  ;;  %3887 = vmatpush3.bf16.msra.mxu1 %v3884_v55  ;;  %v1355_v33 = vld [vmem:[%s1179_s27 + $0x8] sm:$0xff] }
  0x81   : > { %2311 = vmatmul.mubr.f32.gmra.mrb[38].mxu0 %v4814_v28  ;;  %3889 = vmatprep.subr.bf16.mxu1 %v3888_v37 }
  0x82   : > { %2315 = vmatprep.mubr.f32.mxu0 %v4791_v23  ;;  %3939 = vmatpush3.bf16.msra.mxu0 %v5225_v6 }
  0x83   : > { %3941 = vmatprep.subr.bf16.mxu0 %v5249_v13  ;;  %1992 = vmatmul.mubr.f32.gmra.mrb[30].mxu1 %v4814_v28  ;;  %v4093_v28 = vld [vmem:[%s5630_s12] ss:$0 sm:$0xff] }
  0x84   : > { %1996 = vmatprep.mubr.f32.mxu1 %v4791_v23  ;;  %3891 = vmatpush3.bf16.msra.mxu1 %v3888_v37  ;;  %v1356_v23 = vmul.f32 %v4092_v2, %v1354_v32 }
  0x85   : > { %3169 = vmatmul.mubr.msk.f32.gmra.mrb[40].mxu0 %vm4524_vm2, %v4860_v54  ;;  %3956 = vmatprep.subr.bf16.mxu1 %v4944_v35 }
  0x86   : > { %2320 = vmatprep.mubr.f32.mxu0 %v4793_v24  ;;  %3943 = vmatpush3.bf16.msra.mxu0 %v5249_v13 }
  0x87   : > { %3945 = vmatprep.subr.bf16.mxu0 %v5274_v48  ;;  %3101 = vmatmul.mubr.msk.f32.gmra.mrb[32].mxu1 %vm4524_vm2, %v4860_v54  ;;  %v1358_v54 = vadd.f32 %v4093_v28, %v1356_v23 }
  0x88   : > { %2001 = vmatprep.mubr.f32.mxu1 %v4793_v24  ;;  %v1357_v24 = vmul.f32 %v4092_v2, %v1355_v33 }
  0x89   : > { %2321 = vmatmul.mubr.f32.gmra.mrb[42].mxu0 %v4922_v19 }
  0x8a   : > { %2325 = vmatprep.mubr.f32.mxu0 %v4914_v17  ;;  %3947 = vmatpush3.bf16.msra.mxu0 %v5274_v48 }
  0x8b   : > { %3949 = vmatprep.subr.bf16.mxu0 %v5298_v36  ;;  %2002 = vmatmul.mubr.f32.gmra.mrb[34].mxu1 %v4922_v19  ;;  %v1359_v19 = vadd.f32 %v4093_v28, %v1357_v24 }
  0x8c   : > { %2006 = vmatprep.mubr.f32.mxu1 %v4914_v17  ;;  %v1360_v17 = vstv %s3019_s14 }
  0x8d   : > { %3171 = vmatmul.mubr.msk.f32.gmra.mrb[44].mxu0 %vm4524_vm2, %v4954_v38 }
  0x8e   : > { %2330 = vmatprep.mubr.f32.mxu0 %v4916_v18  ;;  %3951 = vmatpush3.bf16.msra.mxu0 %v5298_v36 }
  0x8f   : > { %3953 = vmatprep.subr.bf16.mxu0 %v5315_v45  ;;  %3103 = vmatmul.mubr.msk.f32.gmra.mrb[36].mxu1 %vm4524_vm2, %v4954_v38  ;;  %v5380_v38 = vmul.f32 %v1360_v17, %v1359_v19 }
  0x90   : > { %2011 = vmatprep.mubr.f32.mxu1 %v4916_v18  ;;  %v5374_v18 = vmul.f32 %v1360_v17, %v1358_v54 }
  0x91   : > { %2331 = vmatmul.mubr.f32.gmra.mrb[46].mxu0 %v4998_v59 }
  0x92   : > { %2335 = vmatprep.mubr.f32.mxu0 %v5000_v61  ;;  %3955 = vmatpush3.bf16.msra.mxu0 %v5315_v45 }
  0x93   : > { %2012 = vmatmul.mubr.f32.gmra.mrb[38].mxu1 %v4998_v59  ;;  %v1411_v59 = vrot.slane %v5374_v18, 7 }
  0x94   : > { %2016 = vmatprep.mubr.f32.mxu1 %v5000_v61  ;;  %v1412_v61 = vrot.slane %v5380_v38, 7 }
  0x95   : > { %3173 = vmatmul.mubr.msk.f32.gmra.mrb[48].mxu0 %vm4524_vm2, %v5014_v3 }
  0x96   : > { %2340 = vmatprep.mubr.f32.mxu0 %v5002_v62 }
  0x97   : > { %3105 = vmatmul.mubr.msk.f32.gmra.mrb[40].mxu1 %vm4524_vm2, %v5014_v3  ;;  %v1445_v3 = vrot.slane %v5155_v63, 1 }
  0x98   : > { %2021 = vmatprep.mubr.f32.mxu1 %v5002_v62  ;;  %v1413_v62 = vsel %vm1383_vm1, %v1411_v59, %v1412_v61 }
  0x99   : > { %2341 = vmatmul.mubr.f32.gmra.mrb[50].mxu0 %v5055_v22 }
  0x9a   : > { %2345 = vmatprep.mubr.f32.mxu0 %v5059_v25 }
  0x9b   : > { %2022 = vmatmul.mubr.f32.gmra.mrb[42].mxu1 %v5055_v22 }
  0x9c   : > { %2026 = vmatprep.mubr.f32.mxu1 %v5059_v25 }
  0x9d   : > { %3175 = vmatmul.mubr.msk.f32.gmra.mrb[52].mxu0 %vm4524_vm2, %v5074_v30 }
  0x9e   : > { %2350 = vmatprep.mubr.f32.mxu0 %v5061_v26 }
  0x9f   : > { %3107 = vmatmul.mubr.msk.f32.gmra.mrb[44].mxu1 %vm4524_vm2, %v5074_v30 }
  0xa0   : > { %2031 = vmatprep.mubr.f32.mxu1 %v5061_v26 }
  0xa1   : > { %2351 = vmatmul.mubr.f32.gmra.mrb[54].mxu0 %v5106_v57 }
  0xa2   : > { %2355 = vmatprep.mubr.f32.mxu0 %v5110_v5  ;;  %v1446_v5 = vrot.slane %v5157_v9, 1 }
  0xa3   : > { %2032 = vmatmul.mubr.f32.gmra.mrb[46].mxu1 %v5106_v57 }
  0xa4   : > { %v1447_v22 = vsel %vm1444_vm0, %v1445_v3, %v1446_v5 }
  0xa5   : > { %3177 = vmatmul.mubr.msk.f32.gmra.mrb[56].mxu0 %vm4524_vm2, %v5123_v12  ;;  %3684 = vmatprep.mubr.f32.mxu1 %v1447_v22 }
  0xa6   : > { %2360 = vmatprep.mubr.f32.mxu0 %v5112_v8 }
  0xa7   : > { %3685 = vmatmul.mubr.msk.f32.vlgmr.msra.gmra.mrb[0].mxu1 %vm1444_vm0, %v1446_v5 }
  0xa8   : > { %3964 = vmatpush3.bf16.msra.mxu1 %v4944_v35  ;;  %3687 = vmatprep.mubr.f32.mxu1 %v4459_v20  ;;  %v1473_v20 = vrot.slane %v5380_v38, 1 }
  0xa9   : > { %2361 = vmatmul.mubr.f32.gmra.mrb[58].mxu0 %v5142_v46  ;;  %3957 = vmatprep.subr.bf16.mxu1 %v5178_v53 }
  0xaa   : > { %2365 = vmatprep.mubr.f32.mxu0 %v5374_v18 }
  0xab   : > { %3688 = vmatmul.mubr.msk.f32.gmra.mrb[2].mxu1 %vm1444_vm0, %v4446_v15  ;;  %v1472_v15 = vrot.slane %v5374_v18, 1 }
  0xac   : > { %3965 = vmatpush3.bf16.msra.mxu1 %v5178_v53  ;;  %3690 = vmatprep.mubr.f32.mxu1 %v4606_v4 }
  0xad   : > { %3179 = vmatmul.mubr.msk.f32.gmra.mrb[60].mxu0 %vm4524_vm2, %v1411_v59  ;;  %3958 = vmatprep.subr.bf16.mxu1 %v5201_v43  ;;  %v1474_v42 = vsel %vm1444_vm0, %v1472_v15, %v1473_v20 }
  0xae   : > { %2370 = vmatprep.mubr.f32.mxu0 %v5380_v38 }
  0xaf   : > { %3691 = vmatmul.mubr.msk.f32.gmra.mrb[4].mxu1 %vm1444_vm0, %v4572_v60 }
  0xb0   : > { %3966 = vmatpush3.bf16.msra.mxu1 %v5201_v43  ;;  %3693 = vmatprep.mubr.f32.mxu1 %v4734_v56 }
  0xb1   : > { %2371 = vmatmul.mubr.f32.gmra.mrb[62].mxu0 %v1413_v62  ;;  %3959 = vmatprep.subr.bf16.mxu1 %v5225_v6 }
  0xb2   : > { %3740 = vmatprep.mubr.f32.mxu0 %v4606_v4 }
  0xb3   : > { %3694 = vmatmul.mubr.msk.f32.gmra.mrb[6].mxu1 %vm1444_vm0, %v4702_v44 }
  0xb4   : > { %3967 = vmatpush3.bf16.msra.mxu1 %v5225_v6  ;;  %3696 = vmatprep.mubr.f32.mxu1 %v4854_v47 }
  0xb5   : > { %3741 = vmatmul.mubr.msk.f32.vlgmr.msra.gmra.mrb[64].mxu0 %vm1444_vm0, %v4572_v60  ;;  %3960 = vmatprep.subr.bf16.mxu1 %v5249_v13  ;;  %v5657_v60 = vld [vmem:[#allocation7_spill] sm:$0xff] }
  0xb6   : > { %3743 = vmatprep.mubr.f32.mxu0 %v4734_v56 }
  0xb7   : > { %3697 = vmatmul.mubr.msk.f32.gmra.mrb[8].mxu1 %vm1444_vm0, %v4824_v34 }
  0xb8   : > { %3968 = vmatpush3.bf16.msra.mxu1 %v5249_v13  ;;  %3699 = vmatprep.mubr.f32.mxu1 %v4958_v39 }
  0xb9   : > { %3744 = vmatmul.mubr.msk.f32.gmra.mrb[66].mxu0 %vm1444_vm0, %v4702_v44  ;;  %3961 = vmatprep.subr.bf16.mxu1 %v5274_v48 }
  0xba   : > { %3746 = vmatprep.mubr.f32.mxu0 %v4854_v47 }
  0xbb   : > { %3700 = vmatmul.mubr.msk.f32.gmra.mrb[10].mxu1 %vm1444_vm0, %v4941_v31 }
  0xbc   : > { %3969 = vmatpush3.bf16.msra.mxu1 %v5274_v48  ;;  %3702 = vmatprep.mubr.f32.mxu1 %v5026_v7 }
  0xbd   : > { %3747 = vmatmul.mubr.msk.f32.gmra.mrb[68].mxu0 %vm1444_vm0, %v4824_v34  ;;  %3962 = vmatprep.subr.bf16.mxu1 %v5298_v36 }
  0xbe   : > { %3749 = vmatprep.mubr.f32.mxu0 %v4958_v39 }
  0xbf   : > { %3703 = vmatmul.mubr.msk.f32.gmra.mrb[12].mxu1 %vm1444_vm0, %v5009_v1 }
  0xc0   : > { %3970 = vmatpush3.bf16.msra.mxu1 %v5298_v36  ;;  %3705 = vmatprep.mubr.f32.mxu1 %v5082_v40 }
  0xc1   : > { %3750 = vmatmul.mubr.msk.f32.gmra.mrb[70].mxu0 %vm1444_vm0, %v4941_v31  ;;  %3963 = vmatprep.subr.bf16.mxu1 %v5315_v45 }
  0xc3   : > { %3706 = vmatmul.mubr.msk.f32.gmra.mrb[14].mxu1 %vm1444_vm0, %v5069_v29 }
  0xc4   : > { %3971 = vmatpush3.bf16.msra.mxu1 %v5315_v45  ;;  %3752 = vmatprep.mubr.f32.mxu1 %v5026_v7 }
  0xc7   : > { %3753 = vmatmul.mubr.msk.f32.vlgmr.msra.gmra.mrb[8].mxu1 %vm1444_vm0, %v5009_v1 }
  0xc8   : > { %3755 = vmatprep.mubr.f32.mxu1 %v5082_v40 }
  0xcb   : > { %3756 = vmatmul.mubr.msk.f32.gmra.mrb[10].mxu1 %vm1444_vm0, %v5069_v29 }
  0xcc   : > { %3758 = vmatprep.mubr.f32.mxu1 %v5131_v14 }
  0xcf   : > { %3759 = vmatmul.mubr.msk.f32.gmra.mrb[12].mxu1 %vm1444_vm0, %v5657_v60 }
  0xd0   : > { %3761 = vmatprep.mubr.f32.mxu1 %v1474_v42 }
  0xd3   : > { %3762 = vmatmul.mubr.msk.f32.gmra.mrb[14].mxu1 %vm1444_vm0, %v1473_v20 }
 0x108   : > { %v3292_v4 = vpop.f32.mrb[0].mxu0 }
 0x109   : > { %v3293_v44 = vpop.f32.mrb[1].mxu0 }
 0x10a   : > { %v3294_v56 = vadd.f32 %v3293_v44, %v3292_v4 }
 0x10c   : > { %v3295_v34 = vpop.f32.mrb[2].mxu0 }
 0x10d   : > { %v3296_v47 = vpop.f32.mrb[3].mxu0 }
 0x10e   : > { %v3297_v31 = vadd.f32 %v3296_v47, %v3295_v34 }
 0x110   : > { %v3298_v35 = vpop.f32.mrb[4].mxu0 }
 0x111   : > { %v3299_v39 = vpop.f32.mrb[5].mxu0 }
 0x112   : > { %v5463_v1 = vadd.f32 %v3299_v39, %v3298_v35 }
 0x114   : > { %v3301_v7 = vpop.f32.mrb[6].mxu0 }
 0x115   : > { %v3302_v25 = vpop.f32.mrb[7].mxu0 }
 0x116   : > { %v5465_v26 = vadd.f32 %v3302_v25, %v3301_v7 }
 0x118   : > { %v3304_v29 = vpop.f32.mrb[8].mxu0 }
 0x119   : > { %v3305_v30 = vpop.f32.mrb[9].mxu0 }
 0x11a   : > { %v5467_v40 = vadd.f32 %v3305_v30, %v3304_v29 }
 0x11c   : > { %v3307_v57 = vpop.f32.mrb[10].mxu0 }
 0x11d   : > { %v3308_v8 = vpop.f32.mrb[11].mxu0 }
 0x11e   : > { %v5469_v12 = vadd.f32 %v3308_v8, %v3307_v57 }
 0x120   : > { %v3310_v14 = vpop.f32.mrb[12].mxu0 }
 0x121   : > { %v3311_v46 = vpop.f32.mrb[13].mxu0 }
 0x122   : > { %v5471_v63 = vadd.f32 %v3311_v46, %v3310_v14 }
 0x124   : > { %v3313_v9 = vpop.f32.mrb[14].mxu0 }
 0x125   : > { %v3314_v53 = vpop.f32.mrb[15].mxu0 }
 0x126   : > { %v5473_v43 = vadd.f32 %v3314_v53, %v3313_v9 }
 0x128   : > { %v3316_v6 = vpop.f32.mrb[16].mxu0 }
 0x129   : > { %v3317_v49 = vpop.f32.mrb[17].mxu0 }
 0x12a   : > { %v5475_v13 = vadd.f32 %v3317_v49, %v3316_v6 }
 0x12c   : > { %v3319_v10 = vpop.f32.mrb[18].mxu0 }
 0x12d   : > { %v3320_v50 = vpop.f32.mrb[19].mxu0 }
 0x12e   : > { %v5477_v16 = vadd.f32 %v3320_v50, %v3319_v10 }
 0x130   : > { %v3322_v0 = vpop.f32.mrb[20].mxu0 }
 0x131   : > { %v3323_v27 = vpop.f32.mrb[21].mxu0 }
 0x132   : > { %v5479_v48 = vadd.f32 %v3323_v27, %v3322_v0 }
 0x134   : > { %v3325_v41 = vpop.f32.mrb[22].mxu0 }
 0x135   : > { %v3326_v52 = vpop.f32.mrb[23].mxu0 }
 0x136   : > { %v5481_v55 = vadd.f32 %v3326_v52, %v3325_v41 }
 0x138   : > { %v3328_v21 = vpop.f32.mrb[24].mxu0 }
 0x139   : > { %v3329_v11 = vpop.f32.mrb[25].mxu0 }
 0x13a   : > { %v5483_v36 = vadd.f32 %v3329_v11, %v3328_v21  ;;  %v3404_v54 = vpop.f32.mrb[16].mxu1 }
 0x13b   : > { %v3405_v19 = vpop.f32.mrb[17].mxu1 }
 0x13c   : > { %v3331_v51 = vpop.f32.mrb[26].mxu0  ;;  %v3406_v38 = vadd.f32 %v3405_v19, %v3404_v54 }
 0x13d   : > { %v3332_v58 = vpop.f32.mrb[27].mxu0 }
 0x13e   : > { %v5485_v37 = vadd.f32 %v3332_v58, %v3331_v51  ;;  %v3407_v61 = vpop.f32.mrb[18].mxu1  ;;  %v5493_v5 = vadd.f32 %v3406_v38, %v3294_v56 }
 0x13f   : > { %v3408_v62 = vpop.f32.mrb[19].mxu1 }
 0x140   : > { %v3334_v45 = vpop.f32.mrb[28].mxu0  ;;  %v3409_v15 = vadd.f32 %v3408_v62, %v3407_v61 }
 0x141   : > { %v3335_v32 = vpop.f32.mrb[29].mxu0 }
 0x142   : > { %v5487_v33 = vadd.f32 %v3335_v32, %v3334_v45  ;;  %v3410_v42 = vpop.f32.mrb[20].mxu1  ;;  %v5497_v4 = vadd.f32 %v3409_v15, %v3297_v31 }
 0x143   : > { %v3411_v44 = vpop.f32.mrb[21].mxu1 }
 0x144   : > { %v3337_v2 = vpop.f32.mrb[30].mxu0  ;;  %v3412_v47 = vadd.f32 %v3411_v44, %v3410_v42 }
 0x145   : > { %v3338_v23 = vpop.f32.mrb[31].mxu0 }
 0x146   : > { %v5489_v24 = vadd.f32 %v3338_v23, %v3337_v2  ;;  %v3413_v39 = vpop.f32.mrb[22].mxu1  ;;  %v5502_v25 = vadd.f32 %v3412_v47, %v5463_v1 }
 0x147   : > { %v3414_v56 = vpop.f32.mrb[23].mxu1 }
 0x148   : > { %v3516_v28 = vpop.f32.mrb[32].mxu0  ;;  %v3415_v30 = vadd.f32 %v3414_v56, %v3413_v39 }
 0x149   : > { %v3517_v17 = vpop.f32.mrb[33].mxu0 }
 0x14a   : > { %v5491_v18 = vadd.f32 %v3517_v17, %v3516_v28  ;;  %v3416_v8 = vpop.f32.mrb[24].mxu1  ;;  %v5507_v31 = vadd.f32 %v3415_v30, %v5465_v26 }
 0x14b   : > { %v3417_v46 = vpop.f32.mrb[25].mxu1 }
 0x14c   : > { %v3519_v59 = vpop.f32.mrb[34].mxu0  ;;  %v3418_v53 = vadd.f32 %v3417_v46, %v3416_v8 }
 0x14d   : > { %v3520_v3 = vpop.f32.mrb[35].mxu0 }
 0x14e   : > { %v5495_v22 = vadd.f32 %v3520_v3, %v3519_v59  ;;  %v3419_v49 = vpop.f32.mrb[26].mxu1  ;;  %v5512_v1 = vadd.f32 %v3418_v53, %v5467_v40 }
 0x14f   : > { %v3420_v50 = vpop.f32.mrb[27].mxu1 }
 0x150   : > { %v3522_v20 = vpop.f32.mrb[36].mxu0  ;;  %v3421_v27 = vadd.f32 %v3420_v50, %v3419_v49 }
 0x151   : > { %v3523_v60 = vpop.f32.mrb[37].mxu0 }
 0x152   : > { %v5499_v34 = vadd.f32 %v3523_v60, %v3522_v20  ;;  %v3422_v52 = vpop.f32.mrb[28].mxu1  ;;  %v5517_v26 = vadd.f32 %v3421_v27, %v5469_v12 }
 0x153   : > { %v3423_v11 = vpop.f32.mrb[29].mxu1 }
 0x154   : > { %v3525_v35 = vpop.f32.mrb[38].mxu0  ;;  %v3424_v58 = vadd.f32 %v3423_v11, %v3422_v52 }
 0x155   : > { %v3526_v7 = vpop.f32.mrb[39].mxu0 }
 0x156   : > { %v5504_v29 = vadd.f32 %v3526_v7, %v3525_v35  ;;  %v3425_v32 = vpop.f32.mrb[30].mxu1  ;;  %v5522_v40 = vadd.f32 %v3424_v58, %v5471_v63 }
 0x157   : > { %v3426_v23 = vpop.f32.mrb[31].mxu1 }
 0x158   : > { %v3528_v57 = vpop.f32.mrb[40].mxu0  ;;  %v3427_v54 = vadd.f32 %v3426_v23, %v3425_v32 }
 0x159   : > { %v3529_v14 = vpop.f32.mrb[41].mxu0 }
 0x15a   : > { %v5509_v9 = vadd.f32 %v3529_v14, %v3528_v57  ;;  %v3428_v19 = vpop.f32.mrb[32].mxu1  ;;  %v5527_v12 = vadd.f32 %v3427_v54, %v5473_v43 }
 0x15b   : > { %v3429_v59 = vpop.f32.mrb[33].mxu1 }
 0x15c   : > { %v3531_v6 = vpop.f32.mrb[42].mxu0  ;;  %v3430_v3 = vadd.f32 %v3429_v59, %v3428_v19 }
 0x15d   : > { %v3532_v10 = vpop.f32.mrb[43].mxu0 }
 0x15e   : > { %v5514_v0 = vadd.f32 %v3532_v10, %v3531_v6  ;;  %v4007_v15 = vadd.f32 %v3430_v3, %v5475_v13  ;;  %v3431_v20 = vpop.f32.mrb[34].mxu1 }
 0x15f   : > { %v3432_v63 = vpop.f32.mrb[35].mxu1 }
 0x160   : > { %v3534_v41 = vpop.f32.mrb[44].mxu0  ;;  %v3433_v44 = vadd.f32 %v3432_v63, %v3431_v20 }
 0x161   : > { %v3535_v21 = vpop.f32.mrb[45].mxu0 }
 0x162   : > { %v5519_v51 = vadd.f32 %v3535_v21, %v3534_v41  ;;  %v4004_v39 = vadd.f32 %v3433_v44, %v5477_v16  ;;  %v3434_v7 = vpop.f32.mrb[36].mxu1 }
 0x163   : > { %v3435_v43 = vpop.f32.mrb[37].mxu1 }
 0x164   : > { %v3537_v45 = vpop.f32.mrb[46].mxu0  ;;  %v3436_v57 = vadd.f32 %v3435_v43, %v3434_v7 }
 0x165   : > { %v3538_v2 = vpop.f32.mrb[47].mxu0 }
 0x166   : > { %v5524_v28 = vadd.f32 %v3538_v2, %v3537_v45  ;;  %v4013_v13 = vadd.f32 %v3436_v57, %v5479_v48  ;;  %v3437_v46 = vpop.f32.mrb[38].mxu1 }
 0x167   : > { %v3438_v6 = vpop.f32.mrb[39].mxu1 }
 0x168   : > { %v3540_v17 = vpop.f32.mrb[48].mxu0  ;;  %v3439_v10 = vadd.f32 %v3438_v6, %v3437_v46 }
 0x169   : > { %v3541_v38 = vpop.f32.mrb[49].mxu0 }
 0x16a   : > { %v3542_v61 = vadd.f32 %v3541_v38, %v3540_v17  ;;  %v4010_v16 = vadd.f32 %v3439_v10, %v5481_v55  ;;  %v3440_v41 = vpop.f32.mrb[40].mxu1 }
 0x16b   : > { %v3441_v21 = vpop.f32.mrb[41].mxu1 }
 0x16c   : > { %v3543_v62 = vpop.f32.mrb[50].mxu0  ;;  %v5530_v47 = vadd.f32 %v4007_v15, %v3542_v61  ;;  %v3442_v58 = vadd.f32 %v3441_v21, %v3440_v41 }
 0x16d   : > { %v3544_v42 = vpop.f32.mrb[51].mxu0 }
 0x16e   : > { %v3545_v60 = vadd.f32 %v3544_v42, %v3543_v62  ;;  %v4019_v32 = vadd.f32 %v3442_v58, %v5483_v36  ;;  %v3443_v2 = vpop.f32.mrb[42].mxu1 }
 0x16f   : > { %v3444_v54 = vpop.f32.mrb[43].mxu1 }
 0x170   : > { %v3546_v35 = vpop.f32.mrb[52].mxu0  ;;  %v5533_v8 = vadd.f32 %v4004_v39, %v3545_v60  ;;  %v3445_v19 = vadd.f32 %v3444_v54, %v3443_v2 }
 0x171   : > { %v3547_v56 = vpop.f32.mrb[53].mxu0 }
 0x172   : > { %v3548_v30 = vadd.f32 %v3547_v56, %v3546_v35  ;;  %v4016_v59 = vadd.f32 %v3445_v19, %v5485_v37  ;;  %v3446_v61 = vpop.f32.mrb[44].mxu1 }
 0x173   : > { %v3447_v62 = vpop.f32.mrb[45].mxu1 }
 0x174   : > { %v3549_v14 = vpop.f32.mrb[54].mxu0  ;;  %v5536_v50 = vadd.f32 %v4013_v13, %v3548_v30  ;;  %v3448_v20 = vadd.f32 %v3447_v62, %v3446_v61 }
 0x175   : > { %v3550_v53 = vpop.f32.mrb[55].mxu0 }
 0x176   : > { %v3551_v49 = vadd.f32 %v3550_v53, %v3549_v14  ;;  %v4025_v63 = vadd.f32 %v3448_v20, %v5487_v33  ;;  %v3449_v60 = vpop.f32.mrb[46].mxu1 }
 0x177   : > { %v3450_v35 = vpop.f32.mrb[47].mxu1 }
 0x178   : > { %v3552_v27 = vpop.f32.mrb[56].mxu0  ;;  %v5539_v48 = vadd.f32 %v4010_v16, %v3551_v49  ;;  %v3451_v7 = vadd.f32 %v3450_v35, %v3449_v60 }
 0x179   : > { %v3553_v52 = vpop.f32.mrb[57].mxu0 }
 0x17a   : > { %v3554_v11 = vadd.f32 %v3553_v52, %v3552_v27  ;;  %v4022_v43 = vadd.f32 %v3451_v7, %v5489_v24  ;;  %v3686_v30 = vpop.f32.mrb[0].mxu1 }
 0x17b   : > { %v3973_v14 = vadd.f32 %v5497_v4, %v3686_v30  ;;  %v2103_v13 = vpop.f32.mrb[1].mxu1 }
 0x17c   : > { %v3555_v45 = vpop.f32.mrb[58].mxu0  ;;  %v5543_v55 = vadd.f32 %v4019_v32, %v3554_v11  ;;  %v3977_v33 = vadd.f32 %v5493_v5, %v2103_v13 }
 0x17d   : > { %v3556_v23 = vpop.f32.mrb[59].mxu0  ;;  %v3974_v53 = vadd.f32 %v3973_v14, %v5495_v22 }
 0x17e   : > { %v3557_v17 = vadd.f32 %v3556_v23, %v3555_v45  ;;  %v3689_v49 = vpop.f32.mrb[2].mxu1  ;;  %v3978_v10 = vadd.f32 %v3977_v33, %v5491_v18 }
 0x17f   : > { %v3981_v16 = vadd.f32 %v5507_v31, %v3689_v49  ;;  %v2113_v24 = vpop.f32.mrb[3].mxu1 }
 0x180   : > { %v3558_v38 = vpop.f32.mrb[60].mxu0  ;;  %v5550_v42 = vadd.f32 %v4016_v59, %v3557_v17  ;;  %v3985_v5 = vadd.f32 %v5502_v25, %v2113_v24 }
 0x181   : > { %v3559_v3 = vpop.f32.mrb[61].mxu0  ;;  %v3982_v52 = vadd.f32 %v3981_v16, %v5504_v29 }
 0x182   : > { %v3560_v15 = vadd.f32 %v3559_v3, %v3558_v38  ;;  %v3692_v18 = vpop.f32.mrb[4].mxu1  ;;  %v3986_v31 = vadd.f32 %v3985_v5, %v5499_v34 }
 0x183   : > { %v3989_v45 = vadd.f32 %v5517_v26, %v3692_v18  ;;  %v2123_v32 = vpop.f32.mrb[5].mxu1 }
 0x184   : > { %v3561_v36 = vpop.f32.mrb[62].mxu0  ;;  %v5553_v37 = vadd.f32 %v4025_v63, %v3560_v15  ;;  %v3993_v23 = vadd.f32 %v5512_v1, %v2123_v32 }
 0x185   : > { %v3562_v44 = vpop.f32.mrb[63].mxu0  ;;  %v3990_v29 = vadd.f32 %v3989_v45, %v5514_v0 }
 0x186   : > { %v3563_v39 = vadd.f32 %v3562_v44, %v3561_v36  ;;  %v3695_v19 = vpop.f32.mrb[6].mxu1  ;;  %v3994_v34 = vadd.f32 %v3993_v23, %v5509_v9 }
 0x187   : > { %v3997_v59 = vadd.f32 %v5527_v12, %v3695_v19  ;;  %v2133_v61 = vpop.f32.mrb[7].mxu1 }
 0x188   : > { %v3742_v56 = vpop.f32.mrb[64].mxu0  ;;  %v5558_v46 = vadd.f32 %v4022_v43, %v3563_v39  ;;  %v4001_v3 = vadd.f32 %v5522_v40, %v2133_v61 }
 0x189   : > { %v2442_v57 = vpop.f32.mrb[65].mxu0  ;;  %v3975_v41 = vadd.f32 %v3974_v53, %v3742_v56  ;;  %v3998_v15 = vadd.f32 %v3997_v59, %v5524_v28 }
 0x18a   : > { %v3979_v4 = vadd.f32 %v3978_v10, %v2442_v57  ;;  %v4002_v36 = vadd.f32 %v4001_v3, %v5519_v51 }
 0x18b   : > { %v2538_v22 = vmax.f32 %v3975_v41, 0.0 }
 0x18c   : > { %v3745_v6 = vpop.f32.mrb[66].mxu0  ;;  %v2537_v11 = vmax.f32 %v3979_v4, 0.0 }
 0x18d   : > { %v2452_v27 = vpop.f32.mrb[67].mxu0  ;;  %2554 = vst [vmem:[%s5566_s28 + $0x8] sm:$0xff] %v2538_v22  ;;  %v3983_v2 = vadd.f32 %v3982_v52, %v3745_v6 }
 0x18e   : > { %2553 = vst [vmem:[%s5566_s28] sm:$0xff] %v2537_v11  ;;  %v3987_v25 = vadd.f32 %v3986_v31, %v2452_v27 }
 0x18f   : > { %v2540_v54 = vmax.f32 %v3983_v2, 0.0 }
 0x190   : > { %v3748_v21 = vpop.f32.mrb[68].mxu0  ;;  %v2539_v38 = vmax.f32 %v3987_v25, 0.0 }
 0x191   : > { %v2462_v58 = vpop.f32.mrb[69].mxu0  ;;  %2556 = vst [vmem:[%s5566_s28 + $0x18] sm:$0xff] %v2540_v54  ;;  %v3991_v1 = vadd.f32 %v3990_v29, %v3748_v21 }
 0x192   : > { %2555 = vst [vmem:[%s5566_s28 + $0x10] sm:$0xff] %v2539_v38  ;;  %v3995_v62 = vadd.f32 %v3994_v34, %v2462_v58 }
 0x193   : > { %v2542_v0 = vmax.f32 %v3991_v1, 0.0 }
 0x194   : > { %v3751_v17 = vpop.f32.mrb[70].mxu0  ;;  %v2541_v20 = vmax.f32 %v3995_v62, 0.0 }
 0x195   : > { %v2472_v26 = vpop.f32.mrb[71].mxu0  ;;  %2558 = vst [vmem:[%s5566_s28 + $0x28] sm:$0xff] %v2542_v0  ;;  %v3999_v9 = vadd.f32 %v3998_v15, %v3751_v17 }
 0x196   : > { %2557 = vst [vmem:[%s5566_s28 + $0x20] sm:$0xff] %v2541_v20  ;;  %v4003_v12 = vadd.f32 %v4002_v36, %v2472_v26 }
 0x197   : > { %v2544_v63 = vmax.f32 %v3999_v9, 0.0 }
 0x198   : > { %v2543_v60 = vmax.f32 %v4003_v12, 0.0 }
 0x199   : > { %2560 = vst [vmem:[%s5566_s28 + $0x38] sm:$0xff] %v2544_v63 }
 0x19a   : > { %2559 = vst [vmem:[%s5566_s28 + $0x30] sm:$0xff] %v2543_v60  ;;  %v3754_v40 = vpop.f32.mrb[8].mxu1 }
 0x19b   : > { %v4006_v44 = vadd.f32 %v5533_v8, %v3754_v40  ;;  %v2482_v35 = vpop.f32.mrb[9].mxu1 }
 0x19c   : > { %v4009_v28 = vadd.f32 %v5530_v47, %v2482_v35 }
 0x19d   : > { %v2546_v39 = vmax.f32 %v4006_v44, 0.0 }
 0x19e   : > { %v2545_v51 = vmax.f32 %v4009_v28, 0.0  ;;  %v3757_v7 = vpop.f32.mrb[10].mxu1 }
 0x19f   : > { %2562 = vst [vmem:[%s5566_s28 + $0x48] sm:$0xff] %v2546_v39  ;;  %v4012_v56 = vadd.f32 %v5539_v48, %v3757_v7  ;;  %v2492_v43 = vpop.f32.mrb[11].mxu1 }
 0x1a0   : > { %2561 = vst [vmem:[%s5566_s28 + $0x40] sm:$0xff] %v2545_v51  ;;  %v4015_v30 = vadd.f32 %v5536_v50, %v2492_v43 }
 0x1a1   : > { %v2548_v57 = vmax.f32 %v4012_v56, 0.0 }
 0x1a2   : > { %v2547_v14 = vmax.f32 %v4015_v30, 0.0  ;;  %v3760_v13 = vpop.f32.mrb[12].mxu1 }
 0x1a3   : > { %2564 = vst [vmem:[%s5566_s28 + $0x58] sm:$0xff] %v2548_v57  ;;  %v4018_v47 = vadd.f32 %v5550_v42, %v3760_v13  ;;  %v2502_v8 = vpop.f32.mrb[13].mxu1 }
 0x1a4   : > { %2563 = vst [vmem:[%s5566_s28 + $0x50] sm:$0xff] %v2547_v14  ;;  %v4021_v33 = vadd.f32 %v5543_v55, %v2502_v8 }
 0x1a5   : > { %v2550_v53 = vmax.f32 %v4018_v47, 0.0 }
 0x1a6   : > { %v2549_v6 = vmax.f32 %v4021_v33, 0.0  ;;  %v3763_v48 = vpop.f32.mrb[14].mxu1 }
 0x1a7   : > { %2566 = vst [vmem:[%s5566_s28 + $0x68] sm:$0xff] %v2550_v53  ;;  %v4024_v49 = vadd.f32 %v5558_v46, %v3763_v48  ;;  %v2512_v10 = vpop.f32.mrb[15].mxu1 }
 0x1a8   : > { %2565 = vst [vmem:[%s5566_s28 + $0x60] sm:$0xff] %v2549_v6  ;;  %v4027_v50 = vadd.f32 %v5553_v37, %v2512_v10 }
 0x1a9   : > { %v2552_v27 = vmax.f32 %v4024_v49, 0.0 }
 0x1aa   : > { %v2551_v16 = vmax.f32 %v4027_v50, 0.0 }
 0x1ab   : > { %2568 = vst [vmem:[%s5566_s28 + $0x78] sm:$0xff] %v2552_v27 }
 0x1ac   : > { %2567 = vst [vmem:[%s5566_s28 + $0x70] sm:$0xff] %v2551_v16 }
 0x1ad PF: > { %s5658_s18 = sld [smem:[#allocation4_spill]]  ;;  %s5659_s25 = sld [smem:[#allocation2_spill]] }
 0x1ae   : > { %s5660_s26 = sld [smem:[#allocation3_spill]]  ;;  %s5661_s27 = sld [smem:[#allocation5_spill]] }
 0x1af   : > { %s5662_s28 = sld [smem:[#allocation6_spill]] }
 0x1b3   : > { %s23_s29 = sadd.s32 1, %s5658_s18  }
 0x1b4   : > { %p20_p6 = scmp.ge.s32.totalorder %s23_s29, 6  }
 0x1b6   :  { %22 = sbr.rel (!%p20_p6) target bundleno = 3 (0x3), region = 131 }

</bundles_post_ra>
